<compile_context>
chip_gen: v6e
topology: v6e:2x2x1
jax: 0.10.0
libtpu: 0.0.40
codegen_flags: <defaults>
</compile_context>

<pallas_src>
import functools

import jax
import jax.numpy as jnp
from jax.experimental import pallas as pl
from jax.experimental.pallas import tpu as pltpu


def _round_up(x, m):
    return ((x + m - 1) // m) * m


# ------------------------------ fused kernel ------------------------------- #

def _fused_kernel(x_ref, w1_ref, w2_ref, w3_ref,
                  wf1_ref, b1_ref, wf2_ref, b2_ref,
                  o_ref, act1_ref, act2_ref,
                  *, bblk, h, wpad, ho3, wo3):
    """Whole forward pass for a block of `bblk` images.

    x_ref : (bblk, h*wpad, cin) bf16   raw NHWC images, width padded to wpad
    w{1,2,3}_ref : (3, 3*Cin_l, Cout_l) bf16   conv weights, rows ordered (kw, cin)
    wf{1,2}_ref : (C3, C3)/(C3, D) bf16 ; b{1,2}_ref : (1, C3)/(1, D) f32
    o_ref : (1, bblk, D) f32
    act{1,2}_ref : VMEM scratch, kw-expanded activations (rows, 3*C_l) bf16
    """
    f32 = jnp.float32
    cin = x_ref.shape[-1]
    c1 = w1_ref.shape[-1]
    c2 = w2_ref.shape[-1]
    c3 = w3_ref.shape[-1]
    pimg = h * wpad
    m_total = bblk * pimg                 # rows of the stacked image block
    m1 = m_total - (2 * wpad + 2)         # conv1 output rows (taps stay in-bounds)
    m2 = m_total - 2 * wpad               # conv2 output rows
    mx = m_total - 2                      # rows of the kw-expanded input view

    # ---------------- conv1 + ReLU (K = 3*cin, one matmul per kh) ------------ #
    x = x_ref[...].reshape(m_total, cin)
    # kw-expanded input view: xx[r, kw*cin + c] = x[r + kw, c]
    xx = jnp.concatenate([x[kw:kw + mx, :] for kw in range(3)], axis=-1)
    a1 = jnp.dot(xx[0:m1, :], w1_ref[0], preferred_element_type=f32)
    a1 = a1 + jnp.dot(xx[wpad:wpad + m1, :], w1_ref[1], preferred_element_type=f32)
    a1 = a1 + jnp.dot(xx[2 * wpad:2 * wpad + m1, :], w1_ref[2],
                      preferred_element_type=f32)
    a1 = jnp.maximum(a1, 0.0).astype(act1_ref.dtype)                  # (m1, c1)

    # Zero the tail rows FIRST (garbage-position taps read them), then store the
    # kw-expanded layout: act1[r, kw*c1 + c] = a1[r + kw, c].
    act1_ref[m1 - 2:, :] = jnp.zeros(
        (act1_ref.shape[0] - (m1 - 2), act1_ref.shape[1]), act1_ref.dtype)
    for kw in range(3):
        act1_ref[0:m1 - kw, kw * c1:(kw + 1) * c1] = a1[kw:m1, :]

    # ---------------- conv2 + ReLU (K = 3*c1) -------------------------------- #
    a2 = jnp.dot(act1_ref[0:m2, :], w2_ref[0], preferred_element_type=f32)
    a2 = a2 + jnp.dot(act1_ref[wpad:wpad + m2, :], w2_ref[1],
                      preferred_element_type=f32)
    a2 = a2 + jnp.dot(act1_ref[2 * wpad:2 * wpad + m2, :], w2_ref[2],
                      preferred_element_type=f32)
    a2 = jnp.maximum(a2, 0.0).astype(act2_ref.dtype)                  # (m2, c2)

    act2_ref[m2 - 2:, :] = jnp.zeros(
        (act2_ref.shape[0] - (m2 - 2), act2_ref.shape[1]), act2_ref.dtype)
    for kw in range(3):
        act2_ref[0:m2 - kw, kw * c2:(kw + 1) * c2] = a2[kw:m2, :]

    # ---------------- conv3 + ReLU (K = 3*c2), full m_total rows ------------- #
    a3 = jnp.dot(act2_ref[0:m_total, :], w3_ref[0], preferred_element_type=f32)
    a3 = a3 + jnp.dot(act2_ref[wpad:wpad + m_total, :], w3_ref[1],
                      preferred_element_type=f32)
    a3 = a3 + jnp.dot(act2_ref[2 * wpad:2 * wpad + m_total, :], w3_ref[2],
                      preferred_element_type=f32)
    a3 = jnp.maximum(a3, 0.0)                                          # (m_total, c3) f32

    # ---------------- masked global average pool (per image) ----------------- #
    # TODO(synk): could be a (bblk, m_total) x (m_total, c3) MXU matmul with a
    # precomputed selection matrix if the epilogue ever shows up in profiles.
    a3v = a3.reshape(bblk, pimg, c3)
    row = jax.lax.broadcasted_iota(jnp.int32, (1, pimg, c3), 1)
    if (wpad & (wpad - 1)) == 0:
        col = jnp.bitwise_and(row, wpad - 1)
    else:
        col = jax.lax.rem(row, wpad)
    valid = jnp.logical_and(row < ho3 * wpad, col < wo3)
    pooled = jnp.sum(jnp.where(valid, a3v, 0.0), axis=1)
    pooled = pooled * (1.0 / float(ho3 * wo3))                         # (bblk, c3) f32

    # ---------------- MLP head + F.normalize (f32) --------------------------- #
    hid = jnp.dot(pooled.astype(wf1_ref.dtype), wf1_ref[...],
                  preferred_element_type=f32) + b1_ref[...]
    hid = jnp.maximum(hid, 0.0)
    y = jnp.dot(hid.astype(wf2_ref.dtype), wf2_ref[...],
                preferred_element_type=f32) + b2_ref[...]
    ss = jnp.sum(y * y, axis=-1, keepdims=True)
    # y * rsqrt(max(ss, eps^2)) == y / max(||y||, eps) with eps = 1e-12 (torch).
    o_ref[0] = y * jax.lax.rsqrt(jnp.maximum(ss, 1e-24))


# ------------------------------- wrapper ------------------------------------ #

def cnn_projection_forward(x_nchw, kparams, *, block_b=8):
    """Forward pass of CNNProjectionNetwork.  x_nchw: (N, Cin, H, W) float32.

    `kparams` must come from prepare_params() (bf16, kernel layouts), built once
    outside the jitted call.  block_b is the number of images per grid step; the
    default (8) keeps VMEM well under the 32 MiB scoped limit even on v7x at
    16x16 inputs — re-derive it for large spatial sizes.
    """
    n, cin, hdim, wdim = x_nchw.shape
    assert hdim >= 7 and wdim >= 7, "three VALID 3x3 convs need >= 7x7 input"
    ho3, wo3 = hdim - 6, wdim - 6
    wpad = _round_up(wdim, 8)             # padded row stride shared by all layers
    pimg = hdim * wpad

    c1 = kparams["w_conv1"].shape[-1]
    c2 = kparams["w_conv2"].shape[-1]
    dout = kparams["w2"].shape[-1]

    # Batch block: amortize per-step overhead, but keep >= 2 grid steps when
    # possible so megacore / both v7x TensorCores get work.
    bblk = max(1, min(block_b, (n + 1) // 2))
    nblk = -(-n // bblk)
    npad = nblk * bblk

    # Only glue on the raw input: NCHW -> NHWC + bf16 cast (fused by XLA), pad
    # width to wpad (no-op when W is already a multiple of 8) and batch to npad.
    x = jnp.transpose(x_nchw, (0, 2, 3, 1)).astype(jnp.bfloat16)
    pad_n, pad_w = npad - n, wpad - wdim
    if pad_n or pad_w:
        x = jnp.pad(x, ((0, pad_n), (0, 0), (0, pad_w), (0, 0)))
    x = x.reshape(npad, pimg, cin)

    m_total = bblk * pimg
    act1_rows = m_total                    # conv2 reads rows [0, m_total)
    act2_rows = m_total + 2 * wpad         # conv3 reads rows [0, m_total + 2*wpad)

    kernel = functools.partial(_fused_kernel, bblk=bblk, h=hdim, wpad=wpad,
                               ho3=ho3, wo3=wo3)

    out = pl.pallas_call(
        kernel,
        out_shape=jax.ShapeDtypeStruct((nblk, bblk, dout), jnp.float32),
        grid=(nblk,),
        in_specs=[
            pl.BlockSpec((bblk, pimg, cin), lambda g: (g, 0, 0)),
            pl.BlockSpec(kparams["w_conv1"].shape, lambda g: (0, 0, 0)),
            pl.BlockSpec(kparams["w_conv2"].shape, lambda g: (0, 0, 0)),
            pl.BlockSpec(kparams["w_conv3"].shape, lambda g: (0, 0, 0)),
            pl.BlockSpec(kparams["w1"].shape, lambda g: (0, 0)),
            pl.BlockSpec(kparams["b1"].shape, lambda g: (0, 0)),
            pl.BlockSpec(kparams["w2"].shape, lambda g: (0, 0)),
            pl.BlockSpec(kparams["b2"].shape, lambda g: (0, 0)),
        ],
        out_specs=pl.BlockSpec((1, bblk, dout), lambda g: (g, 0, 0)),
        scratch_shapes=[
            pltpu.VMEM((act1_rows, 3 * c1), jnp.bfloat16),   # kw-expanded act1
            pltpu.VMEM((act2_rows, 3 * c2), jnp.bfloat16),   # kw-expanded act2
        ],
        compiler_params=pltpu.CompilerParams(
            dimension_semantics=("parallel",)),
    )(x, kparams["w_conv1"], kparams["w_conv2"], kparams["w_conv3"],
      kparams["w1"], kparams["b1"], kparams["w2"], kparams["b2"])

    return out.reshape(npad, dout)[:n]


# --------------------------- parameters / reference ------------------------- #

def init_params(key, in_channels, hidden_dim=32, output_dim=128):
    """Deterministic synthetic parameters in canonical f32 layouts."""
    ks = jax.random.split(key, 7)

    def wgt(k, shape, fan_in):
        return jax.random.normal(k, shape, jnp.float32) / jnp.sqrt(float(fan_in))

    c1, c2, c3 = hidden_dim, hidden_dim * 2, hidden_dim * 4
    return {
        # Conv weights HWIO (3,3,Cin,Cout); bias=False, like the torch module.
        "w_conv1": wgt(ks[0], (3, 3, in_channels, c1), 9 * in_channels),
        "w_conv2": wgt(ks[1], (3, 3, c1, c2), 9 * c1),
        "w_conv3": wgt(ks[2], (3, 3, c2, c3), 9 * c2),
        # MLP: Linear(c3, c3) -> ReLU -> Linear(c3, output_dim), stored (in, out).
        "w1": wgt(ks[3], (c3, c3), c3),
        "b1": wgt(ks[4], (c3,), c3),
        "w2": wgt(ks[5], (c3, output_dim), c3),
        "b2": wgt(ks[6], (output_dim,), output_dim),
    }


def prepare_params(p):
    """One-time cast / layout packing for the kernel (run OUTSIDE the jitted fwd)."""
    def conv_w(w):
        kh, kw, ci, co = w.shape
        # (kh, kw, ci, co) -> (kh, kw*ci, co): per-kh K axis ordered (kw, cin),
        # matching the kw-expanded activation layout used inside the kernel.
        return w.reshape(kh, kw * ci, co).astype(jnp.bfloat16)

    return {
        "w_conv1": conv_w(p["w_conv1"]),
        "w_conv2": conv_w(p["w_conv2"]),
        "w_conv3": conv_w(p["w_conv3"]),
        "w1": p["w1"].astype(jnp.bfloat16),
        "b1": p["b1"].reshape(1, -1).astype(jnp.float32),
        "w2": p["w2"].astype(jnp.bfloat16),
        "b2": p["b2"].reshape(1, -1).astype(jnp.float32),
    }


def reference_forward(x_nchw, params):
    """Pure-JAX f32 reference matching the PyTorch semantics."""
    x = jnp.transpose(x_nchw, (0, 2, 3, 1))

    def conv(x, w4):
        y = jax.lax.conv_general_dilated(
            x, w4, window_strides=(1, 1), padding="VALID",
            dimension_numbers=("NHWC", "HWIO", "NHWC"))
        return jnp.maximum(y, 0.0)

    x = conv(x, params["w_conv1"])
    x = conv(x, params["w_conv2"])
    x = conv(x, params["w_conv3"])
    pooled = jnp.mean(x, axis=(1, 2))
    h = jnp.maximum(pooled @ params["w1"] + params["b1"], 0.0)
    y = h @ params["w2"] + params["b2"]
    return y / jnp.maximum(jnp.linalg.norm(y, axis=-1, keepdims=True), 1e-12)


# ----------------------------------- main ------------------------------------ #

if __name__ == "__main__":
    key = jax.random.PRNGKey(0)
    kx, kp = jax.random.split(key)

    in_channels, hidden_dim, output_dim = 4, 32, 128
    # NCHW, like the PyTorch module's input.
    x = jax.random.normal(kx, (2, in_channels, 16, 16), jnp.float32)

    params = init_params(kp, in_channels, hidden_dim, output_dim)
    kparams = prepare_params(params)              # cast / pack once, outside jit

    fwd = jax.jit(lambda xx: cnn_projection_forward(xx, kparams))
    out = jax.block_until_ready(fwd(x))

    ref = reference_forward(x, params)
    assert out.shape == (2, output_dim), out.shape
    # bf16 MXU inputs with f32 accumulation / normalize vs. a pure-f32 reference.
    err = float(jnp.max(jnp.abs(out - ref)))
    assert jnp.allclose(out, ref, atol=2e-2, rtol=2e-2), err

    print("KERNEL_OK")
</pallas_src>

<mosaic_0001>
module attributes {stable_mosaic.version = 11 : i64} {
  func.func @_fused_kernel(%arg0: i32, %arg1: memref<1x256x4xbf16, #tpu.memory_space<vmem>>, %arg2: memref<3x12x32xbf16, #tpu.memory_space<vmem>>, %arg3: memref<3x96x64xbf16, #tpu.memory_space<vmem>>, %arg4: memref<3x192x128xbf16, #tpu.memory_space<vmem>>, %arg5: memref<128x128xbf16, #tpu.memory_space<vmem>>, %arg6: memref<1x128xf32, #tpu.memory_space<vmem>>, %arg7: memref<128x128xbf16, #tpu.memory_space<vmem>>, %arg8: memref<1x128xf32, #tpu.memory_space<vmem>>, %arg9: memref<1x1x128xf32, #tpu.memory_space<vmem>>, %arg10: memref<256x96xbf16, #tpu.memory_space<vmem>>, %arg11: memref<288x192xbf16, #tpu.memory_space<vmem>>) attributes {dimension_semantics = [#tpu.dimension_semantics<parallel>], iteration_bounds = array<i64: 2>, scalar_prefetch = 0 : i64, scratch_operands = 2 : i64, tpu.core_type = #tpu.core_type<tc>, window_params = [{transform_indices = @transform_0, window_bounds = array<i64: 1, 256, 4>}, {pipeline_mode = #tpu.pipeline_mode<synchronous>, transform_indices = @transform_1, window_bounds = array<i64: 3, 12, 32>}, {pipeline_mode = #tpu.pipeline_mode<synchronous>, transform_indices = @transform_2, window_bounds = array<i64: 3, 96, 64>}, {pipeline_mode = #tpu.pipeline_mode<synchronous>, transform_indices = @transform_3, window_bounds = array<i64: 3, 192, 128>}, {pipeline_mode = #tpu.pipeline_mode<synchronous>, transform_indices = @transform_4, window_bounds = array<i64: 128, 128>}, {pipeline_mode = #tpu.pipeline_mode<synchronous>, transform_indices = @transform_5, window_bounds = array<i64: 1, 128>}, {pipeline_mode = #tpu.pipeline_mode<synchronous>, transform_indices = @transform_6, window_bounds = array<i64: 128, 128>}, {pipeline_mode = #tpu.pipeline_mode<synchronous>, transform_indices = @transform_7, window_bounds = array<i64: 1, 128>}, {transform_indices = @transform_8, window_bounds = array<i64: 1, 1, 128>}]} {
    %c0 = arith.constant 0 : index
    %c0_0 = arith.constant 0 : index
    %c0_1 = arith.constant 0 : index
    %0 = vector.load %arg1[%c0, %c0_0, %c0_1] : memref<1x256x4xbf16, #tpu.memory_space<vmem>>, vector<1x256x4xbf16>
    %1 = vector.shape_cast %0 : vector<1x256x4xbf16> to vector<256x4xbf16>
    %2 = vector.extract_strided_slice %1 {offsets = [0, 0], sizes = [254, 4], strides = [1, 1]} : vector<256x4xbf16> to vector<254x4xbf16>
    %3 = vector.extract_strided_slice %1 {offsets = [1, 0], sizes = [254, 4], strides = [1, 1]} : vector<256x4xbf16> to vector<254x4xbf16>
    %4 = vector.extract_strided_slice %1 {offsets = [2, 0], sizes = [254, 4], strides = [1, 1]} : vector<256x4xbf16> to vector<254x4xbf16>
    %5 = tpu.concatenate %2, %3, %4 in 1 : vector<254x4xbf16>, vector<254x4xbf16>, vector<254x4xbf16> -> vector<254x12xbf16>
    %6 = vector.extract_strided_slice %5 {offsets = [0, 0], sizes = [222, 12], strides = [1, 1]} : vector<254x12xbf16> to vector<222x12xbf16>
    %c0_2 = arith.constant 0 : index
    %c0_3 = arith.constant 0 : index
    %c0_4 = arith.constant 0 : index
    %7 = vector.load %arg2[%c0_2, %c0_3, %c0_4] : memref<3x12x32xbf16, #tpu.memory_space<vmem>>, vector<1x12x32xbf16>
    %8 = vector.shape_cast %7 : vector<1x12x32xbf16> to vector<12x32xbf16>
    %cst = arith.constant dense<0.000000e+00> : vector<222x32xf32>
    %9 = tpu.matmul %6, %8, %cst {dimension_numbers = #tpu.dot_dimension_numbers<[1], [0], [0], [1], [0, 0, 1, 1], [], []>} : vector<222x12xbf16>, vector<12x32xbf16>, vector<222x32xf32> -> vector<222x32xf32>
    %10 = vector.extract_strided_slice %5 {offsets = [16, 0], sizes = [222, 12], strides = [1, 1]} : vector<254x12xbf16> to vector<222x12xbf16>
    %c1 = arith.constant 1 : index
    %c0_5 = arith.constant 0 : index
    %c0_6 = arith.constant 0 : index
    %11 = vector.load %arg2[%c1, %c0_5, %c0_6] : memref<3x12x32xbf16, #tpu.memory_space<vmem>>, vector<1x12x32xbf16>
    %12 = vector.shape_cast %11 : vector<1x12x32xbf16> to vector<12x32xbf16>
    %cst_7 = arith.constant dense<0.000000e+00> : vector<222x32xf32>
    %13 = tpu.matmul %10, %12, %cst_7 {dimension_numbers = #tpu.dot_dimension_numbers<[1], [0], [0], [1], [0, 0, 1, 1], [], []>} : vector<222x12xbf16>, vector<12x32xbf16>, vector<222x32xf32> -> vector<222x32xf32>
    %14 = arith.addf %9, %13 : vector<222x32xf32>
    %15 = vector.extract_strided_slice %5 {offsets = [32, 0], sizes = [222, 12], strides = [1, 1]} : vector<254x12xbf16> to vector<222x12xbf16>
    %c2 = arith.constant 2 : index
    %c0_8 = arith.constant 0 : index
    %c0_9 = arith.constant 0 : index
    %16 = vector.load %arg2[%c2, %c0_8, %c0_9] : memref<3x12x32xbf16, #tpu.memory_space<vmem>>, vector<1x12x32xbf16>
    %17 = vector.shape_cast %16 : vector<1x12x32xbf16> to vector<12x32xbf16>
    %cst_10 = arith.constant dense<0.000000e+00> : vector<222x32xf32>
    %18 = tpu.matmul %15, %17, %cst_10 {dimension_numbers = #tpu.dot_dimension_numbers<[1], [0], [0], [1], [0, 0, 1, 1], [], []>} : vector<222x12xbf16>, vector<12x32xbf16>, vector<222x32xf32> -> vector<222x32xf32>
    %19 = arith.addf %14, %18 : vector<222x32xf32>
    %cst_11 = arith.constant 0.000000e+00 : f32
    %20 = vector.broadcast %cst_11 : f32 to vector<222x32xf32>
    %21 = arith.maximumf %19, %20 : vector<222x32xf32>
    %22 = arith.truncf %21 : vector<222x32xf32> to vector<222x32xbf16>
    %cst_12 = arith.constant 0.000000e+00 : bf16
    %23 = vector.broadcast %cst_12 : bf16 to vector<36x96xbf16>
    %c220 = arith.constant 220 : index
    %c0_13 = arith.constant 0 : index
    %24 = vector.load %arg10[%c220, %c0_13] : memref<256x96xbf16, #tpu.memory_space<vmem>>, vector<36x96xbf16>
    tpu.vector_store %arg10[%c220, %c0_13], %23 {strides = array<i32>} : memref<256x96xbf16, #tpu.memory_space<vmem>>, vector<36x96xbf16>,
    %c0_14 = arith.constant 0 : index
    %c0_15 = arith.constant 0 : index
    %25 = vector.load %arg10[%c0_14, %c0_15] : memref<256x96xbf16, #tpu.memory_space<vmem>>, vector<222x32xbf16>
    tpu.vector_store %arg10[%c0_14, %c0_15], %22 {strides = array<i32>} : memref<256x96xbf16, #tpu.memory_space<vmem>>, vector<222x32xbf16>,
    %26 = vector.extract_strided_slice %22 {offsets = [1, 0], sizes = [221, 32], strides = [1, 1]} : vector<222x32xbf16> to vector<221x32xbf16>
    %c0_16 = arith.constant 0 : index
    %c32 = arith.constant 32 : index
    %27 = vector.load %arg10[%c0_16, %c32] : memref<256x96xbf16, #tpu.memory_space<vmem>>, vector<221x32xbf16>
    tpu.vector_store %arg10[%c0_16, %c32], %26 {strides = array<i32>} : memref<256x96xbf16, #tpu.memory_space<vmem>>, vector<221x32xbf16>,
    %28 = vector.extract_strided_slice %22 {offsets = [2, 0], sizes = [220, 32], strides = [1, 1]} : vector<222x32xbf16> to vector<220x32xbf16>
    %c0_17 = arith.constant 0 : index
    %c64 = arith.constant 64 : index
    %29 = vector.load %arg10[%c0_17, %c64] : memref<256x96xbf16, #tpu.memory_space<vmem>>, vector<220x32xbf16>
    tpu.vector_store %arg10[%c0_17, %c64], %28 {strides = array<i32>} : memref<256x96xbf16, #tpu.memory_space<vmem>>, vector<220x32xbf16>,
    %c0_18 = arith.constant 0 : index
    %c0_19 = arith.constant 0 : index
    %30 = vector.load %arg10[%c0_18, %c0_19] : memref<256x96xbf16, #tpu.memory_space<vmem>>, vector<224x96xbf16>
    %c0_20 = arith.constant 0 : index
    %c0_21 = arith.constant 0 : index
    %c0_22 = arith.constant 0 : index
    %31 = vector.load %arg3[%c0_20, %c0_21, %c0_22] : memref<3x96x64xbf16, #tpu.memory_space<vmem>>, vector<1x96x64xbf16>
    %32 = vector.shape_cast %31 : vector<1x96x64xbf16> to vector<96x64xbf16>
    %cst_23 = arith.constant dense<0.000000e+00> : vector<224x64xf32>
    %33 = tpu.matmul %30, %32, %cst_23 {dimension_numbers = #tpu.dot_dimension_numbers<[1], [0], [0], [1], [0, 0, 1, 1], [], []>} : vector<224x96xbf16>, vector<96x64xbf16>, vector<224x64xf32> -> vector<224x64xf32>
    %c16 = arith.constant 16 : index
    %c0_24 = arith.constant 0 : index
    %34 = vector.load %arg10[%c16, %c0_24] : memref<256x96xbf16, #tpu.memory_space<vmem>>, vector<224x96xbf16>
    %c1_25 = arith.constant 1 : index
    %c0_26 = arith.constant 0 : index
    %c0_27 = arith.constant 0 : index
    %35 = vector.load %arg3[%c1_25, %c0_26, %c0_27] : memref<3x96x64xbf16, #tpu.memory_space<vmem>>, vector<1x96x64xbf16>
    %36 = vector.shape_cast %35 : vector<1x96x64xbf16> to vector<96x64xbf16>
    %cst_28 = arith.constant dense<0.000000e+00> : vector<224x64xf32>
    %37 = tpu.matmul %34, %36, %cst_28 {dimension_numbers = #tpu.dot_dimension_numbers<[1], [0], [0], [1], [0, 0, 1, 1], [], []>} : vector<224x96xbf16>, vector<96x64xbf16>, vector<224x64xf32> -> vector<224x64xf32>
    %38 = arith.addf %33, %37 : vector<224x64xf32>
    %c32_29 = arith.constant 32 : index
    %c0_30 = arith.constant 0 : index
    %39 = vector.load %arg10[%c32_29, %c0_30] : memref<256x96xbf16, #tpu.memory_space<vmem>>, vector<224x96xbf16>
    %c2_31 = arith.constant 2 : index
    %c0_32 = arith.constant 0 : index
    %c0_33 = arith.constant 0 : index
    %40 = vector.load %arg3[%c2_31, %c0_32, %c0_33] : memref<3x96x64xbf16, #tpu.memory_space<vmem>>, vector<1x96x64xbf16>
    %41 = vector.shape_cast %40 : vector<1x96x64xbf16> to vector<96x64xbf16>
    %cst_34 = arith.constant dense<0.000000e+00> : vector<224x64xf32>
    %42 = tpu.matmul %39, %41, %cst_34 {dimension_numbers = #tpu.dot_dimension_numbers<[1], [0], [0], [1], [0, 0, 1, 1], [], []>} : vector<224x96xbf16>, vector<96x64xbf16>, vector<224x64xf32> -> vector<224x64xf32>
    %43 = arith.addf %38, %42 : vector<224x64xf32>
    %cst_35 = arith.constant 0.000000e+00 : f32
    %44 = vector.broadcast %cst_35 : f32 to vector<224x64xf32>
    %45 = arith.maximumf %43, %44 : vector<224x64xf32>
    %46 = arith.truncf %45 : vector<224x64xf32> to vector<224x64xbf16>
    %cst_36 = arith.constant 0.000000e+00 : bf16
    %47 = vector.broadcast %cst_36 : bf16 to vector<66x192xbf16>
    %c222 = arith.constant 222 : index
    %c0_37 = arith.constant 0 : index
    %48 = vector.load %arg11[%c222, %c0_37] : memref<288x192xbf16, #tpu.memory_space<vmem>>, vector<66x192xbf16>
    tpu.vector_store %arg11[%c222, %c0_37], %47 {strides = array<i32>} : memref<288x192xbf16, #tpu.memory_space<vmem>>, vector<66x192xbf16>,
    %c0_38 = arith.constant 0 : index
    %c0_39 = arith.constant 0 : index
    %49 = vector.load %arg11[%c0_38, %c0_39] : memref<288x192xbf16, #tpu.memory_space<vmem>>, vector<224x64xbf16>
    tpu.vector_store %arg11[%c0_38, %c0_39], %46 {strides = array<i32>} : memref<288x192xbf16, #tpu.memory_space<vmem>>, vector<224x64xbf16>,
    %50 = vector.extract_strided_slice %46 {offsets = [1, 0], sizes = [223, 64], strides = [1, 1]} : vector<224x64xbf16> to vector<223x64xbf16>
    %c0_40 = arith.constant 0 : index
    %c64_41 = arith.constant 64 : index
    %51 = vector.load %arg11[%c0_40, %c64_41] : memref<288x192xbf16, #tpu.memory_space<vmem>>, vector<223x64xbf16>
    tpu.vector_store %arg11[%c0_40, %c64_41], %50 {strides = array<i32>} : memref<288x192xbf16, #tpu.memory_space<vmem>>, vector<223x64xbf16>,
    %52 = vector.extract_strided_slice %46 {offsets = [2, 0], sizes = [222, 64], strides = [1, 1]} : vector<224x64xbf16> to vector<222x64xbf16>
    %c0_42 = arith.constant 0 : index
    %c128 = arith.constant 128 : index
    %53 = vector.load %arg11[%c0_42, %c128] : memref<288x192xbf16, #tpu.memory_space<vmem>>, vector<222x64xbf16>
    tpu.vector_store %arg11[%c0_42, %c128], %52 {strides = array<i32>} : memref<288x192xbf16, #tpu.memory_space<vmem>>, vector<222x64xbf16>,
    %c0_43 = arith.constant 0 : index
    %c0_44 = arith.constant 0 : index
    %54 = vector.load %arg11[%c0_43, %c0_44] : memref<288x192xbf16, #tpu.memory_space<vmem>>, vector<256x192xbf16>
    %c0_45 = arith.constant 0 : index
    %c0_46 = arith.constant 0 : index
    %c0_47 = arith.constant 0 : index
    %55 = vector.load %arg4[%c0_45, %c0_46, %c0_47] : memref<3x192x128xbf16, #tpu.memory_space<vmem>>, vector<1x192x128xbf16>
    %56 = vector.shape_cast %55 : vector<1x192x128xbf16> to vector<192x128xbf16>
    %cst_48 = arith.constant dense<0.000000e+00> : vector<256x128xf32>
    %57 = tpu.matmul %54, %56, %cst_48 {dimension_numbers = #tpu.dot_dimension_numbers<[1], [0], [0], [1], [0, 0, 1, 1], [], []>} : vector<256x192xbf16>, vector<192x128xbf16>, vector<256x128xf32> -> vector<256x128xf32>
    %c16_49 = arith.constant 16 : index
    %c0_50 = arith.constant 0 : index
    %58 = vector.load %arg11[%c16_49, %c0_50] : memref<288x192xbf16, #tpu.memory_space<vmem>>, vector<256x192xbf16>
    %c1_51 = arith.constant 1 : index
    %c0_52 = arith.constant 0 : index
    %c0_53 = arith.constant 0 : index
    %59 = vector.load %arg4[%c1_51, %c0_52, %c0_53] : memref<3x192x128xbf16, #tpu.memory_space<vmem>>, vector<1x192x128xbf16>
    %60 = vector.shape_cast %59 : vector<1x192x128xbf16> to vector<192x128xbf16>
    %cst_54 = arith.constant dense<0.000000e+00> : vector<256x128xf32>
    %61 = tpu.matmul %58, %60, %cst_54 {dimension_numbers = #tpu.dot_dimension_numbers<[1], [0], [0], [1], [0, 0, 1, 1], [], []>} : vector<256x192xbf16>, vector<192x128xbf16>, vector<256x128xf32> -> vector<256x128xf32>
    %62 = arith.addf %57, %61 : vector<256x128xf32>
    %c32_55 = arith.constant 32 : index
    %c0_56 = arith.constant 0 : index
    %63 = vector.load %arg11[%c32_55, %c0_56] : memref<288x192xbf16, #tpu.memory_space<vmem>>, vector<256x192xbf16>
    %c2_57 = arith.constant 2 : index
    %c0_58 = arith.constant 0 : index
    %c0_59 = arith.constant 0 : index
    %64 = vector.load %arg4[%c2_57, %c0_58, %c0_59] : memref<3x192x128xbf16, #tpu.memory_space<vmem>>, vector<1x192x128xbf16>
    %65 = vector.shape_cast %64 : vector<1x192x128xbf16> to vector<192x128xbf16>
    %cst_60 = arith.constant dense<0.000000e+00> : vector<256x128xf32>
    %66 = tpu.matmul %63, %65, %cst_60 {dimension_numbers = #tpu.dot_dimension_numbers<[1], [0], [0], [1], [0, 0, 1, 1], [], []>} : vector<256x192xbf16>, vector<192x128xbf16>, vector<256x128xf32> -> vector<256x128xf32>
    %67 = arith.addf %62, %66 : vector<256x128xf32>
    %cst_61 = arith.constant 0.000000e+00 : f32
    %68 = vector.broadcast %cst_61 : f32 to vector<256x128xf32>
    %69 = arith.maximumf %67, %68 : vector<256x128xf32>
    %70 = vector.shape_cast %69 : vector<256x128xf32> to vector<1x256x128xf32>
    %71 = tpu.iota {dimensions = array<i32: 1>} : vector<1x256x128xi32>
    %c15_i32 = arith.constant 15 : i32
    %72 = vector.broadcast %c15_i32 : i32 to vector<1x256x128xi32>
    %73 = arith.andi %71, %72 : vector<1x256x128xi32>
    %c160_i32 = arith.constant 160 : i32
    %74 = vector.broadcast %c160_i32 : i32 to vector<1x256x128xi32>
    %75 = arith.cmpi slt, %71, %74 : vector<1x256x128xi32>
    %c10_i32 = arith.constant 10 : i32
    %76 = vector.broadcast %c10_i32 : i32 to vector<1x256x128xi32>
    %77 = arith.cmpi slt, %73, %76 : vector<1x256x128xi32>
    %78 = arith.andi %75, %77 : vector<1x256x128xi1>
    %cst_62 = arith.constant 0.000000e+00 : f32
    %79 = vector.broadcast %cst_62 : f32 to vector<1x256x128xf32>
    %80 = arith.select %78, %70, %79 : vector<1x256x128xi1>, vector<1x256x128xf32>
    %cst_63 = arith.constant dense<0.000000e+00> : vector<1x128xf32>
    %81 = vector.multi_reduction <add>, %80, %cst_63 [1] : vector<1x256x128xf32> to vector<1x128xf32>
    %cst_64 = arith.constant 0.00999999977 : f32
    %82 = vector.broadcast %cst_64 : f32 to vector<1x128xf32>
    %83 = arith.mulf %81, %82 : vector<1x128xf32>
    %84 = arith.truncf %83 : vector<1x128xf32> to vector<1x128xbf16>
    %c0_65 = arith.constant 0 : index
    %c0_66 = arith.constant 0 : index
    %85 = vector.load %arg5[%c0_65, %c0_66] : memref<128x128xbf16, #tpu.memory_space<vmem>>, vector<128x128xbf16>
    %cst_67 = arith.constant dense<0.000000e+00> : vector<1x128xf32>
    %86 = tpu.matmul %84, %85, %cst_67 {dimension_numbers = #tpu.dot_dimension_numbers<[1], [0], [0], [1], [0, 0, 1, 1], [], []>} : vector<1x128xbf16>, vector<128x128xbf16>, vector<1x128xf32> -> vector<1x128xf32>
    %c0_68 = arith.constant 0 : index
    %c0_69 = arith.constant 0 : index
    %87 = vector.load %arg6[%c0_68, %c0_69] : memref<1x128xf32, #tpu.memory_space<vmem>>, vector<1x128xf32>
    %88 = arith.addf %86, %87 : vector<1x128xf32>
    %cst_70 = arith.constant 0.000000e+00 : f32
    %89 = vector.broadcast %cst_70 : f32 to vector<1x128xf32>
    %90 = arith.maximumf %88, %89 : vector<1x128xf32>
    %91 = arith.truncf %90 : vector<1x128xf32> to vector<1x128xbf16>
    %c0_71 = arith.constant 0 : index
    %c0_72 = arith.constant 0 : index
    %92 = vector.load %arg7[%c0_71, %c0_72] : memref<128x128xbf16, #tpu.memory_space<vmem>>, vector<128x128xbf16>
    %cst_73 = arith.constant dense<0.000000e+00> : vector<1x128xf32>
    %93 = tpu.matmul %91, %92, %cst_73 {dimension_numbers = #tpu.dot_dimension_numbers<[1], [0], [0], [1], [0, 0, 1, 1], [], []>} : vector<1x128xbf16>, vector<128x128xbf16>, vector<1x128xf32> -> vector<1x128xf32>
    %c0_74 = arith.constant 0 : index
    %c0_75 = arith.constant 0 : index
    %94 = vector.load %arg8[%c0_74, %c0_75] : memref<1x128xf32, #tpu.memory_space<vmem>>, vector<1x128xf32>
    %95 = arith.addf %93, %94 : vector<1x128xf32>
    %96 = arith.mulf %95, %95 : vector<1x128xf32>
    %cst_76 = arith.constant dense<0.000000e+00> : vector<1xf32>
    %97 = vector.multi_reduction <add>, %96, %cst_76 [1] : vector<1x128xf32> to vector<1xf32>
    %98 = vector.shape_cast %97 : vector<1xf32> to vector<1x1xf32>
    %cst_77 = arith.constant 1.000000e-24 : f32
    %99 = vector.broadcast %cst_77 : f32 to vector<1x1xf32>
    %100 = arith.maximumf %98, %99 : vector<1x1xf32>
    %101 = math.rsqrt %100 : vector<1x1xf32>
    %102 = vector.broadcast %101 : vector<1x1xf32> to vector<1x128xf32>
    %103 = arith.mulf %95, %102 : vector<1x128xf32>
    %c0_78 = arith.constant 0 : index
    %c0_79 = arith.constant 0 : index
    %c0_80 = arith.constant 0 : index
    %104 = vector.load %arg9[%c0_78, %c0_79, %c0_80] : memref<1x1x128xf32, #tpu.memory_space<vmem>>, vector<1x1x128xf32>
    %105 = vector.shape_cast %104 : vector<1x1x128xf32> to vector<1x128xf32>
    %106 = vector.shape_cast %103 : vector<1x128xf32> to vector<1x1x128xf32>
    tpu.vector_store %arg9[%c0_78, %c0_79, %c0_80], %106 {strides = array<i32>} : memref<1x1x128xf32, #tpu.memory_space<vmem>>, vector<1x1x128xf32>,
    return
  }
  func.func @transform_0(%arg0: i32) -> (i32, i32, i32) {
    %c0_i32 = arith.constant 0 : i32
    %c0_i32_0 = arith.constant 0 : i32
    %c0_i32_1 = arith.constant 0 : i32
    return %arg0, %c0_i32, %c0_i32_0 : i32, i32, i32
  }
  func.func @transform_1(%arg0: i32) -> (i32, i32, i32) {
    %c0_i32 = arith.constant 0 : i32
    %c0_i32_0 = arith.constant 0 : i32
    %c0_i32_1 = arith.constant 0 : i32
    %c0_i32_2 = arith.constant 0 : i32
    return %c0_i32, %c0_i32_0, %c0_i32_1 : i32, i32, i32
  }
  func.func @transform_2(%arg0: i32) -> (i32, i32, i32) {
    %c0_i32 = arith.constant 0 : i32
    %c0_i32_0 = arith.constant 0 : i32
    %c0_i32_1 = arith.constant 0 : i32
    %c0_i32_2 = arith.constant 0 : i32
    return %c0_i32, %c0_i32_0, %c0_i32_1 : i32, i32, i32
  }
  func.func @transform_3(%arg0: i32) -> (i32, i32, i32) {
    %c0_i32 = arith.constant 0 : i32
    %c0_i32_0 = arith.constant 0 : i32
    %c0_i32_1 = arith.constant 0 : i32
    %c0_i32_2 = arith.constant 0 : i32
    return %c0_i32, %c0_i32_0, %c0_i32_1 : i32, i32, i32
  }
  func.func @transform_4(%arg0: i32) -> (i32, i32) {
    %c0_i32 = arith.constant 0 : i32
    %c0_i32_0 = arith.constant 0 : i32
    %c0_i32_1 = arith.constant 0 : i32
    return %c0_i32, %c0_i32_0 : i32, i32
  }
  func.func @transform_5(%arg0: i32) -> (i32, i32) {
    %c0_i32 = arith.constant 0 : i32
    %c0_i32_0 = arith.constant 0 : i32
    %c0_i32_1 = arith.constant 0 : i32
    return %c0_i32, %c0_i32_0 : i32, i32
  }
  func.func @transform_6(%arg0: i32) -> (i32, i32) {
    %c0_i32 = arith.constant 0 : i32
    %c0_i32_0 = arith.constant 0 : i32
    %c0_i32_1 = arith.constant 0 : i32
    return %c0_i32, %c0_i32_0 : i32, i32
  }
  func.func @transform_7(%arg0: i32) -> (i32, i32) {
    %c0_i32 = arith.constant 0 : i32
    %c0_i32_0 = arith.constant 0 : i32
    %c0_i32_1 = arith.constant 0 : i32
    return %c0_i32, %c0_i32_0 : i32, i32
  }
  func.func @transform_8(%arg0: i32) -> (i32, i32, i32) {
    %c0_i32 = arith.constant 0 : i32
    %c0_i32_0 = arith.constant 0 : i32
    %c0_i32_1 = arith.constant 0 : i32
    return %arg0, %c0_i32, %c0_i32_0 : i32, i32, i32
  }
}

</mosaic_0001>

<bundles_post_ra>
// kernel: _lambda_.1
= control target key start
LH: loop header
LB: loop body
LE: loop exit
PB: predicated region body
PF: predicated region fallthrough
CT: control target
= control target key end

     0   :  { %13 = vsyncpa [#allocation5], 0  ;;  %s9027_s0 = inlined_call_operand.vmem [shape: bf16[2,256,4], index: 0, kind: input, shape index: {}]   ;;  %s9028_s1 = inlined_call_operand.hbm [shape: bf16[3,12,32], index: 1, kind: input, shape index: {}]   ;;  %s9029_s2 = inlined_call_operand.vmem [shape: bf16[3,96,64], index: 2, kind: input, shape index: {}]   ;;  %s9030_s3 = inlined_call_operand.vmem [shape: bf16[3,192,128], index: 3, kind: input, shape index: {}]   ;;  %s9031_s4 = inlined_call_operand.hbm [shape: bf16[128,128], index: 4, kind: input, shape index: {}]   ;;  %s9032_s5 = inlined_call_operand.vmem [shape: f32[1,128], index: 5, kind: input, shape index: {}]   ;;  %s9033_s6 = inlined_call_operand.vmem [shape: bf16[128,128], index: 6, kind: input, shape index: {}]   ;;  %s9034_s7 = inlined_call_operand.vmem [shape: f32[1,128], index: 7, kind: input, shape index: {}]   ;;  %s9035_s8 = inlined_call_operand.hbm [shape: f32[2,1,128], index: 8, kind: output, shape index: {}]  }
   0x1   :  { %14 = vsyncpa [#allocation8], 0 }
   0x2   :  { %15 = vsyncpa [#allocation6], 0 }
   0x3   :  { %17 = vsyncpa [#allocation6 + $0x1], 0  ;;  %s6818_s27 = smov 0   ;;  %s6820_s28 = smov 0  }
   0x4   :  { %s6822_s29 = smov 0   ;;  %s6824_s30 = smov 0  }
   0x5 LB: > { %s6839_s9 = sadd.s32 4294967295, %s6759_s30   ;;  %s5505_s10 = sadd.s32 4294967294, %s6759_s30   ;;  %s6759_s30 = sphi %s6824_s30, %s9053_s30   ;;  %s6755_s29 = sphi %s6822_s29, %s9052_s29   ;;  %s6751_s28 = sphi %s6820_s28, %s9051_s28   ;;  %s6747_s27 = sphi %s6818_s27, %s9050_s27  }
   0x6   : > { %s6843_s11 = sadd.s32 1, %s6759_s30   ;;  %s203_s12 = sadd.s32 1, %s6755_s29 }
   0x7   : > { %s200_s13 = ssub.s32 %s6759_s30, %s6843_s11  ;;  %p213_p0 = scmp.ne.s32.totalorder %s6755_s29, %s6751_s28 }
   0x8   : > { %p201_p1 = scmp.eq.s32.totalorder %s200_s13, 0  ;;  %p214_p2 = scmp.eq.s32.totalorder %s6839_s9, 1 }
   0x9   : > { %p219_p3 = scmp.ne.s32.totalorder %s6751_s28, %s6747_s27  ;;  %p220_p4 = scmp.eq.s32.totalorder %s5505_s10, 1 }
   0xa   : > { %s6854_s14 = scalar_select %p201_p1, %s6755_s29, %s203_s12  }
   0xb   : > { %p6856_p5 = por %p214_p2, %p213_p0  ;;  %p6860_p6 = por %p220_p4, %p219_p3 }
   0xc   : > { %p5506_p7 = scmp.ge.s32.totalorder %s6759_s30, 1  ;;  %p227_p8 = scmp.lt.s32.totalorder %s6759_s30, 3 }
   0xd   : > { %s9038_s16 = scalar_select %p6860_p6, 1, 0 }
   0xe   : > { %p9036_p9 = scmp.eq.s32.totalorder %s6839_s9, 0  ;;  %p6867_p10 = pnand %p5506_p7, %p227_p8 }
   0xf   : > { %s6761_s18 = smov [#allocation4]   ;;  %s6762_s21 = smov [#allocation7]  }
  0x10   : > { %s239_s19 = sshll.u32 %s6761_s18, 4  ;;  %p6410_p11 = pneg %p6867_p10  ;;  %s240_s19 = int_to_ptr.vmem [resolvable:$true] %s239_s19 }
  0x11   : > { %s258_s22 = sshll.u32 %s6762_s21, 4  ;;  %s6650_s23 = scalar_lea.vmem %s240_s19, 384  ;;  %s259_s22 = int_to_ptr.vmem [resolvable:$true] %s258_s22 }
  0x12   : > { %p6875_p12 = pnand %p9036_p9, %p6410_p11  ;;  %p6651_p0 = scmp.ne.s32.totalorder %s240_s19, %s6650_s23 }
  0x13   : > { %p6658_p3 = scmp.lt.s32.totalorder %s240_s19, %s240_s19  ;;  %p6659_p4 = scmp.lt.s32.totalorder %s6650_s23, %s6650_s23 }
  0x14   : > { %p6641_p13 = pneg %p6875_p12 }
  0x15   : > { %p6660_p7 = por %p6659_p4, %p6658_p3 }
  0x16   : > { %p6653_p1 = pnand %p6651_p0, %p6641_p13 }
  0x18   : > { %p6654_p2 = pneg %p6653_p1 }
  0x1a   : > { %p6661_p8 = pnand %p6660_p7, %p6654_p2 }
  0x1c   : > { %6664 = shalt.err (!%p6661_p8)
}
  0x1d   : > { %s6763_s24 = smov 64   ;;  %s6764_s25 = smov 4  }
  0x1e   : > { %6413 = dma.hbm_to_vmem [thread:$0]  (!%p6875_p12), %s9028_s1, 384, %s240_s19, [#allocation5], %s6763_s24, %s6763_s24, %s6764_s25  }
  0x1f   : > { %s6676_s12 = scalar_lea.vmem %s259_s22, 1024  ;;  %p6684_p9 = scmp.lt.s32.totalorder %s259_s22, %s259_s22 }
  0x20   : > { %p6677_p11 = scmp.ne.s32.totalorder %s259_s22, %s6676_s12  ;;  %p6685_p6 = scmp.lt.s32.totalorder %s6676_s12, %s6676_s12 }
  0x22   : > { %p6679_p0 = pnand %p6677_p11, %p6641_p13  ;;  %p6686_p3 = por %p6685_p6, %p6684_p9 }
  0x24   : > { %p6680_p1 = pneg %p6679_p0 }
  0x26   : > { %p6687_p2 = pnand %p6686_p3, %p6680_p1 }
  0x28   : > { %6690 = shalt.err (!%p6687_p2)
}
  0x29   : > { %6416 = dma.hbm_to_vmem [thread:$0]  (!%p6875_p12), %s9031_s4, 1024, %s259_s22, [#allocation8], %s6763_s24, %s6763_s24, %s6764_s25  }
  0x2a   : > { %291 = sbr.rel (%p6867_p10) target bundleno = 2042 (0x7fa), region = 52  ;;  %p9041_p4 = scmp.eq.s32.totalorder (!%p6867_p10), %s6839_s9, 0 }
  0x2f   : > { %6734 = dma.done.wait (%p9041_p4), [#allocation5], 384   ;;  %p9042_p13 = pmov %p9041_p4 }
  0x30   : > { %p9043_p7 = pmov %p9041_p4 }
  0x31   : > { %6736 = vsyncadd (%p9042_p13), [#allocation5], 4294966912 }
  0x32   : > { %6738 = dma.done.wait (%p9043_p7), [#allocation8], 1024   ;;  %p9044_p6 = pmov %p9041_p4 }
  0x33   : > { %p328_p9 = scmp.lt.s32.totalorder %s6839_s9, 1  ;;  %vm606_vm0 = vcmask 1046528   ;;  %vm446_vm1 = vsmask.f32 7424  ;;  %s6765_s23 = smov 8   ;;  %vm775_vm2 = vcmask 1045504  }
  0x34   : > { %6740 = vsyncadd (%p9044_p6), [#allocation8], 4294966272  ;;  %s6766_s24 = smov 4   ;;  %vm670_vm3 = vcmask 31744   ;;  %vm703_vm4 = vcmask 64512   ;;  %vm746_vm5 = vcmask 97280  }
  0x35   : > { %s329_s19 = scalar_select %p328_p9, %s6839_s9, 1  ;;  %vm1307_vm6 = vcmask 781314   ;;  %vm1412_vm7 = vcmask 257024   ;;  %vm1842_vm8 = vcmask 1042432   ;;  %vm1843_vm9 = vcmask 1046532  }
  0x36   : > { %vm1442_vm10 = vsmask.f32 3328  ;;  %vm1443_vm11 = vsmask.f32 7440  ;;  %vm7295_vm12 = vmor %vm1842_vm8, %vm1843_vm9  ;;  %s6768_s13 = smov 64   ;;  %s6769_s18 = smov 32  }
  0x37   : > { %s5964_s20 = sshll.u32 %s329_s19, 7  ;;  %vm7314_vm13 = vmor %vm1442_vm10, %vm1443_vm11  ;;  %vm1440_vm14 = vcmask 256000   ;;  %vm1309_vm15 = vcmask 781312   ;;  %vm2985_vm8 = vcmask 523271   ;;  %vm3097_vm11 = vcmask 519168   ;;  %s5961_s21 = sshll.u32 %s6839_s9, 4 }
  0x38   : > { %s6912_s22 = scalar_lea.vmem %s9027_s0, %s5964_s20  ;;  %s326_s20 = sand.u32 1, %s6751_s28  }
  0x39   : > { %v6915_v0 = vld [vmem:[%s6912_s22 + $0x28] sm:$0xff]   ;;  %v6918_v1 = vld [vmem:[%s6912_s22 + $0x30] sm:$0xff]   ;;  %v6923_v4 = vld [vmem:[%s6912_s22 + $0x18] sm:$0xff]   ;;  %s327_s17 = scalar_lea.vmem [#allocation9], %s326_s20  ;;  %s5426_s25 = scalar_lea.hbm %s9035_s8, %s5961_s21 }
  0x3a   : > { %v616_v2 = vrot.slane %v6915_v0, 1  ;;  %v618_v3 = vrot.slane %v6918_v1, 1  ;;  %v6926_v5 = vld [vmem:[%s6912_s22 + $0x20] sm:$0xff]   ;;  %v6929_v6 = vld [vmem:[%s6912_s22 + $0x38] sm:$0xff]   ;;  %v487_v7 = vshll.u32 %v6915_v0, 16  ;;  %v612_v9 = vrot.slane %v6923_v4, 1 }
  0x3b   : > { %v614_v10 = vrot.slane %v6926_v5, 1  ;;  %v471_v11 = vshll.u32 %v6923_v4, 16  ;;  %v6937_v12 = vld [vmem:[%s6912_s22 + $0x40] sm:$0xff]   ;;  %v475_v13 = vshrl.u32 %v6923_v4, 16  ;;  %v479_v14 = vshll.u32 %v6926_v5, 16  ;;  %v6954_v24 = vld [vmem:[%s6912_s22 + $0x48] sm:$0xff]  }
  0x3c   : > { %v619_v8 = vsel %vm606_vm0, %v616_v2, %v618_v3  ;;  %v620_v15 = vrot.slane %v6929_v6, 1  ;;  %v483_v16 = vshrl.u32 %v6926_v5, 16  ;;  %v489_v19 = vrot.slane %v487_v7, 1  ;;  %v6962_v32 = vld [vmem:[%s6912_s22 + $0x50] sm:$0xff]   ;;  %v6966_v34 = vld [vmem:[%s6912_s22 + $0x58] sm:$0xff]   ;;  %v6977_v44 = vld [vmem:[%s6912_s22 + $0x60] sm:$0xff]  }
  0x3d   : > { %648 = vrot.lane.b32.xlu0 %v619_v8, %s6765_s23  ;;  %v615_v17 = vsel %vm606_vm0, %v612_v9, %v614_v10  ;;  %v6947_v18 = vrot.slane %v471_v11, 1  ;;  %v617_v20 = vsel %vm606_vm0, %v614_v10, %v616_v2  ;;  %v481_v21 = vrot.slane %v479_v14, 1  ;;  %v6981_v46 = vld [vmem:[%s6912_s22 + $0x68] sm:$0xff]   ;;  %v6992_v55 = vld [vmem:[%s6912_s22 + $0x70] sm:$0xff]   ;;  %v6996_v57 = vld [vmem:[%s6912_s22 + $0x78] sm:$0xff]   ;;  %s5416_s26 = scalar_lea.sflag [#allocation6], %s326_s20 }
  0x3e   : > { %644 = vrot.lane.b32.xlu1 %v615_v17, %s6765_s23  ;;  %v495_v22 = vshll.u32 %v6918_v1, 16  ;;  %v499_v23 = vshrl.u32 %v6918_v1, 16  ;;  %v503_v26 = vshll.u32 %v6929_v6, 16  ;;  %v491_v27 = vshrl.u32 %v6915_v0, 16  ;;  %v7012_v11 = vld [vmem:[%s6912_s22 + $0x10] sm:$0xff]   ;;  %s6772_s12 = smov [#allocation9]  }
  0x3f   : > { %v477_v25 = vor.u32 %v475_v13, %v6947_v18  ;;  %v511_v28 = vshll.u32 %v6937_v12, 16  ;;  %v485_v29 = vor.u32 %v483_v16, %v481_v21  ;;  %v519_v31 = vshll.u32 %v6954_v24, 16 }
  0x40   : > { %v497_v30 = vrot.slane %v495_v22, 1  ;;  %v621_v35 = vsel %vm606_vm0, %v618_v3, %v620_v15  ;;  %v493_v36 = vor.u32 %v491_v27, %v489_v19  ;;  %v515_v38 = vshrl.u32 %v6937_v12, 16  ;;  %v7006_v3 = vld [vmem:[%s6912_s22 + $0x8] sm:$0xff]  }
  0x41   : > { %v482_v33 = vsel %vm446_vm1, %v477_v25, %v481_v21  ;;  %v513_v37 = vrot.slane %v511_v28, 1  ;;  %v490_v39 = vsel %vm446_vm1, %v485_v29, %v489_v19  ;;  %v505_v41 = vrot.slane %v503_v26, 1  ;;  %v6485_v19 = vld [vmem:[#allocation4 + $0x8] sm:$0x3f]   ;;  %v7030_v29 = vld [vmem:[%s6912_s22] sm:$0xff]   ;;  %s5428_s22 = sshll.u32 %s327_s17, 4  ;;  %s5429_s22 = int_to_ptr.vmem [resolvable:$true] %s5428_s22 }
  0x42   : > { %646 = vrot.lane.b32.xlu1 %v617_v20, %s6765_s23  ;;  %580 = vrot.lane.b32.xlu0 %v482_v33, %s6766_s24  ;;  %v501_v40 = vor.u32 %v499_v23, %v497_v30  ;;  %v507_v42 = vshrl.u32 %v6929_v6, 16  ;;  %v521_v43 = vrot.slane %v519_v31, 1  ;;  %v527_v45 = vshll.u32 %v6962_v32, 16  ;;  %s6691_s10 = scalar_lea.vmem %s5429_s22, 16 }
  0x43   : > { %v498_v47 = vsel %vm446_vm1, %v493_v36, %v497_v30  ;;  %v517_v48 = vor.u32 %v515_v38, %v513_v37  ;;  %v622_v49 = vrot.slane %v6937_v12, 1  ;;  %v535_v50 = vshll.u32 %v6966_v34, 16  ;;  %6397 = vmatprep.subr.msk.bf16.mxu1 %vm775_vm2, %v6485_v19  ;;  %6396 = vmatprep.subr.msk.bf16.mxu0 %vm775_vm2, %v6485_v19  ;;  %p6692_p10 = scmp.ne.s32.totalorder %s5429_s22, %s6691_s10 }
  0x44   : > { %v506_v51 = vsel %vm446_vm1, %v501_v40, %v505_v41  ;;  %v509_v52 = vor.u32 %v507_v42, %v505_v41  ;;  %v624_v53 = vrot.slane %v6954_v24, 1  ;;  %v531_v54 = vshrl.u32 %v6962_v32, 16 }
  0x45   : > { %v543_v56 = vshll.u32 %v6977_v44, 16  ;;  %v529_v58 = vrot.slane %v527_v45, 1  ;;  %v523_v59 = vshrl.u32 %v6954_v24, 16  ;;  %v626_v60 = vrot.slane %v6962_v32, 1  ;;  %p6693_p12 = pnand %p6692_p10, %p6856_p5 }
  0x46   : > { %650 = vrot.lane.b32.xlu1 %v621_v35, %s6765_s23  ;;  %582 = vrot.lane.b32.xlu0 %v490_v39, %s6766_s24  ;;  %v551_v61 = vshll.u32 %v6981_v46, 16  ;;  %v537_v62 = vrot.slane %v535_v50, 1  ;;  %v628_v63 = vrot.slane %v6966_v34, 1  ;;  %v547_v2 = vshrl.u32 %v6977_v44, 16 }
  0x47   : > { %v522_v7 = vsel %vm446_vm1, %v517_v48, %v521_v43  ;;  %v514_v8 = vsel %vm446_vm1, %v509_v52, %v513_v37  ;;  %v559_v10 = vshll.u32 %v6992_v55, 16  ;;  %v545_v13 = vrot.slane %v543_v56, 1  ;;  %v6486_v37 = vld [vmem:[#allocation4] sm:$0x3f]   ;;  %p6694_p8 = pneg %p6693_p12 }
  0x48   : > { %v539_v14 = vshrl.u32 %v6966_v34, 16  ;;  %v630_v16 = vrot.slane %v6977_v44, 1  ;;  %v567_v17 = vshll.u32 %v6996_v57, 16  ;;  %v625_v20 = vsel %vm606_vm0, %v622_v49, %v624_v53 }
  0x49   : > { %v623_v21 = vsel %vm606_vm0, %v620_v15, %v622_v49  ;;  %v553_v22 = vrot.slane %v551_v61, 1  ;;  %v632_v23 = vrot.slane %v6981_v46, 1  ;;  %v561_v25 = vrot.slane %v559_v10, 1 }
  0x4a   : > { %586 = vrot.lane.b32.xlu1 %v506_v51, %s6766_s24  ;;  %584 = vrot.lane.b32.xlu0 %v498_v47, %s6766_s24  ;;  %v563_v26 = vshrl.u32 %v6992_v55, 16  ;;  %v555_v27 = vshrl.u32 %v6981_v46, 16  ;;  %v455_v28 = vshll.u32 %v7006_v3, 16  ;;  %v533_v30 = vor.u32 %v531_v54, %v529_v58 }
  0x4b   : > { %v525_v31 = vor.u32 %v523_v59, %v521_v43  ;;  %v634_v15 = vrot.slane %v6992_v55, 1  ;;  %v463_v33 = vshll.u32 %v7012_v11, 16  ;;  %v7036_v35 = vrot.slane %v567_v17, 1  ;;  %v6487_v17 = vld [vmem:[#allocation4 + $0x10] sm:$0x3f]  }
  0x4c   : > { %v459_v36 = vshrl.u32 %v7006_v3, 16  ;;  %v457_v38 = vrot.slane %v455_v28, 1  ;;  %v636_v39 = vrot.slane %v6996_v57, 1  ;;  %v467_v41 = vshrl.u32 %v7012_v11, 16 }
  0x4d   : > { %v465_v40 = vrot.slane %v463_v33, 1  ;;  %v608_v42 = vrot.slane %v7006_v3, 1  ;;  %v610_v43 = vrot.slane %v7012_v11, 1  ;;  %v538_v45 = vsel %vm446_vm1, %v533_v30, %v537_v62 }
  0x4e   : > { %590 = vrot.lane.b32.xlu1 %v522_v7, %s6766_s24  ;;  %588 = vrot.lane.b32.xlu0 %v514_v8, %s6766_s24  ;;  %v530_v47 = vsel %vm446_vm1, %v525_v31, %v529_v58  ;;  %v448_v48 = vshrl.u32 %v7030_v29, 16  ;;  %v450_v49 = vshll.u32 %v7030_v29, 16  ;;  %v607_v50 = vrot.slane %v7030_v29, 1 }
  0x4f   : > { %v777_v51 = vsel %vm775_vm2, %v6485_v19, 0  ;;  %v571_v52 = vshrl.u32 %v6996_v57, 16  ;;  %v7053_v54 = vsel %vm775_vm2, %v6486_v37, 0  ;;  %v629_v56 = vsel %vm606_vm0, %v626_v60, %v628_v63 }
  0x50   : > { %6395 = vmatpush3.bf16.msra.mxu1 %v777_v51  ;;  %6145 = vmatpush3.bf16.msra.mxu0 %v777_v51  ;;  %v627_v58 = vsel %vm606_vm0, %v624_v53, %v626_v60  ;;  %v549_v59 = vor.u32 %v547_v2, %v545_v13  ;;  %v541_v61 = vor.u32 %v539_v14, %v537_v62 }
  0x51   : > { %6398 = vmatprep.subr.msk.bf16.mxu1 %vm775_vm2, %v6486_v37  ;;  %v633_v10 = vsel %vm606_vm0, %v630_v16, %v632_v23  ;;  %v631_v53 = vsel %vm606_vm0, %v628_v63, %v630_v16  ;;  %v565_v60 = vor.u32 %v563_v26, %v561_v25  ;;  %v557_v62 = vor.u32 %v555_v27, %v553_v22 }
  0x52   : > { %654 = vrot.lane.b32.xlu1 %v625_v20, %s6765_s23  ;;  %652 = vrot.lane.b32.xlu0 %v623_v21, %s6765_s23  ;;  %v554_v7 = vsel %vm446_vm1, %v549_v59, %v553_v22  ;;  %v546_v8 = vsel %vm446_vm1, %v541_v61, %v545_v13  ;;  %v461_v14 = vor.u32 %v459_v36, %v457_v38  ;;  %v452_v20 = vrot.slane %v450_v49, 1 }
  0x53   : > { %v570_v2 = vsel %vm446_vm1, %v565_v60, %v7036_v35  ;;  %v562_v13 = vsel %vm446_vm1, %v557_v62, %v561_v25  ;;  %v635_v19 = vsel %vm606_vm0, %v632_v23, %v634_v15  ;;  %v469_v16 = vor.u32 %v467_v41, %v465_v40  ;;  %6399 = vmatprep.subr.msk.bf16.mxu0 %vm775_vm2, %v6487_v17 }
  0x54   : > { %v466_v63 = vsel %vm446_vm1, %v461_v14, %v465_v40  ;;  %v7085_v21 = vsel %vm775_vm2, %v6487_v17, 0  ;;  %v637_v22 = vsel %vm606_vm0, %v634_v15, %v636_v39  ;;  %v611_v25 = vsel %vm606_vm0, %v608_v42, %v610_v43 }
  0x55   : > { %v474_v23 = vsel %vm446_vm1, %v469_v16, %v6947_v18  ;;  %v613_v26 = vsel %vm606_vm0, %v610_v43, %v612_v9  ;;  %v453_v27 = vor.u32 %v452_v20, %v448_v48  ;;  %v609_v30 = vsel %vm606_vm0, %v607_v50, %v608_v42 }
  0x56   : > { %594 = vrot.lane.b32.xlu1 %v538_v45, %s6766_s24  ;;  %592 = vrot.lane.b32.xlu0 %v530_v47, %s6766_s24  ;;  %v573_v18 = vor.u32 %v571_v52, %v7036_v35  ;;  %vm1808_vm0 = vcmask 519424   ;;  %vm2203_vm2 = vcmask 785408  }
  0x57   : > { %v458_v28 = vsel %vm446_vm1, %v453_v27, %v457_v38  ;;  %vm2012_vm1 = vcmask 781824  }
  0x5a   : > { %658 = vrot.lane.b32.xlu1 %v629_v56, %s6765_s23  ;;  %656 = vrot.lane.b32.xlu0 %v627_v58, %s6765_s23 }
  0x5e   : > { %598 = vrot.lane.b32.xlu1 %v554_v7, %s6766_s24  ;;  %596 = vrot.lane.b32.xlu0 %v546_v8, %s6766_s24 }
  0x62   : > { %662 = vrot.lane.b32.xlu1 %v633_v10, %s6765_s23  ;;  %660 = vrot.lane.b32.xlu0 %v631_v53, %s6765_s23 }
  0x66   : > { %602 = vrot.lane.b32.xlu1 %v570_v2, %s6766_s24  ;;  %600 = vrot.lane.b32.xlu0 %v562_v13, %s6766_s24 }
  0x6a   : > { %664 = vrot.lane.b32.xlu0 %v635_v19, %s6765_s23  ;;  %576 = vrot.lane.b32.xlu1 %v466_v63, %s6766_s24 }
  0x6e   : > { %666 = vrot.lane.b32.xlu0 %v637_v22, %s6765_s23  ;;  %578 = vrot.lane.b32.xlu1 %v474_v23, %s6766_s24 }
  0x72   : > { %640 = vrot.lane.b32.xlu0 %v611_v25, %s6765_s23  ;;  %642 = vrot.lane.b32.xlu1 %v613_v26, %s6765_s23 }
  0x76   : > { %574 = vrot.lane.b32.xlu0 %v458_v28, %s6766_s24  ;;  %638 = vrot.lane.b32.xlu1 %v609_v30, %s6765_s23 }
  0x7a   : > { %604 = vrot.lane.b32.xlu0 %v573_v18, %s6766_s24  ;;  %668 = vrot.lane.b32.xlu1 %v636_v39, %s6765_s23 }
  0xaf   : > { %v649_v9 = vpop.permute.xlu0 %648 }
  0xb0   : > { %v645_v31 = vpop.permute.xlu1 %644 }
  0xb4   : > { %v647_v15 = vpop.permute.xlu1 %646  ;;  %v581_v33 = vpop.permute.xlu0 %580 }
  0xb5   : > { %v678_v36 = vsel %vm670_vm3, %v6923_v4, %v581_v33 }
  0xb6   : > { %v7114_v37 = vsel %vm703_vm4, %v678_v36, %v645_v31 }
  0xb7   : > { %6150 = vmatprep.mubr.msk.bf16.mxu1 %vm746_vm5, %v7114_v37 }
  0xb8   : > { %v651_v35 = vpop.permute.xlu1 %650  ;;  %v583_v38 = vpop.permute.xlu0 %582 }
  0xb9   : > { %v680_v39 = vsel %vm670_vm3, %v6926_v5, %v583_v38 }
  0xba   : > { %v7121_v40 = vsel %vm703_vm4, %v680_v39, %v647_v15 }
  0xbb   : > { %6151 = vmatmul.mubr.msk.bf16.vlgmr.msra.gmra.mxu1 %vm746_vm5, %v7121_v40 }
  0xbc   : > { %v587_v41 = vpop.permute.xlu1 %586  ;;  %v585_v42 = vpop.permute.xlu0 %584  ;;  %6175 = vmatpush3.bf16.msra.mxu1 %v7053_v54 }
  0xbd   : > { %v682_v4 = vsel %vm670_vm3, %v6915_v0, %v585_v42  ;;  %v684_v45 = vsel %vm670_vm3, %v6918_v1, %v587_v41 }
  0xbe   : > { %v7129_v43 = vsel %vm703_vm4, %v682_v4, %v649_v9  ;;  %v7136_v48 = vsel %vm703_vm4, %v684_v45, %v651_v35 }
  0xbf   : > { %6154 = vmatprep.mubr.msk.bf16.mxu1 %vm746_vm5, %v7129_v43 }
  0xc0   : > { %v591_v5 = vpop.permute.xlu1 %590  ;;  %v589_v47 = vpop.permute.xlu0 %588 }
  0xc1   : > { %v686_v0 = vsel %vm670_vm3, %v6929_v6, %v589_v47  ;;  %v688_v54 = vsel %vm670_vm3, %v6937_v12, %v591_v5 }
  0xc3   : > { %6155 = vmatmul.mubr.msk.bf16.gmra.mxu1 %vm746_vm5, %v7136_v48 }
  0xc4   : > { %v655_v49 = vpop.permute.xlu1 %654  ;;  %v653_v50 = vpop.permute.xlu0 %652 }
  0xc5   : > { %v7143_v51 = vsel %vm703_vm4, %v686_v0, %v653_v50  ;;  %v7150_v56 = vsel %vm703_vm4, %v688_v54, %v655_v49 }
  0xc6   : > { %6158 = vmatprep.mubr.msk.bf16.mxu1 %vm746_vm5, %v7143_v51 }
  0xc8   : > { %v595_v1 = vpop.permute.xlu1 %594  ;;  %v593_v52 = vpop.permute.xlu0 %592 }
  0xc9   : > { %v690_v6 = vsel %vm670_vm3, %v6954_v24, %v593_v52  ;;  %v692_v12 = vsel %vm670_vm3, %v6962_v32, %v595_v1 }
  0xcb   : > { %6159 = vmatmul.mubr.msk.bf16.gmra.mxu1 %vm746_vm5, %v7150_v56 }
  0xcc   : > { %v659_v58 = vpop.permute.xlu1 %658  ;;  %v657_v59 = vpop.permute.xlu0 %656 }
  0xcd   : > { %v723_v61 = vsel %vm703_vm4, %v690_v6, %v657_v59  ;;  %v725_v10 = vsel %vm703_vm4, %v692_v12, %v659_v58 }
  0xce   : > { %6162 = vmatprep.mubr.msk.bf16.mxu1 %vm746_vm5, %v723_v61 }
  0xd0   : > { %v599_v7 = vpop.permute.xlu1 %598  ;;  %v597_v8 = vpop.permute.xlu0 %596 }
  0xd1   : > { %v694_v53 = vsel %vm670_vm3, %v6966_v34, %v597_v8  ;;  %v696_v14 = vsel %vm670_vm3, %v6977_v44, %v599_v7 }
  0xd3   : > { %6163 = vmatmul.mubr.msk.bf16.gmra.mxu1 %vm746_vm5, %v725_v10 }
  0xd4   : > { %v663_v60 = vpop.permute.xlu1 %662  ;;  %v661_v24 = vpop.permute.xlu0 %660 }
  0xd5   : > { %v727_v62 = vsel %vm703_vm4, %v694_v53, %v661_v24  ;;  %v729_v32 = vsel %vm703_vm4, %v696_v14, %v663_v60 }
  0xd6   : > { %6166 = vmatprep.mubr.msk.bf16.mxu1 %vm746_vm5, %v727_v62 }
  0xd8   : > { %v603_v2 = vpop.permute.xlu1 %602  ;;  %v601_v13 = vpop.permute.xlu0 %600 }
  0xd9   : > { %v698_v17 = vsel %vm670_vm3, %v6981_v46, %v601_v13  ;;  %v700_v16 = vsel %vm670_vm3, %v6992_v55, %v603_v2 }
  0xdb   : > { %6167 = vmatmul.mubr.msk.bf16.gmra.mxu1 %vm746_vm5, %v729_v32 }
  0xdc   : > { %v665_v19 = vpop.permute.xlu0 %664  ;;  %v577_v34 = vpop.permute.xlu1 %576 }
  0xdd   : > { %v731_v63 = vsel %vm703_vm4, %v698_v17, %v665_v19  ;;  %v674_v23 = vsel %vm670_vm3, %v7006_v3, %v577_v34 }
  0xde   : > { %6170 = vmatprep.mubr.msk.bf16.mxu1 %vm746_vm5, %v731_v63 }
  0xe0   : > { %v667_v20 = vpop.permute.xlu0 %666  ;;  %v579_v22 = vpop.permute.xlu1 %578 }
  0xe1   : > { %v733_v44 = vsel %vm703_vm4, %v700_v16, %v667_v20  ;;  %v676_v46 = vsel %vm670_vm3, %v7012_v11, %v579_v22 }
  0xe3   : > { %6171 = vmatmul.mubr.msk.bf16.gmra.mxu1 %vm746_vm5, %v733_v44 }
  0xe4   : > { %v641_v25 = vpop.permute.xlu0 %640  ;;  %v643_v26 = vpop.permute.xlu1 %642 }
  0xe5   : > { %v709_v27 = vsel %vm703_vm4, %v676_v46, %v643_v26  ;;  %v707_v28 = vsel %vm703_vm4, %v674_v23, %v641_v25 }
  0xe6   : > { %6146 = vmatprep.mubr.msk.bf16.mxu0 %vm746_vm5, %v707_v28 }
  0xe7   : > { %6147 = vmatmul.mubr.msk.bf16.vlgmr.msra.gmra.mxu0 %vm746_vm5, %v709_v27 }
  0xe8   : > { %6205 = vmatpush3.bf16.msra.mxu0 %v7085_v21  ;;  %6206 = vmatprep.mubr.msk.bf16.mxu0 %vm746_vm5, %v709_v27  ;;  %v575_v55 = vpop.permute.xlu0 %574  ;;  %v639_v30 = vpop.permute.xlu1 %638 }
  0xe9   : > { %v672_v3 = vsel %vm670_vm3, %v7030_v29, %v575_v55 }
  0xea   : > { %v705_v11 = vsel %vm703_vm4, %v672_v3, %v639_v30 }
  0xeb   : > { %6176 = vmatprep.mubr.msk.bf16.mxu1 %vm746_vm5, %v705_v11 }
  0xec   : > { %6177 = vmatmul.mubr.msk.bf16.vlgmr.msra.gmra.mxu1 %vm746_vm5, %v707_v28  ;;  %v605_v18 = vpop.permute.xlu0 %604  ;;  %v669_v9 = vpop.permute.xlu1 %668 }
  0xed   : > { %6180 = vmatprep.mubr.msk.bf16.mxu1 %vm746_vm5, %v709_v27  ;;  %v702_v21 = vsel %vm670_vm3, %v6996_v57, %v605_v18  ;;  %v6767_v57 = vmov 0   ;;  %vm1836_vm3 = vcmask 518400  }
  0xee   : > { %v735_v31 = vsel %vm703_vm4, %v702_v21, %v669_v9  ;;  %1308 = vst.msk [vmem:[#allocation2 + $0x6c] sm:$0xc] %vm1307_vm6, %v6767_v57  ;;  %v6488_v21 = vld [vmem:[%s9029_s2 + $0x58] sm:$0xff]   ;;  %vm1837_vm4 = vsmask.f32 2304  ;;  %vm2040_vm6 = vcmask 779776  }
  0xef   : > { %6207 = vmatmul.mubr.msk.bf16.vlgmr.msra.gmra.mxu0 %vm746_vm5, %v7114_v37  ;;  %6234 = vmatprep.subr.bf16.mxu1 %v6488_v21  ;;  %1310 = vst.msk [vmem:[#allocation2 + $0x70] sm:$0xf] %vm1309_vm15, %v6767_v57  ;;  %1311 = vst.msk [vmem:[#allocation2 + $0x74] sm:$0xf] %vm1309_vm15, %v6767_v57 }
  0xf0   : > { %6210 = vmatprep.mubr.msk.bf16.mxu0 %vm746_vm5, %v7121_v40  ;;  %6235 = vmatpush3.bf16.msra.mxu1 %v6488_v21  ;;  %1312 = vst.msk [vmem:[#allocation2 + $0x78] sm:$0xf] %vm1309_vm15, %v6767_v57  ;;  %1313 = vst.msk [vmem:[#allocation2 + $0x7c] sm:$0xf] %vm1309_vm15, %v6767_v57  ;;  %vm3961_vm15 = vcmask 523264  }
  0xf4   : > { %6181 = vmatmul.mubr.msk.bf16.gmra.mxu1 %vm746_vm5, %v7114_v37 }
  0xf5   : > { %6184 = vmatprep.mubr.msk.bf16.mxu1 %vm746_vm5, %v7121_v40 }
  0xf7   : > { %6211 = vmatmul.mubr.msk.bf16.gmra.mxu0 %vm746_vm5, %v7129_v43 }
  0xf8   : > { %6214 = vmatprep.mubr.msk.bf16.mxu0 %vm746_vm5, %v7136_v48 }
  0xfc   : > { %6185 = vmatmul.mubr.msk.bf16.gmra.mxu1 %vm746_vm5, %v7129_v43 }
  0xfd   : > { %6188 = vmatprep.mubr.msk.bf16.mxu1 %vm746_vm5, %v7136_v48 }
  0xff   : > { %6215 = vmatmul.mubr.msk.bf16.gmra.mxu0 %vm746_vm5, %v7143_v51 }
 0x100   : > { %6218 = vmatprep.mubr.msk.bf16.mxu0 %vm746_vm5, %v7150_v56 }
 0x104   : > { %6189 = vmatmul.mubr.msk.bf16.gmra.mxu1 %vm746_vm5, %v7143_v51 }
 0x105   : > { %6192 = vmatprep.mubr.msk.bf16.mxu1 %vm746_vm5, %v7150_v56 }
 0x107   : > { %6219 = vmatmul.mubr.msk.bf16.gmra.mxu0 %vm746_vm5, %v723_v61 }
 0x108   : > { %6222 = vmatprep.mubr.msk.bf16.mxu0 %vm746_vm5, %v725_v10 }
 0x10c   : > { %6193 = vmatmul.mubr.msk.bf16.gmra.mxu1 %vm746_vm5, %v723_v61 }
 0x10d   : > { %6196 = vmatprep.mubr.msk.bf16.mxu1 %vm746_vm5, %v725_v10 }
 0x10f   : > { %6223 = vmatmul.mubr.msk.bf16.gmra.mxu0 %vm746_vm5, %v727_v62 }
 0x110   : > { %6226 = vmatprep.mubr.msk.bf16.mxu0 %vm746_vm5, %v729_v32 }
 0x114   : > { %6197 = vmatmul.mubr.msk.bf16.gmra.mxu1 %vm746_vm5, %v727_v62 }
 0x115   : > { %6200 = vmatprep.mubr.msk.bf16.mxu1 %vm746_vm5, %v729_v32 }
 0x117   : > { %6227 = vmatmul.mubr.msk.bf16.gmra.mxu0 %vm746_vm5, %v731_v63 }
 0x118   : > { %6230 = vmatprep.mubr.msk.bf16.mxu0 %vm746_vm5, %v733_v44 }
 0x11c   : > { %6201 = vmatmul.mubr.msk.bf16.gmra.mxu1 %vm746_vm5, %v731_v63 }
 0x11f   : > { %6231 = vmatmul.mubr.msk.bf16.gmra.mxu0 %vm746_vm5, %v735_v31  ;;  %vm1838_vm5 = vmand %vm1836_vm3, %vm1837_vm4 }
 0x17b   : > { %v6152_v29 = vpop.f32.mrf.mxu1 }
 0x17d   : > { %v829_v15 = vpop.f32.mrf.mxu1 }
 0x17f   : > { %v7234_v33 = vpop.f32.mrf.mxu1 }
 0x181   : > { %v7236_v36 = vpop.f32.mrf.mxu1 }
 0x183   : > { %v7238_v37 = vpop.f32.mrf.mxu1 }
 0x185   : > { %v7240_v35 = vpop.f32.mrf.mxu1 }
 0x187   : > { %v7242_v38 = vpop.f32.mrf.mxu1 }
 0x189   : > { %v7244_v39 = vpop.f32.mrf.mxu1 }
 0x18b   : > { %v7246_v40 = vpop.f32.mrf.mxu1 }
 0x18d   : > { %v7248_v41 = vpop.f32.mrf.mxu1 }
 0x18f   : > { %v7250_v42 = vpop.f32.mrf.mxu1 }
 0x191   : > { %v7252_v4 = vpop.f32.mrf.mxu1 }
 0x193   : > { %v7254_v43 = vpop.f32.mrf.mxu1 }
 0x195   : > { %v7256_v45 = vpop.f32.mrf.mxu1 }
 0x197   : > { %v7258_v5 = vpop.f32.mrf.mxu1 }
 0x199   : > { %v7260_v47 = vpop.f32.mrf.mxu1 }
 0x19b   : > { %v7262_v48 = vpop.f32.mrf.mxu1 }
 0x19d   : > { %v7264_v0 = vpop.f32.mrf.mxu1 }
 0x19f   : > { %v7266_v49 = vpop.f32.mrf.mxu1 }
 0x1a1   : > { %v7268_v50 = vpop.f32.mrf.mxu1 }
 0x1a3   : > { %v7270_v51 = vpop.f32.mrf.mxu1 }
 0x1a5   : > { %v7272_v1 = vpop.f32.mrf.mxu1 }
 0x1a7   : > { %v6148_v52 = vpop.f32.mrf.mxu0  ;;  %v7274_v54 = vpop.f32.mrf.mxu1 }
 0x1a9   : > { %v813_v56 = vpop.f32.mrf.mxu0  ;;  %v7276_v6 = vpop.f32.mrf.mxu1 }
 0x1ab   : > { %v6149_v58 = vpop.f32.mrf.mxu0 }
 0x1ac   : > { %v6178_v59 = vpop.f32.mrf.mxu1 }
 0x1ad   : > { %v977_v61 = vadd.f32 %v6178_v59, %v6148_v52  ;;  %v816_v7 = vpop.f32.mrf.mxu0 }
 0x1ae   : > { %v968_v8 = vpop.f32.mrf.mxu1 }
 0x1af   : > { %v969_v12 = vadd.f32 %v968_v8, %v813_v56  ;;  %v6208_v10 = vpop.f32.mrf.mxu0 }
 0x1b0   : > { %v1239_v53 = vadd.f32 %v6208_v10, %v977_v61  ;;  %v6179_v60 = vpop.f32.mrf.mxu1 }
 0x1b1   : > { %v980_v24 = vadd.f32 %v6179_v60, %v6149_v58  ;;  %v1126_v62 = vpop.f32.mrf.mxu0 }
 0x1b2   : > { %v1267_v2 = vmax.f32 %v1239_v53, 0.0  ;;  %v1237_v13 = vadd.f32 %v1126_v62, %v969_v12  ;;  %v971_v14 = vpop.f32.mrf.mxu1 }
 0x1b3   : > { %v972_v32 = vadd.f32 %v971_v14, %v816_v7  ;;  %v6209_v17 = vpop.f32.mrf.mxu0 }
 0x1b4   : > { %v7278_v19 = vpack.c.bf16 %v1267_v2, %v1267_v2  ;;  %v1265_v34 = vmax.f32 %v1237_v13, 0.0  ;;  %v1240_v63 = vadd.f32 %v6209_v17, %v980_v24  ;;  %v6182_v16 = vpop.f32.mrf.mxu1 }
 0x1b5   : > { %v993_v20 = vadd.f32 %v6182_v16, %v6152_v29  ;;  %v1129_v22 = vpop.f32.mrf.mxu0 }
 0x1b6   : > { %v7280_v44 = vpack.c.bf16 %v1265_v34, %v1265_v34  ;;  %v1268_v23 = vmax.f32 %v1240_v63, 0.0  ;;  %v1238_v46 = vadd.f32 %v1129_v22, %v972_v32  ;;  %v984_v25 = vpop.f32.mrf.mxu1  ;;  %v1850_v26 = vrot.slane %v7278_v19, 5  ;;  %1415 = vst.msk [vmem:[#allocation2 + $0x8] sm:$0xf] %vm1412_vm7, %v7278_v19 }
 0x1b7   : > { %v985_v27 = vadd.f32 %v984_v25, %v829_v15  ;;  %v6212_v28 = vpop.f32.mrf.mxu0  ;;  %v1465_v55 = vshll.u32 %v7278_v19, 16  ;;  %v1469_v30 = vshrl.u32 %v7278_v19, 16 }
 0x1b8   : > { %v5968_v3 = vpack.c.bf16 %v1268_v23, %v1268_v23  ;;  %v1266_v11 = vmax.f32 %v1238_v46, 0.0  ;;  %v1243_v18 = vadd.f32 %v6212_v28, %v993_v20  ;;  %v6183_v9 = vpop.f32.mrf.mxu1  ;;  %1413 = vst.msk [vmem:[#allocation2] sm:$0xf] %vm1412_vm7, %v7280_v44  ;;  %v1852_v52 = vrot.slane %v1850_v26, 4 }
 0x1b9   : > { %v996_v31 = vadd.f32 %v6183_v9, %v7234_v33  ;;  %v1142_v29 = vpop.f32.mrf.mxu0  ;;  %v7301_v56 = vrot.slane %v1465_v55, 5  ;;  %v1471_v58 = vrot.slane %v1469_v30, 4 }
 0x1ba   : > { %v7303_v59 = vpack.c.bf16 %v1266_v11, %v1266_v11  ;;  %v1271_v61 = vmax.f32 %v1243_v18, 0.0  ;;  %v1241_v7 = vadd.f32 %v1142_v29, %v985_v27  ;;  %v987_v8 = vpop.f32.mrf.mxu1  ;;  %v1853_v12 = vrot.slane %v5968_v3, 5  ;;  %1416 = vst.msk [vmem:[#allocation2 + $0xc] sm:$0xf] %vm1412_vm7, %v5968_v3 }
 0x1bb   : > { %v988_v33 = vadd.f32 %v987_v8, %v7236_v36  ;;  %v6213_v10 = vpop.f32.mrf.mxu0  ;;  %v1472_v53 = vor.u32 %v1471_v58, %v7301_v56  ;;  %v1475_v60 = vshll.u32 %v5968_v3, 16  ;;  %v1479_v24 = vshrl.u32 %v5968_v3, 16  ;;  %v6489_v36 = vld [vmem:[%s9029_s2 + $0x50] sm:$0xff]  }
 0x1bc   : > { %v7308_v62 = vpack.c.bf16 %v1271_v61, %v1271_v61  ;;  %v1269_v2 = vmax.f32 %v1241_v7, 0.0  ;;  %v1244_v13 = vadd.f32 %v6213_v10, %v996_v31  ;;  %v6186_v14 = vpop.f32.mrf.mxu1  ;;  %v1854_v32 = vsel %vm7295_vm12, %v1852_v52, %v1853_v12  ;;  %1414 = vst.msk [vmem:[#allocation2 + $0x4] sm:$0xf] %vm1412_vm7, %v7303_v59  ;;  %6236 = vmatprep.subr.bf16.mxu1 %v6489_v36 }
 0x1bd   : > { %v1009_v34 = vadd.f32 %v6186_v14, %v7238_v37  ;;  %v1145_v63 = vpop.f32.mrf.mxu0  ;;  %1932 = vrot.lane.b32.xlu0 %v1854_v32, %s6768_s13  ;;  %v1473_v16 = vrot.slane %v1472_v53, 4  ;;  %v1477_v20 = vrot.slane %v1475_v60, 5  ;;  %v1855_v22 = vrot.slane %v1853_v12, 4  ;;  %6237 = vmatpush3.bf16.msra.mxu1 %v6489_v36 }
 0x1be   : > { %v7325_v23 = vpack.c.bf16 %v1269_v2, %v1269_v2  ;;  %v1272_v46 = vmax.f32 %v1244_v13, 0.0  ;;  %v1242_v25 = vadd.f32 %v1145_v63, %v988_v33  ;;  %v1000_v27 = vpop.f32.mrf.mxu1  ;;  %v1862_v28 = vrot.slane %v7308_v62, 5  ;;  %1419 = vst.msk [vmem:[#allocation2 + $0x18] sm:$0xf] %vm1412_vm7, %v7308_v62 }
 0x1bf   : > { %v1001_v37 = vadd.f32 %v1000_v27, %v7240_v35  ;;  %v6216_v55 = vpop.f32.mrf.mxu0  ;;  %v1478_v30 = vsel %vm7314_vm13, %v1473_v16, %v1477_v20  ;;  %v1481_v3 = vrot.slane %v1479_v24, 4  ;;  %v1505_v11 = vshll.u32 %v7308_v62, 16 }
 0x1c0   : > { %v7334_v18 = vpack.c.bf16 %v1272_v46, %v1272_v46  ;;  %v1270_v9 = vmax.f32 %v1242_v25, 0.0  ;;  %v1247_v21 = vadd.f32 %v6216_v55, %v1009_v34  ;;  %v6187_v31 = vpop.f32.mrf.mxu1  ;;  %v1856_v29 = vrot.slane %v7325_v23, 5  ;;  %1417 = vst.msk [vmem:[#allocation2 + $0x10] sm:$0xf] %vm1412_vm7, %v7325_v23 }
 0x1c1   : > { %v1012_v35 = vadd.f32 %v6187_v31, %v7242_v38  ;;  %v1158_v52 = vpop.f32.mrf.mxu0  ;;  %1728 = vrot.lane.b32.xlu0 %v1478_v30, %s6769_s18  ;;  %v1864_v58 = vrot.slane %v1862_v28, 4  ;;  %v1482_v61 = vor.u32 %v1481_v3, %v1477_v20  ;;  %v1485_v7 = vshll.u32 %v7325_v23, 16 }
 0x1c2   : > { %v7344_v8 = vpack.c.bf16 %v1270_v9, %v1270_v9  ;;  %v1275_v12 = vmax.f32 %v1247_v21, 0.0  ;;  %v1245_v33 = vadd.f32 %v1158_v52, %v1001_v37  ;;  %v1003_v10 = vpop.f32.mrf.mxu1  ;;  %v1857_v53 = vsel %vm7295_vm12, %v1855_v22, %v1856_v29  ;;  %1420 = vst.msk [vmem:[#allocation2 + $0x1c] sm:$0xf] %vm1412_vm7, %v7334_v18 }
 0x1c3   : > { %v1004_v38 = vadd.f32 %v1003_v10, %v7244_v39  ;;  %v6217_v60 = vpop.f32.mrf.mxu0  ;;  %1934 = vrot.lane.b32.xlu1 %v1857_v53, %s6768_s13  ;;  %v1865_v24 = vrot.slane %v7334_v18, 5  ;;  %v1483_v2 = vrot.slane %v1482_v61, 4  ;;  %v7353_v13 = vrot.slane %v1485_v7, 5  ;;  %v6490_v39 = vld [vmem:[%s9029_s2 + $0x48] sm:$0xff]  }
 0x1c4   : > { %v7355_v14 = vpack.c.bf16 %v1275_v12, %v1275_v12  ;;  %v1273_v32 = vmax.f32 %v1245_v33, 0.0  ;;  %v1248_v36 = vadd.f32 %v6217_v60, %v1012_v35  ;;  %v6190_v34 = vpop.f32.mrf.mxu1  ;;  %v1858_v63 = vrot.slane %v1856_v29, 4  ;;  %1418 = vst.msk [vmem:[#allocation2 + $0x14] sm:$0xf] %vm1412_vm7, %v7344_v8  ;;  %6238 = vmatprep.subr.bf16.mxu1 %v6490_v39 }
 0x1c5   : > { %v1025_v16 = vadd.f32 %v6190_v34, %v7246_v40  ;;  %v1161_v20 = vpop.f32.mrf.mxu0  ;;  %v1866_v22 = vsel %vm7295_vm12, %v1864_v58, %v1865_v24  ;;  %v1488_v46 = vsel %vm7314_vm13, %v1483_v2, %v7353_v13  ;;  %v1859_v25 = vrot.slane %v7344_v8, 5  ;;  %6239 = vmatpush3.bf16.msra.mxu1 %v6490_v39 }
 0x1c6   : > { %v7369_v27 = vpack.c.bf16 %v1273_v32, %v1273_v32  ;;  %v1276_v37 = vmax.f32 %v1248_v36, 0.0  ;;  %v1246_v55 = vadd.f32 %v1161_v20, %v1004_v38  ;;  %1940 = vrot.lane.b32.xlu0 %v1866_v22, %s6768_s13  ;;  %v1016_v30 = vpop.f32.mrf.mxu1  ;;  %v7372_v3 = vrot.slane %v1505_v11, 5  ;;  %1423 = vst.msk [vmem:[#allocation2 + $0x28] sm:$0xf] %vm1412_vm7, %v7355_v14 }
 0x1c7   : > { %v1017_v40 = vadd.f32 %v1016_v30, %v7248_v41  ;;  %v6220_v9 = vpop.f32.mrf.mxu0  ;;  %1730 = vrot.lane.b32.xlu1 %v1488_v46, %s6769_s18  ;;  %v1860_v21 = vsel %vm7295_vm12, %v1858_v63, %v1859_v25  ;;  %v1861_v31 = vrot.slane %v1859_v25, 4  ;;  %v1509_v29 = vshrl.u32 %v7308_v62, 16  ;;  %v6491_v41 = vld [vmem:[%s9029_s2 + $0x40] sm:$0xff]  }
 0x1c8   : > { %v7381_v35 = vpack.c.bf16 %v1276_v37, %v1276_v37  ;;  %v1274_v11 = vmax.f32 %v1246_v55, 0.0  ;;  %v1251_v52 = vadd.f32 %v6220_v9, %v1025_v16  ;;  %v6191_v58 = vpop.f32.mrf.mxu1  ;;  %v1515_v61 = vshll.u32 %v7334_v18, 16  ;;  %1421 = vst.msk [vmem:[#allocation2 + $0x20] sm:$0xf] %vm1412_vm7, %v7369_v27  ;;  %6240 = vmatprep.subr.bf16.mxu1 %v6491_v41 }
 0x1c9   : > { %v1028_v7 = vadd.f32 %v6191_v58, %v7250_v42  ;;  %v1174_v12 = vpop.f32.mrf.mxu0  ;;  %v1863_v33 = vsel %vm7295_vm12, %v1861_v31, %v1862_v28  ;;  %v1511_v10 = vrot.slane %v1509_v29, 4  ;;  %v1867_v53 = vrot.slane %v1865_v24, 4  ;;  %6241 = vmatpush3.bf16.msra.mxu1 %v6491_v41 }
 0x1ca   : > { %v7394_v38 = vpack.c.bf16 %v1274_v11, %v1274_v11  ;;  %v1279_v60 = vmax.f32 %v1251_v52, 0.0  ;;  %v1249_v2 = vadd.f32 %v1174_v12, %v1017_v40  ;;  %1936 = vrot.lane.b32.xlu0 %v1860_v21, %s6768_s13  ;;  %v1019_v32 = vpop.f32.mrf.mxu1  ;;  %v7397_v36 = vrot.slane %v1515_v61, 5  ;;  %1424 = vst.msk [vmem:[#allocation2 + $0x2c] sm:$0xf] %vm1412_vm7, %v7381_v35 }
 0x1cb   : > { %v1020_v42 = vadd.f32 %v1019_v32, %v7252_v4  ;;  %v6221_v62 = vpop.f32.mrf.mxu0  ;;  %1938 = vrot.lane.b32.xlu1 %v1863_v33, %s6768_s13  ;;  %v1512_v28 = vor.u32 %v1511_v10, %v7372_v3  ;;  %v1868_v24 = vrot.slane %v7369_v27, 5  ;;  %v1489_v34 = vshrl.u32 %v7325_v23, 16  ;;  %v6493_v4 = vld [vmem:[%s9029_s2 + $0x38] sm:$0xff]  }
 0x1cc   : > { %v7406_v63 = vpack.c.bf16 %v1279_v60, %v1279_v60  ;;  %v1277_v39 = vmax.f32 %v1249_v2, 0.0  ;;  %v1252_v16 = vadd.f32 %v6221_v62, %v1028_v7  ;;  %v6194_v20 = vpop.f32.mrf.mxu1  ;;  %v1495_v22 = vshll.u32 %v7344_v8, 16  ;;  %1422 = vst.msk [vmem:[#allocation2 + $0x24] sm:$0xf] %vm1412_vm7, %v7394_v38  ;;  %6242 = vmatprep.subr.bf16.mxu1 %v6493_v4 }
 0x1cd   : > { %v1041_v46 = vadd.f32 %v6194_v20, %v7254_v43  ;;  %v1177_v25 = vpop.f32.mrf.mxu0  ;;  %v1513_v37 = vrot.slane %v1512_v28, 4  ;;  %v1869_v23 = vsel %vm7295_vm12, %v1867_v53, %v1868_v24  ;;  %v1491_v55 = vrot.slane %v1489_v34, 4  ;;  %6243 = vmatpush3.bf16.msra.mxu1 %v6493_v4 }
 0x1ce   : > { %v7419_v30 = vpack.c.bf16 %v1277_v39, %v1277_v39  ;;  %v1280_v40 = vmax.f32 %v1252_v16, 0.0  ;;  %v1250_v9 = vadd.f32 %v1177_v25, %v1020_v42  ;;  %v1032_v21 = vpop.f32.mrf.mxu1  ;;  %v1497_v31 = vrot.slane %v1495_v22, 5  ;;  %1427 = vst.msk [vmem:[#allocation2 + $0x38] sm:$0xf] %vm1412_vm7, %v7406_v63 }
 0x1cf   : > { %v1518_v43 = vsel %vm7314_vm13, %v1513_v37, %v7397_v36  ;;  %v1033_v29 = vadd.f32 %v1032_v21, %v7256_v45  ;;  %v6224_v11 = vpop.f32.mrf.mxu0  ;;  %1942 = vrot.lane.b32.xlu1 %v1869_v23, %s6768_s13  ;;  %v1492_v52 = vor.u32 %v1491_v55, %v7353_v13  ;;  %v1499_v58 = vshrl.u32 %v7344_v8, 16  ;;  %v6494_v45 = vld [vmem:[%s9029_s2 + $0x30] sm:$0xff]  }
 0x1d0   : > { %v7430_v61 = vpack.c.bf16 %v1280_v40, %v1280_v40  ;;  %v1278_v41 = vmax.f32 %v1250_v9, 0.0  ;;  %1736 = vrot.lane.b32.xlu0 %v1518_v43, %s6769_s18  ;;  %v1255_v7 = vadd.f32 %v6224_v11, %v1041_v46  ;;  %v6195_v12 = vpop.f32.mrf.mxu1  ;;  %v1874_v33 = vrot.slane %v7355_v14, 5  ;;  %1425 = vst.msk [vmem:[#allocation2 + $0x30] sm:$0xf] %vm1412_vm7, %v7419_v30  ;;  %6244 = vmatprep.subr.bf16.mxu1 %v6494_v45 }
 0x1d1   : > { %v1044_v13 = vadd.f32 %v6195_v12, %v7258_v5  ;;  %v1190_v8 = vpop.f32.mrf.mxu0  ;;  %v1493_v10 = vrot.slane %v1492_v52, 4  ;;  %v1501_v53 = vrot.slane %v1499_v58, 4  ;;  %v1877_v60 = vrot.slane %v7381_v35, 5  ;;  %6245 = vmatpush3.bf16.msra.mxu1 %v6494_v45 }
 0x1d2   : > { %v7441_v2 = vpack.c.bf16 %v1278_v41, %v1278_v41  ;;  %v1283_v32 = vmax.f32 %v1255_v7, 0.0  ;;  %v1253_v42 = vadd.f32 %v1190_v8, %v1033_v29  ;;  %v1035_v62 = vpop.f32.mrf.mxu1  ;;  %v1876_v28 = vrot.slane %v1874_v33, 4  ;;  %1428 = vst.msk [vmem:[#allocation2 + $0x3c] sm:$0xf] %vm1412_vm7, %v7430_v61 }
 0x1d3   : > { %v1498_v5 = vsel %vm7314_vm13, %v1493_v10, %v1497_v31  ;;  %v1036_v34 = vadd.f32 %v1035_v62, %v7260_v47  ;;  %v6225_v39 = vpop.f32.mrf.mxu0  ;;  %v1502_v16 = vor.u32 %v1501_v53, %v1497_v31  ;;  %v1519_v20 = vshrl.u32 %v7334_v18, 16 }
 0x1d4   : > { %v7451_v22 = vpack.c.bf16 %v1283_v32, %v1283_v32  ;;  %v1281_v4 = vmax.f32 %v1253_v42, 0.0  ;;  %1732 = vrot.lane.b32.xlu0 %v1498_v5, %s6769_s18  ;;  %v1256_v46 = vadd.f32 %v6225_v39, %v1044_v13  ;;  %v6198_v25 = vpop.f32.mrf.mxu1  ;;  %v1878_v37 = vsel %vm7295_vm12, %v1876_v28, %v1877_v60  ;;  %1426 = vst.msk [vmem:[#allocation2 + $0x34] sm:$0xf] %vm1412_vm7, %v7441_v2 }
 0x1d5   : > { %v1503_v47 = vrot.slane %v1502_v16, 4  ;;  %v1057_v23 = vadd.f32 %v6198_v25, %v7262_v48  ;;  %v1193_v18 = vpop.f32.mrf.mxu0  ;;  %v1521_v55 = vrot.slane %v1519_v20, 4  ;;  %v1525_v40 = vshll.u32 %v7369_v27, 16 }
 0x1d6   : > { %v7462_v9 = vpack.c.bf16 %v1281_v4, %v1281_v4  ;;  %v1284_v21 = vmax.f32 %v1256_v46, 0.0  ;;  %v1254_v31 = vadd.f32 %v1193_v18, %v1036_v34  ;;  %v1048_v43 = vpop.f32.mrf.mxu1  ;;  %v1870_v29 = vrot.slane %v1868_v24, 4  ;;  %1431 = vst.msk [vmem:[#allocation2 + $0x48] sm:$0xf] %vm1412_vm7, %v7451_v22 }
 0x1d7   : > { %v1508_v11 = vsel %vm7314_vm13, %v1503_v47, %v7372_v3  ;;  %v1049_v48 = vadd.f32 %v1048_v43, %v7264_v0  ;;  %v6228_v52 = vpop.f32.mrf.mxu0  ;;  %v1522_v58 = vor.u32 %v1521_v55, %v7397_v36  ;;  %v7473_v41 = vrot.slane %v1525_v40, 5 }
 0x1d8   : > { %v7475_v7 = vpack.c.bf16 %v1284_v21, %v1284_v21  ;;  %1734 = vrot.lane.b32.xlu1 %v1508_v11, %s6769_s18  ;;  %v1282_v12 = vmax.f32 %v1254_v31, 0.0  ;;  %1948 = vrot.lane.b32.xlu0 %v1878_v37, %s6768_s13  ;;  %v1259_v24 = vadd.f32 %v6228_v52, %v1057_v23  ;;  %v6199_v45 = vpop.f32.mrf.mxu1  ;;  %v1871_v13 = vrot.slane %v7394_v38, 5  ;;  %1429 = vst.msk [vmem:[#allocation2 + $0x40] sm:$0xf] %vm1412_vm7, %v7462_v9 }
 0x1d9   : > { %v1523_v0 = vrot.slane %v1522_v58, 4  ;;  %v1060_v3 = vadd.f32 %v6199_v45, %v7266_v49  ;;  %v1206_v36 = vpop.f32.mrf.mxu0  ;;  %v1545_v8 = vshll.u32 %v7355_v14, 16  ;;  %v1549_v10 = vshrl.u32 %v7355_v14, 16 }
 0x1da   : > { %v7485_v53 = vpack.c.bf16 %v1282_v12, %v1282_v12  ;;  %v1287_v32 = vmax.f32 %v1259_v24, 0.0  ;;  %v1257_v42 = vadd.f32 %v1206_v36, %v1049_v48  ;;  %v1872_v62 = vsel %vm7295_vm12, %v1870_v29, %v1871_v13  ;;  %v1051_v28 = vpop.f32.mrf.mxu1  ;;  %1432 = vst.msk [vmem:[#allocation2 + $0x4c] sm:$0xf] %vm1412_vm7, %v7475_v7 }
 0x1db   : > { %v1528_v49 = vsel %vm7314_vm13, %v1523_v0, %v7473_v41  ;;  %v1052_v5 = vadd.f32 %v1051_v28, %v7268_v50  ;;  %v6229_v34 = vpop.f32.mrf.mxu0  ;;  %v1873_v39 = vrot.slane %v1871_v13, 4  ;;  %v7495_v16 = vrot.slane %v1545_v8, 5 }
 0x1dc   : > { %v7497_v20 = vpack.c.bf16 %v1287_v32, %v1287_v32  ;;  %1738 = vrot.lane.b32.xlu1 %v1528_v49, %s6769_s18  ;;  %v1285_v4 = vmax.f32 %v1257_v42, 0.0  ;;  %1944 = vrot.lane.b32.xlu0 %v1872_v62, %s6768_s13  ;;  %v1260_v46 = vadd.f32 %v6229_v34, %v1060_v3  ;;  %v6202_v25 = vpop.f32.mrf.mxu1  ;;  %v1551_v37 = vrot.slane %v1549_v10, 4  ;;  %1430 = vst.msk [vmem:[#allocation2 + $0x44] sm:$0xf] %vm1412_vm7, %v7485_v53 }
 0x1dd   : > { %v1875_v50 = vsel %vm7295_vm12, %v1873_v39, %v1874_v33  ;;  %v1073_v47 = vadd.f32 %v6202_v25, %v7270_v51  ;;  %v1209_v23 = vpop.f32.mrf.mxu0  ;;  %v1555_v18 = vshll.u32 %v7381_v35, 16  ;;  %v1879_v55 = vrot.slane %v1877_v60, 4 }
 0x1de   : > { %v7511_v40 = vpack.c.bf16 %v1285_v4, %v1285_v4  ;;  %v1288_v21 = vmax.f32 %v1260_v46, 0.0  ;;  %v1258_v31 = vadd.f32 %v1209_v23, %v1052_v5  ;;  %v1552_v43 = vor.u32 %v1551_v37, %v7495_v16  ;;  %v1064_v29 = vpop.f32.mrf.mxu1  ;;  %1435 = vst.msk [vmem:[#allocation2 + $0x58] sm:$0xf] %vm1412_vm7, %v7497_v20 }
 0x1df   : > { %v7516_v14 = vrot.slane %v1555_v18, 5  ;;  %v1065_v51 = vadd.f32 %v1064_v29, %v7272_v1  ;;  %v1880_v33 = vrot.slane %v7419_v30, 5  ;;  %v6232_v11 = vpop.f32.mrf.mxu0  ;;  %v1529_v48 = vshrl.u32 %v7369_v27, 16 }
 0x1e0   : > { %v7521_v60 = vpack.c.bf16 %v1288_v21, %v1288_v21  ;;  %1946 = vrot.lane.b32.xlu1 %v1875_v50, %s6768_s13  ;;  %v1286_v52 = vmax.f32 %v1258_v31, 0.0  ;;  %v1553_v58 = vrot.slane %v1552_v43, 4  ;;  %v1263_v12 = vadd.f32 %v6232_v11, %v1073_v47  ;;  %v6203_v24 = vpop.f32.mrf.mxu1  ;;  %1433 = vst.msk [vmem:[#allocation2 + $0x50] sm:$0xf] %vm1412_vm7, %v7511_v40 }
 0x1e1   : > { %v1881_v1 = vsel %vm7295_vm12, %v1879_v55, %v1880_v33  ;;  %v1076_v45 = vadd.f32 %v6203_v24, %v7274_v54  ;;  %v1531_v13 = vrot.slane %v1529_v48, 4  ;;  %v1535_v27 = vshll.u32 %v7394_v38, 16  ;;  %v1222_v0 = vpop.f32.mrf.mxu0 }
 0x1e2   : > { %v7532_v3 = vpack.c.bf16 %v1286_v52, %v1286_v52  ;;  %v1558_v36 = vsel %vm7314_vm13, %v1553_v58, %v7516_v14  ;;  %v1291_v8 = vmax.f32 %v1263_v12, 0.0  ;;  %v1261_v10 = vadd.f32 %v1222_v0, %v1065_v51  ;;  %v1067_v32 = vpop.f32.mrf.mxu1  ;;  %1436 = vst.msk [vmem:[#allocation2 + $0x5c] sm:$0xf] %vm1412_vm7, %v7521_v60 }
 0x1e3   : > { %1744 = vrot.lane.b32.xlu0 %v1558_v36, %s6769_s18  ;;  %v1532_v54 = vor.u32 %v1531_v13, %v7473_v41  ;;  %v1537_v42 = vrot.slane %v1535_v27, 5  ;;  %v1068_v62 = vadd.f32 %v1067_v32, %v7276_v6  ;;  %v1539_v28 = vshrl.u32 %v7394_v38, 16  ;;  %v6233_v49 = vpop.f32.mrf.mxu0 }
 0x1e4   : > { %1950 = vrot.lane.b32.xlu1 %v1881_v1, %s6768_s13  ;;  %v7544_v5 = vpack.c.bf16 %v1291_v8, %v1291_v8  ;;  %v1289_v34 = vmax.f32 %v1261_v10, 0.0  ;;  %v1264_v39 = vadd.f32 %v6233_v49, %v1076_v45  ;;  %1434 = vst.msk [vmem:[#allocation2 + $0x54] sm:$0xf] %vm1412_vm7, %v7532_v3  ;;  %v1886_v41 = vrot.slane %v7406_v63, 5 }
 0x1e5   : > { %v1533_v4 = vrot.slane %v1532_v54, 4  ;;  %v1541_v46 = vrot.slane %v1539_v28, 4  ;;  %v1225_v25 = vpop.f32.mrf.mxu0  ;;  %v1559_v6 = vshrl.u32 %v7381_v35, 16  ;;  %v1889_v50 = vrot.slane %v7430_v61, 5 }
 0x1e6   : > { %v7550_v37 = vpack.c.bf16 %v1289_v34, %v1289_v34  ;;  %v1292_v38 = vmax.f32 %v1264_v39, 0.0  ;;  %v1262_v47 = vadd.f32 %v1225_v25, %v1068_v62  ;;  %1439 = vst.msk [vmem:[#allocation2 + $0x68] sm:$0xf] %vm1412_vm7, %v7544_v5  ;;  %v1565_v21 = vshll.u32 %v7419_v30, 16 }
 0x1e7   : > { %v1538_v23 = vsel %vm7314_vm13, %v1533_v4, %v1537_v42  ;;  %v1542_v18 = vor.u32 %v1541_v46, %v1537_v42  ;;  %v1561_v55 = vrot.slane %v1559_v6, 4  ;;  %v1888_v29 = vrot.slane %v1886_v41, 4 }
 0x1e8   : > { %1740 = vrot.lane.b32.xlu0 %v1538_v23, %s6769_s18  ;;  %v7559_v31 = vpack.c.bf16 %v1292_v38, %v1292_v38  ;;  %v1290_v35 = vmax.f32 %v1262_v47, 0.0  ;;  %1437 = vst.msk [vmem:[#allocation2 + $0x60] sm:$0xf] %vm1412_vm7, %v7550_v37  ;;  %v1883_v48 = vrot.slane %v7441_v2, 5  ;;  %v1585_v52 = vshll.u32 %v7406_v63, 16 }
 0x1e9   : > { %v1543_v43 = vrot.slane %v1542_v18, 4  ;;  %v1562_v51 = vor.u32 %v1561_v55, %v7516_v14  ;;  %v1589_v58 = vshrl.u32 %v7406_v63, 16  ;;  %v1890_v24 = vsel %vm7295_vm12, %v1888_v29, %v1889_v50 }
 0x1ea   : > { %1441 = vst.msk [vmem:[#allocation2 + $0x6c] sm:$0x7] %vm1440_vm14, %v7559_v31  ;;  %v7566_v11 = vpack.c.bf16 %v1290_v35, %v1290_v35  ;;  %v1567_v1 = vrot.slane %v1565_v21, 5  ;;  %v1595_v14 = vshll.u32 %v7430_v61, 16  ;;  %v1882_v45 = vrot.slane %v1880_v33, 4 }
 0x1eb   : > { %v1548_v12 = vsel %vm7314_vm13, %v1543_v43, %v7495_v16  ;;  %v1587_v13 = vrot.slane %v1585_v52, 5  ;;  %v1591_v27 = vrot.slane %v1589_v58, 4  ;;  %v1563_v63 = vrot.slane %v1562_v51, 4 }
 0x1ec   : > { %1742 = vrot.lane.b32.xlu1 %v1548_v12, %s6769_s18  ;;  %1956 = vrot.lane.b32.xlu0 %v1890_v24, %s6768_s13  ;;  %1438 = vst.msk [vmem:[#allocation2 + $0x64] sm:$0xf] %vm1412_vm7, %v7566_v11  ;;  %v1569_v16 = vshrl.u32 %v7419_v30, 16  ;;  %v1884_v0 = vsel %vm7295_vm12, %v1882_v45, %v1883_v48  ;;  %v1575_v8 = vshll.u32 %v7441_v2, 16  ;;  %v1579_v10 = vshrl.u32 %v7441_v2, 16 }
 0x1ed   : > { %v1592_v36 = vor.u32 %v1591_v27, %v1587_v13  ;;  %v1568_v32 = vsel %vm7314_vm13, %v1563_v63, %v1567_v1  ;;  %v1885_v33 = vrot.slane %v1883_v48, 4  ;;  %v1597_v54 = vrot.slane %v1595_v14, 5  ;;  %v6500_v63 = vld [vmem:[%s9029_s2 + $0x28] sm:$0xff]  }
 0x1ee   : > { %v1571_v42 = vrot.slane %v1569_v16, 4  ;;  %v1577_v30 = vrot.slane %v1575_v8, 5  ;;  %v1581_v28 = vrot.slane %v1579_v10, 4  ;;  %v1599_v34 = vshrl.u32 %v7430_v61, 16  ;;  %6274 = vmatprep.subr.bf16.mxu0 %v6500_v63 }
 0x1ef   : > { %v1593_v62 = vrot.slane %v1592_v36, 4  ;;  %v1892_v39 = vrot.slane %v7462_v9, 5  ;;  %v1898_v2 = vrot.slane %v7451_v22, 5  ;;  %v1887_v46 = vsel %vm7295_vm12, %v1885_v33, %v1886_v41  ;;  %6275 = vmatpush3.bf16.msra.mxu0 %v6500_v63 }
 0x1f0   : > { %1746 = vrot.lane.b32.xlu1 %v1568_v32, %s6769_s18  ;;  %1952 = vrot.lane.b32.xlu0 %v1884_v0, %s6768_s13  ;;  %v1572_v49 = vor.u32 %v1571_v42, %v1567_v1  ;;  %v1582_v4 = vor.u32 %v1581_v28, %v1577_v30  ;;  %v1625_v38 = vshll.u32 %v7451_v22, 16  ;;  %v1891_v47 = vrot.slane %v1889_v50, 4  ;;  %v7638_v42 = vld [vmem:[%s9029_s2 + $0x88] sm:$0xff]  }
 0x1f1   : > { %v1598_v25 = vsel %vm7314_vm13, %v1593_v62, %v1597_v54  ;;  %v1629_v61 = vshrl.u32 %v7451_v22, 16  ;;  %v1901_v23 = vrot.slane %v7475_v7, 5  ;;  %v1601_v18 = vrot.slane %v1599_v34, 4  ;;  %6314 = vmatprep.subr.bf16.mxu1 %v7638_v42 }
 0x1f2   : > { %v1573_v6 = vrot.slane %v1572_v49, 4  ;;  %v1893_v55 = vsel %vm7295_vm12, %v1891_v47, %v1892_v39  ;;  %v1583_v41 = vrot.slane %v1582_v4, 4  ;;  %v1900_v21 = vrot.slane %v1898_v2, 4 }
 0x1f3   : > { %v1605_v35 = vshll.u32 %v7462_v9, 16  ;;  %v7609_v29 = vrot.slane %v1625_v38, 5  ;;  %v1631_v51 = vrot.slane %v1629_v61, 4  ;;  %v1609_v50 = vshrl.u32 %v7462_v9, 16  ;;  %v6503_v61 = vld [vmem:[%s9029_s2 + $0x20] sm:$0xff]  }
 0x1f4   : > { %1954 = vrot.lane.b32.xlu1 %v1887_v46, %s6768_s13  ;;  %1752 = vrot.lane.b32.xlu0 %v1598_v25, %s6769_s18  ;;  %v1578_v43 = vsel %vm7314_vm13, %v1573_v6, %v1577_v30  ;;  %v1902_v22 = vsel %vm7295_vm12, %v1900_v21, %v1901_v23  ;;  %v1602_v48 = vor.u32 %v1601_v18, %v1597_v54  ;;  %v1895_v58 = vrot.slane %v7485_v53, 5 }
 0x1f5   : > { %v1607_v52 = vrot.slane %v1605_v35, 5  ;;  %v1615_v12 = vshll.u32 %v7485_v53, 16  ;;  %v1619_v24 = vshrl.u32 %v7485_v53, 16  ;;  %v1588_v1 = vsel %vm7314_vm13, %v1583_v41, %v1587_v13  ;;  %6276 = vmatprep.subr.bf16.mxu0 %v6503_v61 }
 0x1f6   : > { %v1632_v9 = vor.u32 %v1631_v51, %v7609_v29  ;;  %v1635_v14 = vshll.u32 %v7475_v7, 16  ;;  %v1611_v45 = vrot.slane %v1609_v50, 4  ;;  %v1894_v27 = vrot.slane %v1892_v39, 4  ;;  %6277 = vmatpush3.bf16.msra.mxu0 %v6503_v61 }
 0x1f7   : > { %v1603_v16 = vrot.slane %v1602_v48, 4  ;;  %v1897_v0 = vrot.slane %v1895_v58, 4  ;;  %v1617_v13 = vrot.slane %v1615_v12, 5  ;;  %v1621_v36 = vrot.slane %v1619_v24, 4 }
 0x1f8   : > { %1958 = vrot.lane.b32.xlu1 %v1893_v55, %s6768_s13  ;;  %1748 = vrot.lane.b32.xlu0 %v1578_v43, %s6769_s18  ;;  %v1896_v53 = vsel %vm7295_vm12, %v1894_v27, %v1895_v58  ;;  %v1633_v10 = vrot.slane %v1632_v9, 4  ;;  %v1637_v32 = vrot.slane %v1635_v14, 5  ;;  %v1612_v33 = vor.u32 %v1611_v45, %v1607_v52 }
 0x1f9   : > { %v1608_v8 = vsel %vm7314_vm13, %v1603_v16, %v1607_v52  ;;  %v1639_v54 = vshrl.u32 %v7475_v7, 16  ;;  %v1899_v62 = vsel %vm7295_vm12, %v1897_v0, %v1898_v2  ;;  %v1904_v30 = vrot.slane %v7511_v40, 5 }
 0x1fa   : > { %v1622_v28 = vor.u32 %v1621_v36, %v1617_v13  ;;  %v1638_v49 = vsel %vm7314_vm13, %v1633_v10, %v1637_v32  ;;  %v1613_v34 = vrot.slane %v1612_v33, 4  ;;  %v1665_v39 = vshll.u32 %v7497_v20, 16 }
 0x1fb   : > { %v1669_v7 = vshrl.u32 %v7497_v20, 16  ;;  %v1903_v4 = vrot.slane %v1901_v23, 4  ;;  %v1910_v2 = vrot.slane %v7497_v20, 5  ;;  %v1641_v46 = vrot.slane %v1639_v54, 4 }
 0x1fc   : > { %1750 = vrot.lane.b32.xlu1 %v1588_v1, %s6769_s18  ;;  %1964 = vrot.lane.b32.xlu0 %v1902_v22, %s6768_s13  ;;  %v1623_v6 = vrot.slane %v1622_v28, 4  ;;  %v1913_v38 = vrot.slane %v7521_v60, 5  ;;  %v1645_v47 = vshll.u32 %v7511_v40, 16  ;;  %v1618_v18 = vsel %vm7314_vm13, %v1613_v34, %v1617_v13  ;;  %v6507_v13 = vld [vmem:[%s9029_s2 + $0x18] sm:$0xff]  }
 0x1fd   : > { %v1905_v25 = vsel %vm7295_vm12, %v1903_v4, %v1904_v30  ;;  %v7660_v55 = vrot.slane %v1665_v39, 5  ;;  %v1671_v23 = vrot.slane %v1669_v7, 4  ;;  %v1649_v20 = vshrl.u32 %v7511_v40, 16  ;;  %6278 = vmatprep.subr.bf16.mxu0 %v6507_v13 }
 0x1fe   : > { %v1912_v41 = vrot.slane %v1910_v2, 4  ;;  %v1642_v21 = vor.u32 %v1641_v46, %v1637_v32  ;;  %v1906_v35 = vrot.slane %v1904_v30, 4  ;;  %v1907_v43 = vrot.slane %v7532_v3, 5  ;;  %6279 = vmatpush3.bf16.msra.mxu0 %v6507_v13 }
 0x1ff   : > { %v1628_v51 = vsel %vm7314_vm13, %v1623_v6, %v7609_v29  ;;  %v1647_v22 = vrot.slane %v1645_v47, 5  ;;  %v1675_v40 = vshll.u32 %v7521_v60, 16  ;;  %v1672_v48 = vor.u32 %v1671_v23, %v7660_v55 }
 0x200   : > { %1754 = vrot.lane.b32.xlu1 %v1608_v8, %s6769_s18  ;;  %1960 = vrot.lane.b32.xlu0 %v1896_v53, %s6768_s13  ;;  %v1914_v50 = vsel %vm7295_vm12, %v1912_v41, %v1913_v38  ;;  %v1651_v52 = vrot.slane %v1649_v20, 4  ;;  %v1655_v58 = vshll.u32 %v7532_v3, 16  ;;  %v1659_v12 = vshrl.u32 %v7532_v3, 16 }
 0x201   : > { %v1643_v24 = vrot.slane %v1642_v21, 4  ;;  %v1908_v29 = vsel %vm7295_vm12, %v1906_v35, %v1907_v43  ;;  %v1909_v1 = vrot.slane %v1907_v43, 4  ;;  %v1677_v14 = vrot.slane %v1675_v40, 5 }
 0x202   : > { %v1685_v45 = vshll.u32 %v7550_v37, 16  ;;  %v1689_v27 = vshrl.u32 %v7550_v37, 16  ;;  %v1673_v63 = vrot.slane %v1672_v48, 4  ;;  %v1652_v16 = vor.u32 %v1651_v52, %v1647_v22 }
 0x203   : > { %v1648_v9 = vsel %vm7314_vm13, %v1643_v24, %v1647_v22  ;;  %v1657_v3 = vrot.slane %v1655_v58, 5  ;;  %v1661_v53 = vrot.slane %v1659_v12, 4  ;;  %v1679_v0 = vshrl.u32 %v7521_v60, 16 }
 0x204   : > { %1962 = vrot.lane.b32.xlu1 %v1899_v62, %s6768_s13  ;;  %1760 = vrot.lane.b32.xlu0 %v1638_v49, %s6769_s18  ;;  %v1916_v36 = vrot.slane %v7550_v37, 5  ;;  %v1687_v8 = vrot.slane %v1685_v45, 5  ;;  %v1691_v10 = vrot.slane %v1689_v27, 4  ;;  %v1911_v32 = vsel %vm7295_vm12, %v1909_v1, %v1910_v2 }
 0x205   : > { %v1678_v33 = vsel %vm7314_vm13, %v1673_v63, %v1677_v14  ;;  %v1653_v54 = vrot.slane %v1652_v16, 4  ;;  %v1662_v62 = vor.u32 %v1661_v53, %v1657_v3  ;;  %v1915_v60 = vrot.slane %v1913_v38, 4  ;;  %v6509_v38 = vld [vmem:[%s9029_s2 + $0x10] sm:$0xff]  }
 0x206   : > { %v1681_v30 = vrot.slane %v1679_v0, 4  ;;  %v1919_v37 = vrot.slane %v7566_v11, 5  ;;  %v1695_v28 = vshll.u32 %v7566_v11, 16  ;;  %v1692_v34 = vor.u32 %v1691_v10, %v1687_v8  ;;  %6280 = vmatprep.subr.bf16.mxu0 %v6509_v38  ;;  %v6513_v0 = vld [vmem:[%s9029_s2 + $0x8] sm:$0xff]  }
 0x207   : > { %v1917_v49 = vsel %vm7295_vm12, %v1915_v60, %v1916_v36  ;;  %v1715_v39 = vshll.u32 %v7559_v31, 16  ;;  %v1719_v7 = vshrl.u32 %v7559_v31, 16  ;;  %v1658_v4 = vsel %vm7314_vm13, %v1653_v54, %v1657_v3  ;;  %6281 = vmatpush3.bf16.msra.mxu0 %v6509_v38 }
 0x208   : > { %1966 = vrot.lane.b32.xlu1 %v1905_v25, %s6768_s13  ;;  %1756 = vrot.lane.b32.xlu0 %v1618_v18, %s6769_s18  ;;  %v1663_v2 = vrot.slane %v1662_v62, 4  ;;  %v1918_v46 = vrot.slane %v1916_v36, 4  ;;  %v1699_v25 = vshrl.u32 %v7566_v11, 16  ;;  %v1682_v6 = vor.u32 %v1681_v30, %v1677_v14  ;;  %v6516_v30 = vld [vmem:[%s9029_s2] sm:$0xff]  }
 0x209   : > { %v1697_v61 = vrot.slane %v1695_v28, 5  ;;  %v1446_v18 = vshrl.u32 %v7280_v44, 16  ;;  %v1693_v23 = vrot.slane %v1692_v34, 4  ;;  %v1717_v20 = vrot.slane %v1715_v39, 5  ;;  %6282 = vmatprep.subr.bf16.mxu0 %v6513_v0 }
 0x20a   : > { %v1920_v47 = vsel %vm7295_vm12, %v1918_v46, %v1919_v37  ;;  %v1721_v41 = vrot.slane %v1719_v7, 4  ;;  %v1705_v11 = vshll.u32 %v7544_v5, 16  ;;  %v1668_v21 = vsel %vm7314_vm13, %v1663_v2, %v7660_v55 }
 0x20b   : > { %v1701_v35 = vrot.slane %v1699_v25, 4  ;;  %v1709_v43 = vshrl.u32 %v7544_v5, 16  ;;  %v1921_v22 = vrot.slane %v1919_v37, 4  ;;  %v1698_v48 = vsel %vm7314_vm13, %v1693_v23, %v1697_v61  ;;  %6283 = vmatpush3.bf16.msra.mxu0 %v6513_v0 }
 0x20c   : > { %1758 = vrot.lane.b32.xlu1 %v1628_v51, %s6769_s18  ;;  %1972 = vrot.lane.b32.xlu0 %v1914_v50, %s6768_s13  ;;  %v1449_v51 = vshll.u32 %v7280_v44, 16  ;;  %v1683_v50 = vrot.slane %v1682_v6, 4  ;;  %v1722_v52 = vor.u32 %v1721_v41, %v1717_v20  ;;  %v1707_v55 = vrot.slane %v1705_v11, 5  ;;  %v6504_v11 = vld [vmem:[%s9029_s2 + $0x80] sm:$0xff]  }
 0x20d   : > { %v1702_v58 = vor.u32 %v1701_v35, %v1697_v61  ;;  %v1711_v12 = vrot.slane %v1709_v43, 4  ;;  %v1448_v24 = vrot.slane %v1446_v18, 4  ;;  %v1922_v1 = vrot.slane %v7544_v5, 5  ;;  %6284 = vmatprep.subr.bf16.mxu0 %v6516_v30  ;;  %v6508_v43 = vld [vmem:[%s9029_s2 + $0x78] sm:$0xff]  }
 0x20e   : > { %v1688_v40 = vsel %vm7314_vm13, %v1683_v50, %v1687_v8  ;;  %v1723_v14 = vrot.slane %v1722_v52, 4  ;;  %v1925_v45 = vrot.slane %v7559_v31, 5  ;;  %v1455_v27 = vshll.u32 %v7303_v59, 16  ;;  %v6514_v52 = vld [vmem:[%s9029_s2 + $0x68] sm:$0xff]  }
 0x20f   : > { %v1703_v63 = vrot.slane %v1702_v58, 4  ;;  %v1712_v16 = vor.u32 %v1711_v12, %v1707_v55  ;;  %v1459_v53 = vshrl.u32 %v7303_v59, 16  ;;  %v1924_v5 = vrot.slane %v1922_v1, 4  ;;  %6285 = vmatpush3.bf16.msra.mxu0 %v6516_v30  ;;  %v6519_v12 = vld [vmem:[%s9029_s2 + $0x60] sm:$0xff]  }
 0x210   : > { %1762 = vrot.lane.b32.xlu1 %v1648_v9, %s6769_s18  ;;  %1968 = vrot.lane.b32.xlu0 %v1908_v29, %s6768_s13  ;;  %v1451_v29 = vrot.slane %v1449_v51, 5  ;;  %v1923_v9 = vsel %vm7295_vm12, %v1921_v22, %v1922_v1  ;;  %v1457_v13 = vrot.slane %v1455_v27, 5  ;;  %v1847_v62 = vrot.slane %v7303_v59, 5 }
 0x211   : > { %v1926_v31 = vsel %vm7295_vm12, %v1924_v5, %v1925_v45  ;;  %v1708_v36 = vsel %vm7314_vm13, %v1703_v63, %v1707_v55  ;;  %v1713_v8 = vrot.slane %v1712_v16, 4  ;;  %v5604_v37 = vrot.slane %v7280_v44, 9  ;;  %4010 = vmatprep.subr.bf16.mxu0 %v6767_v57 }
 0x212   : > { %v1452_v3 = vor.u32 %v1451_v29, %v1448_v24  ;;  %v1927_v59 = vrot.slane %v1925_v45, 4  ;;  %v1849_v39 = vrot.slane %v1847_v62, 4  ;;  %vm2984_vm7 = vcmask 1043459  }
 0x213   : > { %v1848_v28 = vsel %vm7295_vm12, %v5604_v37, %v1847_v62  ;;  %vm2986_vm9 = vmor %vm2985_vm8, %vm2984_vm7  ;;  %vm3660_vm14 = vcmask 518144  }
 0x214   : > { %1970 = vrot.lane.b32.xlu1 %v1911_v32, %s6768_s13  ;;  %1768 = vrot.lane.b32.xlu0 %v1678_v33, %s6769_s18  ;;  %v1453_v10 = vrot.slane %v1452_v3, 4  ;;  %v1461_v32 = vrot.slane %v1459_v53, 4  ;;  %v1718_v33 = vsel %vm7314_vm13, %v1713_v8, %v1717_v20  ;;  %v1851_v2 = vsel %vm7295_vm12, %v1849_v39, %v1850_v26  ;;  %2987 = vst.msk [vmem:[#allocation3 + $0xd8] sm:$0x88] %vm2986_vm9, %v6767_v57 }
 0x216   : > { %v1458_v54 = vsel %vm7314_vm13, %v1453_v10, %v1457_v13  ;;  %v1462_v60 = vor.u32 %v1461_v32, %v1457_v13 }
 0x218   : > { %1974 = vrot.lane.b32.xlu1 %v1917_v49, %s6768_s13  ;;  %1764 = vrot.lane.b32.xlu0 %v1658_v4, %s6769_s18  ;;  %v1463_v49 = vrot.slane %v1462_v60, 4 }
 0x21a   : > { %v1468_v44 = vsel %vm7314_vm13, %v1463_v49, %v7301_v56 }
 0x21c   : > { %1766 = vrot.lane.b32.xlu1 %v1668_v21, %s6769_s18  ;;  %1976 = vrot.lane.b32.xlu0 %v1920_v47, %s6768_s13 }
 0x220   : > { %1770 = vrot.lane.b32.xlu1 %v1688_v40, %s6769_s18  ;;  %1772 = vrot.lane.b32.xlu0 %v1698_v48, %s6769_s18 }
 0x224   : > { %1978 = vrot.lane.b32.xlu1 %v1923_v9, %s6768_s13  ;;  %1778 = vrot.lane.b32.xlu0 %v1723_v14, %s6769_s18 }
 0x228   : > { %1774 = vrot.lane.b32.xlu1 %v1708_v36, %s6769_s18  ;;  %1980 = vrot.lane.b32.xlu0 %v1926_v31, %s6768_s13 }
 0x22c   : > { %1776 = vrot.lane.b32.xlu1 %v1718_v33, %s6769_s18  ;;  %1724 = vrot.lane.b32.xlu0 %v1458_v54, %s6769_s18 }
 0x22f   : > { %v1933_v34 = vpop.permute.xlu0 %1932 }
 0x230   : > { %1982 = vrot.lane.b32.xlu1 %v1927_v59, %s6768_s13  ;;  %1928 = vrot.lane.b32.xlu0 %v1848_v28, %s6768_s13 }
 0x233   : > { %v1729_v7 = vpop.permute.xlu0 %1728 }
 0x234   : > { %1726 = vrot.lane.b32.xlu1 %v1468_v44, %s6769_s18  ;;  %1811 = vst.msk [vmem:[#allocation2 + $0x8] sm:$0xf] %vm1808_vm0, %v1729_v7  ;;  %v1839_v7 = vld [vmem:[#allocation2 + $0x6c] sm:$0x7] }
 0x235   : > { %2015 = vst.msk [vmem:[#allocation2 + $0x8] sm:$0xf] %vm2012_vm1, %v1933_v34  ;;  %v1935_v4 = vpop.permute.xlu1 %1934 }
 0x238   : > { %1930 = vrot.lane.b32.xlu1 %v1851_v2, %s6768_s13  ;;  %v1941_v46 = vpop.permute.xlu0 %1940 }
 0x239   : > { %v1731_v25 = vpop.permute.xlu1 %1730 }
 0x23a   : > { %1812 = vst.msk [vmem:[#allocation2 + $0xc] sm:$0xf] %vm1808_vm0, %v1731_v25 }
 0x23b   : > { %2016 = vst.msk [vmem:[#allocation2 + $0xc] sm:$0xf] %vm2012_vm1, %v1935_v4 }
 0x23c   : > { %v1937_v56 = vpop.permute.xlu0 %1936 }
 0x23d   : > { %v1939_v6 = vpop.permute.xlu1 %1938 }
 0x241   : > { %v1943_v19 = vpop.permute.xlu1 %1942 }
 0x242   : > { %v1737_v38 = vpop.permute.xlu0 %1736  ;;  %v7777_v47 = vld [vmem:[#allocation2 + $0x8] sm:$0xff]  }
 0x243   : > { %1815 = vst.msk [vmem:[#allocation2 + $0x18] sm:$0xf] %vm1808_vm0, %v1737_v38  ;;  %6246 = vmatprep.mubr.msk.bf16.mxu1 %vm2203_vm2, %v7777_v47 }
 0x244   : > { %2019 = vst.msk [vmem:[#allocation2 + $0x18] sm:$0xf] %vm2012_vm1, %v1941_v46 }
 0x246   : > { %v1733_v26 = vpop.permute.xlu0 %1732 }
 0x247   : > { %1813 = vst.msk [vmem:[#allocation2 + $0x10] sm:$0xf] %vm1808_vm0, %v1733_v26 }
 0x248   : > { %2017 = vst.msk [vmem:[#allocation2 + $0x10] sm:$0xf] %vm2012_vm1, %v1937_v56 }
 0x24a   : > { %v1735_v61 = vpop.permute.xlu1 %1734  ;;  %v1949_v18 = vpop.permute.xlu0 %1948 }
 0x24b   : > { %1814 = vst.msk [vmem:[#allocation2 + $0x14] sm:$0xf] %vm1808_vm0, %v1735_v61 }
 0x24c   : > { %2018 = vst.msk [vmem:[#allocation2 + $0x14] sm:$0xf] %vm2012_vm1, %v1939_v6 }
 0x24e   : > { %v1739_v23 = vpop.permute.xlu1 %1738  ;;  %v1945_v20 = vpop.permute.xlu0 %1944 }
 0x24f   : > { %1816 = vst.msk [vmem:[#allocation2 + $0x1c] sm:$0xf] %vm1808_vm0, %v1739_v23 }
 0x250   : > { %2020 = vst.msk [vmem:[#allocation2 + $0x1c] sm:$0xf] %vm2012_vm1, %v1943_v19 }
 0x252   : > { %v1947_v41 = vpop.permute.xlu1 %1946 }
 0x253   : > { %v7792_v21 = vld [vmem:[#allocation2 + $0x10] sm:$0xff]  }
 0x254   : > { %6247 = vmatmul.mubr.msk.bf16.vlgmr.msra.gmra.mxu1 %vm2203_vm2, %v7792_v21 }
 0x255   : > { %v1745_v35 = vpop.permute.xlu0 %1744  ;;  %6315 = vmatpush3.bf16.msra.mxu1 %v7638_v42  ;;  %v6511_v42 = vld [vmem:[%s9029_s2 + $0x70] sm:$0xff]  }
 0x256   : > { %1819 = vst.msk [vmem:[#allocation2 + $0x28] sm:$0xf] %vm1808_vm0, %v1745_v35  ;;  %6316 = vmatprep.subr.bf16.mxu1 %v6504_v11  ;;  %v1951_v50 = vpop.permute.xlu1 %1950  ;;  %v6520_v35 = vld [vmem:[#allocation2 + $0x10] sm:$0xff]  }
 0x257   : > { %2023 = vst.msk [vmem:[#allocation2 + $0x28] sm:$0xf] %vm2012_vm1, %v1949_v18  ;;  %v7802_v51 = vld [vmem:[#allocation2 + $0x18] sm:$0xff]  }
 0x258   : > { %6250 = vmatprep.mubr.msk.bf16.mxu1 %vm2203_vm2, %v7802_v51 }
 0x259   : > { %6317 = vmatpush3.bf16.msra.mxu1 %v6504_v11 }
 0x25a   : > { %v1741_v22 = vpop.permute.xlu0 %1740  ;;  %6318 = vmatprep.subr.bf16.mxu1 %v6508_v43 }
 0x25b   : > { %1817 = vst.msk [vmem:[#allocation2 + $0x20] sm:$0xf] %vm1808_vm0, %v1741_v22 }
 0x25c   : > { %2021 = vst.msk [vmem:[#allocation2 + $0x20] sm:$0xf] %vm2012_vm1, %v1945_v20  ;;  %v6518_v20 = vld [vmem:[#allocation2 + $0x70] sm:$0xff]  }
 0x25d   : > { %6319 = vmatpush3.bf16.msra.mxu1 %v6508_v43 }
 0x25e   : > { %v1743_v40 = vpop.permute.xlu1 %1742  ;;  %v1957_v48 = vpop.permute.xlu0 %1956  ;;  %6320 = vmatprep.subr.bf16.mxu1 %v6511_v42 }
 0x25f   : > { %1818 = vst.msk [vmem:[#allocation2 + $0x24] sm:$0xf] %vm1808_vm0, %v1743_v40 }
 0x260   : > { %2022 = vst.msk [vmem:[#allocation2 + $0x24] sm:$0xf] %vm2012_vm1, %v1947_v41 }
 0x261   : > { %6321 = vmatpush3.bf16.msra.mxu1 %v6511_v42 }
 0x262   : > { %v1747_v55 = vpop.permute.xlu1 %1746  ;;  %v1953_v58 = vpop.permute.xlu0 %1952  ;;  %6322 = vmatprep.subr.bf16.mxu1 %v6514_v52 }
 0x263   : > { %1820 = vst.msk [vmem:[#allocation2 + $0x2c] sm:$0xf] %vm1808_vm0, %v1747_v55 }
 0x264   : > { %2024 = vst.msk [vmem:[#allocation2 + $0x2c] sm:$0xf] %vm2012_vm1, %v1951_v50  ;;  %v6522_v50 = vld [vmem:[#allocation2 + $0x18] sm:$0xff]  }
 0x265   : > { %6323 = vmatpush3.bf16.msra.mxu1 %v6514_v52 }
 0x266   : > { %v1955_v24 = vpop.permute.xlu1 %1954  ;;  %v1753_v29 = vpop.permute.xlu0 %1752  ;;  %6324 = vmatprep.subr.bf16.mxu1 %v6519_v12 }
 0x267   : > { %1823 = vst.msk [vmem:[#allocation2 + $0x38] sm:$0xf] %vm1808_vm0, %v1753_v29  ;;  %v7822_v1 = vld [vmem:[#allocation2 + $0x20] sm:$0xff]  }
 0x268   : > { %2027 = vst.msk [vmem:[#allocation2 + $0x38] sm:$0xf] %vm2012_vm1, %v1957_v48  ;;  %6251 = vmatmul.mubr.msk.bf16.gmra.mxu1 %vm2203_vm2, %v7822_v1  ;;  %v6523_v22 = vld [vmem:[#allocation2 + $0x20] sm:$0xff]  }
 0x269   : > { %6325 = vmatpush3.bf16.msra.mxu1 %v6519_v12 }
 0x26a   : > { %v1959_v9 = vpop.permute.xlu1 %1958  ;;  %v1749_v14 = vpop.permute.xlu0 %1748  ;;  %4255 = vmatprep.subr.bf16.mxu1 %v6767_v57 }
 0x26b   : > { %1821 = vst.msk [vmem:[#allocation2 + $0x30] sm:$0xf] %vm1808_vm0, %v1749_v14  ;;  %v7828_v45 = vld [vmem:[#allocation2 + $0x28] sm:$0xff]  }
 0x26c   : > { %2025 = vst.msk [vmem:[#allocation2 + $0x30] sm:$0xf] %vm2012_vm1, %v1953_v58  ;;  %6254 = vmatprep.mubr.msk.bf16.mxu1 %vm2203_vm2, %v7828_v45  ;;  %v6524_v42 = vld [vmem:[#allocation2 + $0x28] sm:$0xff]   ;;  %v6533_v58 = vld [vmem:[#allocation2 + $0x70] sm:$0xff]  }
 0x26e   : > { %v1751_v27 = vpop.permute.xlu1 %1750  ;;  %v1965_v63 = vpop.permute.xlu0 %1964 }
 0x26f   : > { %1822 = vst.msk [vmem:[#allocation2 + $0x34] sm:$0xf] %vm1808_vm0, %v1751_v27 }
 0x270   : > { %2026 = vst.msk [vmem:[#allocation2 + $0x34] sm:$0xf] %vm2012_vm1, %v1955_v24  ;;  %v6534_v24 = vld [vmem:[#allocation2 + $0x78] sm:$0xff]  }
 0x272   : > { %v1755_v16 = vpop.permute.xlu1 %1754  ;;  %v1961_v3 = vpop.permute.xlu0 %1960 }
 0x273   : > { %1824 = vst.msk [vmem:[#allocation2 + $0x3c] sm:$0xf] %vm1808_vm0, %v1755_v16 }
 0x274   : > { %2028 = vst.msk [vmem:[#allocation2 + $0x3c] sm:$0xf] %vm2012_vm1, %v1959_v9 }
 0x276   : > { %v1963_v53 = vpop.permute.xlu1 %1962  ;;  %v1761_v0 = vpop.permute.xlu0 %1760 }
 0x277   : > { %1827 = vst.msk [vmem:[#allocation2 + $0x48] sm:$0xf] %vm1808_vm0, %v1761_v0  ;;  %v7839_v5 = vld [vmem:[#allocation2 + $0x30] sm:$0xff]  }
 0x278   : > { %2031 = vst.msk [vmem:[#allocation2 + $0x48] sm:$0xf] %vm2012_vm1, %v1965_v63  ;;  %6255 = vmatmul.mubr.msk.bf16.gmra.mxu1 %vm2203_vm2, %v7839_v5  ;;  %v6525_v40 = vld [vmem:[#allocation2 + $0x30] sm:$0xff]  }
 0x27a   : > { %v1967_v31 = vpop.permute.xlu1 %1966  ;;  %v1757_v13 = vpop.permute.xlu0 %1756 }
 0x27b   : > { %1825 = vst.msk [vmem:[#allocation2 + $0x40] sm:$0xf] %vm1808_vm0, %v1757_v13  ;;  %v7845_v36 = vld [vmem:[#allocation2 + $0x38] sm:$0xff]  }
 0x27c   : > { %2029 = vst.msk [vmem:[#allocation2 + $0x40] sm:$0xf] %vm2012_vm1, %v1961_v3  ;;  %6258 = vmatprep.mubr.msk.bf16.mxu1 %vm2203_vm2, %v7845_v36 }
 0x27e   : > { %v1759_v8 = vpop.permute.xlu1 %1758  ;;  %v1973_v10 = vpop.permute.xlu0 %1972 }
 0x27f   : > { %1826 = vst.msk [vmem:[#allocation2 + $0x44] sm:$0xf] %vm1808_vm0, %v1759_v8 }
 0x280   : > { %2030 = vst.msk [vmem:[#allocation2 + $0x44] sm:$0xf] %vm2012_vm1, %v1963_v53 }
 0x282   : > { %v1763_v32 = vpop.permute.xlu1 %1762  ;;  %v1969_v33 = vpop.permute.xlu0 %1968 }
 0x283   : > { %1828 = vst.msk [vmem:[#allocation2 + $0x4c] sm:$0xf] %vm1808_vm0, %v1763_v32 }
 0x284   : > { %2032 = vst.msk [vmem:[#allocation2 + $0x4c] sm:$0xf] %vm2012_vm1, %v1967_v31 }
 0x286   : > { %v1971_v54 = vpop.permute.xlu1 %1970  ;;  %v1769_v62 = vpop.permute.xlu0 %1768 }
 0x287   : > { %1831 = vst.msk [vmem:[#allocation2 + $0x58] sm:$0xf] %vm1808_vm0, %v1769_v62  ;;  %v7855_v60 = vld [vmem:[#allocation2 + $0x40] sm:$0xff]  }
 0x288   : > { %2035 = vst.msk [vmem:[#allocation2 + $0x58] sm:$0xf] %vm2012_vm1, %v1973_v10  ;;  %6259 = vmatmul.mubr.msk.bf16.gmra.mxu1 %vm2203_vm2, %v7855_v60  ;;  %v6527_v48 = vld [vmem:[#allocation2 + $0x40] sm:$0xff]  }
 0x28a   : > { %v1975_v30 = vpop.permute.xlu1 %1974  ;;  %v1765_v37 = vpop.permute.xlu0 %1764 }
 0x28b   : > { %1829 = vst.msk [vmem:[#allocation2 + $0x50] sm:$0xf] %vm1808_vm0, %v1765_v37  ;;  %v7861_v59 = vld [vmem:[#allocation2 + $0x48] sm:$0xff]  }
 0x28c   : > { %2033 = vst.msk [vmem:[#allocation2 + $0x50] sm:$0xf] %vm2012_vm1, %v1969_v33  ;;  %6262 = vmatprep.mubr.msk.bf16.mxu1 %vm2203_vm2, %v7861_v59 }
 0x28e   : > { %v1767_v28 = vpop.permute.xlu1 %1766  ;;  %v1977_v49 = vpop.permute.xlu0 %1976 }
 0x28f   : > { %1830 = vst.msk [vmem:[#allocation2 + $0x54] sm:$0xf] %vm1808_vm0, %v1767_v28 }
 0x290   : > { %2034 = vst.msk [vmem:[#allocation2 + $0x54] sm:$0xf] %vm2012_vm1, %v1971_v54 }
 0x292   : > { %v1771_v34 = vpop.permute.xlu1 %1770  ;;  %v1773_v44 = vpop.permute.xlu0 %1772 }
 0x293   : > { %1832 = vst.msk [vmem:[#allocation2 + $0x5c] sm:$0xf] %vm1808_vm0, %v1771_v34  ;;  %1833 = vst.msk [vmem:[#allocation2 + $0x60] sm:$0xf] %vm1808_vm0, %v1773_v44 }
 0x294   : > { %2036 = vst.msk [vmem:[#allocation2 + $0x5c] sm:$0xf] %vm2012_vm1, %v1975_v30  ;;  %2037 = vst.msk [vmem:[#allocation2 + $0x60] sm:$0xf] %vm2012_vm1, %v1977_v49  ;;  %v6536_v49 = vld [vmem:[%s9030_s3 + $0x90] sm:$0xff]  }
 0x296   : > { %v1979_v39 = vpop.permute.xlu1 %1978  ;;  %v1779_v4 = vpop.permute.xlu0 %1778 }
 0x297   : > { %v1840_v2 = vsel %vm1838_vm5, %v1779_v4, %v1839_v7  ;;  %v6510_v46 = vld [vmem:[#allocation2 + $0x50] sm:$0xff]  }
 0x298   : > { %1841 = vst [vmem:[#allocation2 + $0x6c] sm:$0x7] %v1840_v2  ;;  %6263 = vmatmul.mubr.msk.bf16.gmra.mxu1 %vm2203_vm2, %v6510_v46 }
 0x29a   : > { %v1775_v25 = vpop.permute.xlu1 %1774  ;;  %v1981_v56 = vpop.permute.xlu0 %1980 }
 0x29b   : > { %1834 = vst.msk [vmem:[#allocation2 + $0x64] sm:$0xf] %vm1808_vm0, %v1775_v25  ;;  %v6512_v6 = vld [vmem:[#allocation2 + $0x58] sm:$0xff]  }
 0x29c   : > { %2038 = vst.msk [vmem:[#allocation2 + $0x64] sm:$0xf] %vm2012_vm1, %v1979_v39  ;;  %6266 = vmatprep.mubr.msk.bf16.mxu1 %vm2203_vm2, %v6512_v6  ;;  %v6530_v52 = vld [vmem:[#allocation2 + $0x58] sm:$0xff]   ;;  %v6537_v39 = vld [vmem:[%s9030_s3 + $0x88] sm:$0xff]  }
 0x29e   : > { %v1777_v38 = vpop.permute.xlu1 %1776  ;;  %v1725_v19 = vpop.permute.xlu0 %1724 }
 0x29f   : > { %1835 = vst.msk [vmem:[#allocation2 + $0x68] sm:$0xf] %vm1808_vm0, %v1777_v38  ;;  %1809 = vst.msk [vmem:[#allocation2] sm:$0xf] %vm1808_vm0, %v1725_v19 }
 0x2a0   : > { %2039 = vst.msk [vmem:[#allocation2 + $0x68] sm:$0xf] %vm2012_vm1, %v1981_v56 }
 0x2a2   : > { %v1983_v26 = vpop.permute.xlu1 %1982  ;;  %v1929_v61 = vpop.permute.xlu0 %1928 }
 0x2a3   : > { %2041 = vst.msk [vmem:[#allocation2 + $0x6c] sm:$0x3] %vm2040_vm6, %v1983_v26  ;;  %v6515_v18 = vld [vmem:[#allocation2 + $0x60] sm:$0xff]  }
 0x2a4   : > { %2013 = vst.msk [vmem:[#allocation2] sm:$0xf] %vm2012_vm1, %v1929_v61  ;;  %6267 = vmatmul.mubr.msk.bf16.gmra.mxu1 %vm2203_vm2, %v6515_v18  ;;  %v6531_v55 = vld [vmem:[#allocation2 + $0x60] sm:$0xff]  }
 0x2a6   : > { %v1727_v23 = vpop.permute.xlu1 %1726 }
 0x2a7   : > { %1810 = vst.msk [vmem:[#allocation2 + $0x4] sm:$0xf] %vm1808_vm0, %v1727_v23  ;;  %vm2988_vm0 = vcmask 1043456  }
 0x2aa   : > { %v1931_v41 = vpop.permute.xlu1 %1930  ;;  %v6517_v11 = vld [vmem:[#allocation2 + $0x68] sm:$0xff]  }
 0x2ab   : > { %2014 = vst.msk [vmem:[#allocation2 + $0x4] sm:$0xf] %vm2012_vm1, %v1931_v41  ;;  %6270 = vmatprep.mubr.msk.bf16.mxu1 %vm2203_vm2, %v6517_v11  ;;  %v6532_v12 = vld [vmem:[#allocation2 + $0x68] sm:$0xff]   ;;  %vm2989_vm1 = vcmask 523268  }
 0x2ac   : > { %6271 = vmatmul.mubr.msk.bf16.gmra.mxu1 %vm2203_vm2, %v6518_v20 }
 0x2ad   : > { %6326 = vmatprep.mubr.msk.bf16.mxu1 %vm2203_vm2, %v6520_v35 }
 0x2b2   : > { %v6521_v43 = vld [vmem:[#allocation2] sm:$0xff]  }
 0x2b3   : > { %6286 = vmatprep.mubr.msk.bf16.mxu0 %vm2203_vm2, %v6521_v43 }
 0x2b4   : > { %6287 = vmatmul.mubr.msk.bf16.vlgmr.msra.gmra.mxu0 %vm2203_vm2, %v7777_v47  ;;  %6327 = vmatmul.mubr.msk.bf16.vlgmr.msra.gmra.mxu1 %vm2203_vm2, %v6522_v50  ;;  %v6526_v47 = vld [vmem:[#allocation2 + $0x38] sm:$0xff]  }
 0x2b5   : > { %6290 = vmatprep.mubr.msk.bf16.mxu0 %vm2203_vm2, %v7792_v21  ;;  %6330 = vmatprep.mubr.msk.bf16.mxu1 %vm2203_vm2, %v6523_v22  ;;  %v6528_v21 = vld [vmem:[#allocation2 + $0x48] sm:$0xff]  }
 0x2bc   : > { %6291 = vmatmul.mubr.msk.bf16.gmra.mxu0 %vm2203_vm2, %v7802_v51  ;;  %6331 = vmatmul.mubr.msk.bf16.gmra.mxu1 %vm2203_vm2, %v6524_v42  ;;  %v6529_v51 = vld [vmem:[#allocation2 + $0x50] sm:$0xff]  }
 0x2bd   : > { %6294 = vmatprep.mubr.msk.bf16.mxu0 %vm2203_vm2, %v7822_v1  ;;  %6334 = vmatprep.mubr.msk.bf16.mxu1 %vm2203_vm2, %v6525_v40 }
 0x2c4   : > { %6295 = vmatmul.mubr.msk.bf16.gmra.mxu0 %vm2203_vm2, %v7828_v45  ;;  %6335 = vmatmul.mubr.msk.bf16.gmra.mxu1 %vm2203_vm2, %v6526_v47 }
 0x2c5   : > { %6298 = vmatprep.mubr.msk.bf16.mxu0 %vm2203_vm2, %v7839_v5  ;;  %6338 = vmatprep.mubr.msk.bf16.mxu1 %vm2203_vm2, %v6527_v48  ;;  %v6540_v48 = vld [vmem:[%s9030_s3 + $0x70] sm:$0xff]  }
 0x2cc   : > { %6299 = vmatmul.mubr.msk.bf16.gmra.mxu0 %vm2203_vm2, %v7845_v36  ;;  %6339 = vmatmul.mubr.msk.bf16.gmra.mxu1 %vm2203_vm2, %v6528_v21 }
 0x2cd   : > { %6302 = vmatprep.mubr.msk.bf16.mxu0 %vm2203_vm2, %v7855_v60  ;;  %6342 = vmatprep.mubr.msk.bf16.mxu1 %vm2203_vm2, %v6529_v51 }
 0x2d4   : > { %6303 = vmatmul.mubr.msk.bf16.gmra.mxu0 %vm2203_vm2, %v7861_v59  ;;  %6343 = vmatmul.mubr.msk.bf16.gmra.mxu1 %vm2203_vm2, %v6530_v52  ;;  %v6535_v59 = vld [vmem:[%s9030_s3 + $0x98] sm:$0xff]  }
 0x2d5   : > { %6306 = vmatprep.mubr.msk.bf16.mxu0 %vm2203_vm2, %v6510_v46  ;;  %6346 = vmatprep.mubr.msk.bf16.mxu1 %vm2203_vm2, %v6531_v55  ;;  %v6538_v46 = vld [vmem:[%s9030_s3 + $0x80] sm:$0xff]  }
 0x2d6   : > { %4011 = vmatpush1.bf16.msra.mxu0 %v6535_v59 }
 0x2d7   : > { %4012 = vmatprep.subr.bf16.mxu0 %v6767_v57 }
 0x2da   : > { %4013 = vmatpush1.bf16.msra.mxu0 %v6536_v49 }
 0x2db   : > { %4014 = vmatprep.subr.bf16.mxu0 %v6767_v57 }
 0x2dc   : > { %6307 = vmatmul.mubr.msk.bf16.gmra.mxu0 %vm2203_vm2, %v6512_v6  ;;  %6347 = vmatmul.mubr.msk.bf16.gmra.mxu1 %vm2203_vm2, %v6532_v12 }
 0x2dd   : > { %6310 = vmatprep.mubr.msk.bf16.mxu0 %vm2203_vm2, %v6515_v18  ;;  %6350 = vmatprep.mubr.msk.bf16.mxu1 %vm2203_vm2, %v6533_v58  ;;  %v6539_v18 = vld [vmem:[%s9030_s3 + $0x78] sm:$0xff]  }
 0x2de   : > { %4015 = vmatpush1.bf16.msra.mxu0 %v6537_v39 }
 0x2df   : > { %4016 = vmatprep.subr.bf16.mxu0 %v6767_v57 }
 0x2e2   : > { %4017 = vmatpush1.bf16.msra.mxu0 %v6538_v46 }
 0x2e3   : > { %4018 = vmatprep.subr.bf16.mxu0 %v6767_v57 }
 0x2e4   : > { %6311 = vmatmul.mubr.msk.bf16.gmra.mxu0 %vm2203_vm2, %v6517_v11  ;;  %6351 = vmatmul.mubr.msk.bf16.gmra.mxu1 %vm2203_vm2, %v6534_v24 }
 0x2e6   : > { %4019 = vmatpush1.bf16.msra.mxu0 %v6539_v18 }
 0x2e7   : > { %4020 = vmatprep.subr.bf16.mxu0 %v6767_v57 }
 0x2ea   : > { %4021 = vmatpush1.bf16.msra.mxu0 %v6540_v48 }
 0x2eb   : > { %4022 = vmatprep.subr.bf16.mxu0 %v6767_v57 }
 0x314   : > { %v6248_v29 = vpop.f32.mrf.mxu1 }
 0x316   : > { %v2280_v1 = vpop.f32.mrf.mxu1 }
 0x318   : > { %v6249_v9 = vpop.f32.mrf.mxu1 }
 0x31a   : > { %v2283_v14 = vpop.f32.mrf.mxu1 }
 0x328   : > { %v7922_v45 = vpop.f32.mrf.mxu1 }
 0x32a   : > { %v7924_v27 = vpop.f32.mrf.mxu1 }
 0x32c   : > { %v7926_v63 = vpop.f32.mrf.mxu1 }
 0x32e   : > { %v7928_v16 = vpop.f32.mrf.mxu1 }
 0x338   : > { %v7930_v3 = vpop.f32.mrf.mxu1 }
 0x33a   : > { %v7932_v53 = vpop.f32.mrf.mxu1 }
 0x33c   : > { %v7934_v0 = vpop.f32.mrf.mxu1 }
 0x33e   : > { %v7936_v5 = vpop.f32.mrf.mxu1 }
 0x348   : > { %v7938_v31 = vpop.f32.mrf.mxu1 }
 0x34a   : > { %v7940_v13 = vpop.f32.mrf.mxu1 }
 0x34c   : > { %v7943_v36 = vpop.f32.mrf.mxu1 }
 0x34e   : > { %v7945_v8 = vpop.f32.mrf.mxu1 }
 0x358   : > { %v7947_v10 = vpop.f32.mrf.mxu1 }
 0x35a   : > { %v7949_v32 = vpop.f32.mrf.mxu1 }
 0x35c   : > { %v7951_v33 = vpop.f32.mrf.mxu1 }
 0x35e   : > { %v7953_v54 = vpop.f32.mrf.mxu1 }
 0x364   : > { %v7955_v62 = vpop.f32.mrf.mxu1 }
 0x366   : > { %v7957_v60 = vpop.f32.mrf.mxu1 }
 0x368   : > { %v7959_v30 = vpop.f32.mrf.mxu1 }
 0x36a   : > { %v7961_v37 = vpop.f32.mrf.mxu1 }
 0x36c   : > { %v7966_v28 = vpop.f32.mrf.mxu1 }
 0x36e   : > { %v7972_v34 = vpop.f32.mrf.mxu1 }
 0x370   : > { %v7974_v44 = vpop.f32.mrf.mxu1 }
 0x372   : > { %v7980_v7 = vpop.f32.mrf.mxu1 }
 0x374   : > { %v6288_v4 = vpop.f32.mrf.mxu0  ;;  %v6328_v2 = vpop.f32.mrf.mxu1 }
 0x375   : > { %v2478_v25 = vadd.f32 %v6288_v4, %v6248_v29 }
 0x376   : > { %v2469_v56 = vpop.f32.mrf.mxu0  ;;  %v2803_v6 = vpop.f32.mrf.mxu1 }
 0x377   : > { %v2916_v38 = vadd.f32 %v6328_v2, %v2478_v25  ;;  %v2470_v19 = vadd.f32 %v2469_v56, %v2280_v1 }
 0x378   : > { %v6289_v26 = vpop.f32.mrf.mxu0  ;;  %v6329_v61 = vpop.f32.mrf.mxu1 }
 0x379   : > { %v2944_v23 = vmax.f32 %v2916_v38, 0.0  ;;  %v2914_v20 = vadd.f32 %v2803_v6, %v2470_v19  ;;  %v2481_v41 = vadd.f32 %v6289_v26, %v6249_v9 }
 0x37a   : > { %v2472_v11 = vpop.f32.mrf.mxu0  ;;  %v2806_v35 = vpop.f32.mrf.mxu1 }
 0x37b   : > { %v7990_v43 = vpack.c.bf16 %v2944_v23, %v2944_v23  ;;  %v2942_v50 = vmax.f32 %v2914_v20, 0.0  ;;  %v2917_v22 = vadd.f32 %v6329_v61, %v2481_v41  ;;  %v2473_v42 = vadd.f32 %v2472_v11, %v2283_v14 }
 0x37c   : > { %v6292_v40 = vpop.f32.mrf.mxu0  ;;  %v6332_v47 = vpop.f32.mrf.mxu1 }
 0x37d   : > { %v3527_v21 = vrot.slane %v7990_v43, 5  ;;  %v7996_v51 = vpack.c.bf16 %v2942_v50, %v2942_v50  ;;  %v2945_v52 = vmax.f32 %v2917_v22, 0.0  ;;  %3100 = vst.msk [vmem:[#allocation3 + $0x10] sm:$0xf] %vm3097_vm11, %v7990_v43  ;;  %v2915_v55 = vadd.f32 %v2806_v35, %v2473_v42 }
 0x37e   : > { %v2494_v58 = vadd.f32 %v6292_v40, %v7922_v45  ;;  %v2485_v12 = vpop.f32.mrf.mxu0  ;;  %v2819_v24 = vpop.f32.mrf.mxu1  ;;  %v3146_v29 = vshll.u32 %v7990_v43, 16  ;;  %v3150_v1 = vshrl.u32 %v7990_v43, 16  ;;  %v6541_v45 = vld [vmem:[%s9030_s3 + $0x68] sm:$0xff]  }
 0x37f   : > { %3098 = vst.msk [vmem:[#allocation3] sm:$0xf] %vm3097_vm11, %v7996_v51  ;;  %v8006_v9 = vpack.c.bf16 %v2945_v52, %v2945_v52  ;;  %v2943_v14 = vmax.f32 %v2915_v55, 0.0  ;;  %v2486_v49 = vadd.f32 %v2485_v12, %v7924_v27  ;;  %v3529_v2 = vrot.slane %v3527_v21, 4  ;;  %4023 = vmatpush1.bf16.msra.mxu0 %v6541_v45 }
 0x380   : > { %v2920_v59 = vadd.f32 %v6332_v47, %v2494_v58  ;;  %v6293_v39 = vpop.f32.mrf.mxu0  ;;  %v6333_v4 = vpop.f32.mrf.mxu1  ;;  %v5746_v26 = vrot.slane %v7996_v51, 9  ;;  %v8021_v23 = vrot.slane %v3146_v29, 5  ;;  %v3152_v35 = vrot.slane %v3150_v1, 4  ;;  %4024 = vmatprep.subr.bf16.mxu0 %v6767_v57 }
 0x381   : > { %v2497_v46 = vadd.f32 %v6293_v39, %v7926_v63  ;;  %v3530_v25 = vrot.slane %v8006_v9, 5  ;;  %3101 = vst.msk [vmem:[#allocation3 + $0x18] sm:$0xf] %vm3097_vm11, %v8006_v9  ;;  %v8017_v56 = vpack.c.bf16 %v2943_v14, %v2943_v14  ;;  %v2918_v6 = vadd.f32 %v2819_v24, %v2486_v49 }
 0x382   : > { %v2948_v27 = vmax.f32 %v2920_v59, 0.0  ;;  %v2488_v38 = vpop.f32.mrf.mxu0  ;;  %v2822_v19 = vpop.f32.mrf.mxu1  ;;  %v3156_v43 = vshll.u32 %v8006_v9, 16 }
 0x383   : > { %v2921_v61 = vadd.f32 %v6333_v4, %v2497_v46  ;;  %v2489_v18 = vadd.f32 %v2488_v38, %v7928_v16  ;;  %v3531_v63 = vsel %vm7295_vm12, %v3529_v2, %v3530_v25  ;;  %v3524_v20 = vrot.slane %v8017_v56, 5  ;;  %3099 = vst.msk [vmem:[#allocation3 + $0x8] sm:$0xf] %vm3097_vm11, %v8017_v56  ;;  %v6542_v16 = vld [vmem:[%s9030_s3 + $0x60] sm:$0xff]   ;;  %v6543_v2 = vld [vmem:[%s9030_s3 + $0xb8] sm:$0xff]  }
 0x384   : > { %v6296_v41 = vpop.f32.mrf.mxu0  ;;  %v6336_v11 = vpop.f32.mrf.mxu1  ;;  %3635 = vst.msk [vmem:[#allocation3 + $0x14] sm:$0xf] %vm3097_vm11, %v3531_v63  ;;  %v8033_v50 = vpack.c.bf16 %v2948_v27, %v2948_v27  ;;  %v2946_v22 = vmax.f32 %v2918_v6, 0.0  ;;  %v3532_v47 = vrot.slane %v3530_v25, 4  ;;  %v8050_v39 = vrot.slane %v3156_v43, 5  ;;  %4025 = vmatpush1.bf16.msra.mxu0 %v6542_v16 }
 0x385   : > { %v2949_v42 = vmax.f32 %v2921_v61, 0.0  ;;  %v2919_v40 = vadd.f32 %v2822_v19, %v2489_v18  ;;  %v3525_v48 = vsel %vm7295_vm12, %v5746_v26, %v3524_v20  ;;  %v3526_v52 = vrot.slane %v3524_v20, 4  ;;  %4034 = vmatprep.subr.bf16.mxu0 %v6767_v57 }
 0x386   : > { %v2510_v55 = vadd.f32 %v6296_v41, %v7930_v3  ;;  %v2835_v58 = vpop.f32.mrf.mxu1  ;;  %v2501_v12 = vpop.f32.mrf.mxu0  ;;  %3633 = vst.msk [vmem:[#allocation3 + $0x4] sm:$0xf] %vm3097_vm11, %v3525_v48  ;;  %v3539_v24 = vrot.slane %v8033_v50, 5  ;;  %3104 = vst.msk [vmem:[#allocation3 + $0x30] sm:$0xf] %vm3097_vm11, %v8033_v50  ;;  %v8043_v29 = vpack.c.bf16 %v2946_v22, %v2946_v22  ;;  %v3153_v3 = vor.u32 %v3152_v35, %v8021_v23  ;;  %v6544_v22 = vld [vmem:[%s9030_s3 + $0xb0] sm:$0xff]  }
 0x387   : > { %v8045_v1 = vpack.c.bf16 %v2949_v42, %v2949_v42  ;;  %v2947_v14 = vmax.f32 %v2919_v40, 0.0  ;;  %v3528_v59 = vsel %vm7295_vm12, %v3526_v52, %v3527_v21  ;;  %v2502_v19 = vadd.f32 %v2501_v12, %v7932_v53 }
 0x388   : > { %v2924_v49 = vadd.f32 %v6336_v11, %v2510_v55  ;;  %v6297_v4 = vpop.f32.mrf.mxu0  ;;  %v6337_v45 = vpop.f32.mrf.mxu1  ;;  %3634 = vst.msk [vmem:[#allocation3 + $0xc] sm:$0xf] %vm3097_vm11, %v3528_v59  ;;  %v3541_v46 = vrot.slane %v3539_v24, 4  ;;  %v3533_v25 = vrot.slane %v8043_v29, 5  ;;  %3102 = vst.msk [vmem:[#allocation3 + $0x20] sm:$0xf] %vm3097_vm11, %v8043_v29  ;;  %4035 = vmatpush2.bf16.msra.mxu0 %v6543_v2 }
 0x389   : > { %v3542_v21 = vrot.slane %v8045_v1, 5  ;;  %3105 = vst.msk [vmem:[#allocation3 + $0x38] sm:$0xf] %vm3097_vm11, %v8045_v1  ;;  %v8062_v27 = vpack.c.bf16 %v2947_v14, %v2947_v14  ;;  %v3154_v38 = vrot.slane %v3153_v3, 4  ;;  %v2513_v26 = vadd.f32 %v6297_v4, %v7934_v0  ;;  %4036 = vmatprep.subr.bf16.mxu0 %v6767_v57 }
 0x38a   : > { %v2952_v6 = vmax.f32 %v2924_v49, 0.0  ;;  %v2504_v61 = vpop.f32.mrf.mxu0  ;;  %v2838_v18 = vpop.f32.mrf.mxu1  ;;  %v3534_v63 = vsel %vm7295_vm12, %v3532_v47, %v3533_v25  ;;  %v3535_v20 = vrot.slane %v3533_v25, 4  ;;  %v2922_v35 = vadd.f32 %v2835_v58, %v2502_v19  ;;  %v6545_v25 = vld [vmem:[%s9030_s3 + $0xa8] sm:$0xff]  }
 0x38b   : > { %v3543_v41 = vsel %vm7295_vm12, %v3541_v46, %v3542_v21  ;;  %3103 = vst.msk [vmem:[#allocation3 + $0x28] sm:$0xf] %vm3097_vm11, %v8062_v27  ;;  %3636 = vst.msk [vmem:[#allocation3 + $0x1c] sm:$0xf] %vm3097_vm11, %v3534_v63  ;;  %v3536_v53 = vrot.slane %v8062_v27, 5  ;;  %v3159_v0 = vsel %vm7314_vm13, %v3154_v38, %v8050_v39  ;;  %v2925_v42 = vadd.f32 %v6337_v45, %v2513_v26 }
 0x38c   : > { %3639 = vst.msk [vmem:[#allocation3 + $0x34] sm:$0xf] %vm3097_vm11, %v3543_v41  ;;  %v8076_v11 = vpack.c.bf16 %v2952_v6, %v2952_v6  ;;  %v6300_v43 = vpop.f32.mrf.mxu0  ;;  %v6340_v16 = vpop.f32.mrf.mxu1  ;;  %3409 = vrot.lane.b32.xlu0 %v3159_v0, %s6768_s13  ;;  %v2505_v40 = vadd.f32 %v2504_v61, %v7936_v5  ;;  %v3160_v48 = vshrl.u32 %v8006_v9, 16  ;;  %v2950_v12 = vmax.f32 %v2922_v35, 0.0  ;;  %4037 = vmatpush2.bf16.msra.mxu0 %v6544_v22 }
 0x38d   : > { %v2526_v47 = vadd.f32 %v6300_v43, %v7938_v31  ;;  %v3537_v52 = vsel %vm7295_vm12, %v3535_v20, %v3536_v53  ;;  %v3538_v55 = vrot.slane %v3536_v53, 4  ;;  %v2953_v5 = vmax.f32 %v2925_v42, 0.0  ;;  %4038 = vmatprep.subr.bf16.mxu0 %v6767_v57 }
 0x38e   : > { %v3551_v58 = vrot.slane %v8076_v11, 5  ;;  %3108 = vst.msk [vmem:[#allocation3 + $0x50] sm:$0xf] %vm3097_vm11, %v8076_v11  ;;  %v2517_v14 = vpop.f32.mrf.mxu0  ;;  %3637 = vst.msk [vmem:[#allocation3 + $0x24] sm:$0xf] %vm3097_vm11, %v3537_v52  ;;  %v2923_v59 = vadd.f32 %v2838_v18, %v2505_v40  ;;  %v3162_v49 = vrot.slane %v3160_v48, 4  ;;  %v2851_v9 = vpop.f32.mrf.mxu1  ;;  %v8097_v45 = vpack.c.bf16 %v2950_v12, %v2950_v12 }
 0x38f   : > { %v2928_v31 = vadd.f32 %v6340_v16, %v2526_v47  ;;  %v3544_v3 = vrot.slane %v3542_v21, 4  ;;  %v3540_v4 = vsel %vm7295_vm12, %v3538_v55, %v3539_v24  ;;  %v3166_v2 = vshll.u32 %v8043_v29, 16  ;;  %v6546_v48 = vld [vmem:[%s9030_s3 + $0xa0] sm:$0xff]  }
 0x390   : > { %v6301_v46 = vpop.f32.mrf.mxu0  ;;  %3638 = vst.msk [vmem:[#allocation3 + $0x2c] sm:$0xf] %vm3097_vm11, %v3540_v4  ;;  %v8104_v6 = vpack.c.bf16 %v2953_v5, %v2953_v5  ;;  %v2951_v38 = vmax.f32 %v2923_v59, 0.0  ;;  %v3163_v21 = vor.u32 %v3162_v49, %v8050_v39  ;;  %v3545_v24 = vrot.slane %v8097_v45, 5  ;;  %3106 = vst.msk [vmem:[#allocation3 + $0x40] sm:$0xf] %vm3097_vm11, %v8097_v45  ;;  %v6341_v0 = vpop.f32.mrf.mxu1  ;;  %4039 = vmatpush2.bf16.msra.mxu0 %v6545_v25 }
 0x391   : > { %v2956_v19 = vmax.f32 %v2928_v31, 0.0  ;;  %v8111_v26 = vrot.slane %v3166_v2, 5  ;;  %v2518_v61 = vadd.f32 %v2517_v14, %v7940_v13  ;;  %v2529_v18 = vadd.f32 %v6301_v46, %v7943_v36  ;;  %4040 = vmatprep.subr.bf16.mxu0 %v6767_v57 }
 0x392   : > { %v2520_v63 = vpop.f32.mrf.mxu0  ;;  %v3553_v20 = vrot.slane %v3551_v58, 4  ;;  %v3554_v41 = vrot.slane %v8104_v6, 5  ;;  %3109 = vst.msk [vmem:[#allocation3 + $0x58] sm:$0xf] %vm3097_vm11, %v8104_v6  ;;  %v8120_v39 = vpack.c.bf16 %v2951_v38, %v2951_v38  ;;  %v3546_v35 = vsel %vm7295_vm12, %v3544_v3, %v3545_v24  ;;  %v2854_v46 = vpop.f32.mrf.mxu1  ;;  %v8540_v17 = vld [vmem:[#allocation3 + $0x14] ss:$8 sps:$4 sm:$0xff]  }
 0x393   : > { %v8122_v53 = vpack.c.bf16 %v2956_v19, %v2956_v19  ;;  %v3164_v13 = vrot.slane %v3163_v21, 4  ;;  %v2926_v43 = vadd.f32 %v2851_v9, %v2518_v61  ;;  %v2929_v36 = vadd.f32 %v6341_v0, %v2529_v18  ;;  %3640 = vst.msk [vmem:[#allocation3 + $0x3c] sm:$0xf] %vm3097_vm11, %v3546_v35  ;;  %5815 = vmatprep.mubr.msk.bf16.mxu0 %vm3961_vm15, %v8540_v17 }
 0x394   : > { %v3547_v16 = vrot.slane %v3545_v24, 4  ;;  %v3555_v22 = vsel %vm7295_vm12, %v3553_v20, %v3554_v41  ;;  %v3548_v42 = vrot.slane %v8120_v39, 5  ;;  %3107 = vst.msk [vmem:[#allocation3 + $0x48] sm:$0xf] %vm3097_vm11, %v8120_v39  ;;  %v6304_v47 = vpop.f32.mrf.mxu0  ;;  %v3127_v52 = vshrl.u32 %v7996_v51, 16  ;;  %4041 = vmatpush2.bf16.msra.mxu0 %v6546_v48 }
 0x395   : > { %v3266_v40 = vshll.u32 %v8122_v53, 16  ;;  %3112 = vst.msk [vmem:[#allocation3 + $0x70] sm:$0xf] %vm3097_vm11, %v8122_v53  ;;  %3643 = vst.msk [vmem:[#allocation3 + $0x54] sm:$0xf] %vm3097_vm11, %v3555_v22  ;;  %v3270_v55 = vshrl.u32 %v8122_v53, 16  ;;  %v3169_v12 = vsel %vm7314_vm13, %v3164_v13, %v8111_v26  ;;  %v2521_v21 = vadd.f32 %v2520_v63, %v7945_v8  ;;  %4737 = vmatprep.subr.bf16.mxu0 %v6767_v57 }
 0x396   : > { %v2954_v14 = vmax.f32 %v2926_v43, 0.0  ;;  %v3549_v5 = vsel %vm7295_vm12, %v3547_v16, %v3548_v42  ;;  %v3550_v59 = vrot.slane %v3548_v42, 4  ;;  %v3563_v31 = vrot.slane %v8122_v53, 5  ;;  %3411 = vrot.lane.b32.xlu1 %v3169_v12, %s6768_s13  ;;  %v2533_v24 = vpop.f32.mrf.mxu0 }
 0x397   : > { %v2957_v49 = vmax.f32 %v2929_v36, 0.0  ;;  %v3556_v9 = vrot.slane %v3554_v41, 4  ;;  %3641 = vst.msk [vmem:[#allocation3 + $0x44] sm:$0xf] %vm3097_vm11, %v3549_v5  ;;  %v8150_v3 = vrot.slane %v3266_v40, 5  ;;  %v3170_v2 = vshrl.u32 %v8043_v29, 16  ;;  %v6344_v36 = vpop.f32.mrf.mxu1 }
 0x398   : > { %v6005_v4 = vpack.c.bf16 %v2954_v14, %v2954_v14  ;;  %v3552_v25 = vsel %vm7295_vm12, %v3550_v59, %v3551_v58  ;;  %v3176_v19 = vshll.u32 %v8062_v27, 16  ;;  %v8164_v41 = vrot.slane %v3270_v55, 4  ;;  %v6305_v48 = vpop.f32.mrf.mxu0 }
 0x399   : > { %v8157_v38 = vpack.c.bf16 %v2957_v49, %v2957_v49  ;;  %3642 = vst.msk [vmem:[#allocation3 + $0x4c] sm:$0xf] %vm3097_vm11, %v3552_v25  ;;  %v3172_v20 = vrot.slane %v3170_v2, 4  ;;  %v3565_v58 = vrot.slane %v3563_v31, 4  ;;  %v2927_v8 = vadd.f32 %v2854_v46, %v2521_v21 }
 0x39a   : > { %v3246_v61 = vshll.u32 %v6005_v4, 16  ;;  %v3250_v29 = vshrl.u32 %v6005_v4, 16  ;;  %v3557_v18 = vrot.slane %v6005_v4, 5  ;;  %3110 = vst.msk [vmem:[#allocation3 + $0x60] sm:$0xf] %vm3097_vm11, %v6005_v4  ;;  %v3178_v43 = vrot.slane %v3176_v19, 5  ;;  %v2867_v19 = vpop.f32.mrf.mxu1 }
 0x39b   : > { %v3566_v0 = vrot.slane %v8157_v38, 5  ;;  %3113 = vst.msk [vmem:[#allocation3 + $0x78] sm:$0xf] %vm3097_vm11, %v8157_v38  ;;  %v3280_v13 = vshrl.u32 %v8157_v38, 16  ;;  %v3173_v40 = vor.u32 %v3172_v20, %v8111_v26  ;;  %v2955_v55 = vmax.f32 %v2927_v8, 0.0 }
 0x39c   : > { %v8171_v63 = vrot.slane %v3246_v61, 5  ;;  %v3558_v35 = vsel %vm7295_vm12, %v3556_v9, %v3557_v18  ;;  %v8176_v16 = vrot.slane %v3250_v29, 4  ;;  %v3559_v22 = vrot.slane %v3557_v18, 4  ;;  %v2536_v61 = vpop.f32.mrf.mxu0 }
 0x39d   : > { %3644 = vst.msk [vmem:[#allocation3 + $0x5c] sm:$0xf] %vm3097_vm11, %v3558_v35  ;;  %v3567_v42 = vsel %vm7295_vm12, %v3565_v58, %v3566_v0  ;;  %v2542_v12 = vadd.f32 %v6304_v47, %v7947_v10  ;;  %v3186_v14 = vshll.u32 %v8033_v50, 16  ;;  %v3190_v5 = vshrl.u32 %v8033_v50, 16 }
 0x39e   : > { %3647 = vst.msk [vmem:[#allocation3 + $0x74] sm:$0xf] %vm3097_vm11, %v3567_v42  ;;  %v3174_v59 = vrot.slane %v3173_v40, 4  ;;  %v3196_v49 = vshll.u32 %v8045_v1, 16  ;;  %v3180_v9 = vshrl.u32 %v8062_v27, 16  ;;  %v2534_v4 = vadd.f32 %v2533_v24, %v7949_v32  ;;  %v6345_v42 = vpop.f32.mrf.mxu1 }
 0x39f   : > { %v8189_v2 = vpack.c.bf16 %v2955_v55, %v2955_v55  ;;  %v2932_v26 = vadd.f32 %v6344_v36, %v2542_v12  ;;  %v3188_v46 = vrot.slane %v3186_v14, 5  ;;  %v3192_v25 = vrot.slane %v3190_v5, 4 }
 0x3a0   : > { %v8191_v21 = vrot.slane %v3280_v13, 4  ;;  %v3179_v10 = vsel %vm7314_vm13, %v3174_v59, %v3178_v43  ;;  %v3182_v47 = vrot.slane %v3180_v9, 4  ;;  %v2930_v50 = vadd.f32 %v2867_v19, %v2534_v4  ;;  %v6308_v59 = vpop.f32.mrf.mxu0  ;;  %v2870_v19 = vpop.f32.mrf.mxu1 }
 0x3a1   : > { %3413 = vrot.lane.b32.xlu0 %v3179_v10, %s6768_s13  ;;  %v3560_v27 = vrot.slane %v8189_v2, 5  ;;  %3111 = vst.msk [vmem:[#allocation3 + $0x68] sm:$0xf] %vm3097_vm11, %v8189_v2  ;;  %v2960_v32 = vmax.f32 %v2932_v26, 0.0  ;;  %v3193_v24 = vor.u32 %v3192_v25, %v3188_v46  ;;  %v8199_v29 = vrot.slane %v3196_v49, 5 }
 0x3a2   : > { %v3260_v18 = vshrl.u32 %v8189_v2, 16  ;;  %v3183_v20 = vor.u32 %v3182_v47, %v3178_v43  ;;  %v2958_v58 = vmax.f32 %v2930_v50, 0.0  ;;  %v2545_v8 = vadd.f32 %v6305_v48, %v7951_v33 }
 0x3a3   : > { %v3561_v35 = vsel %vm7295_vm12, %v3559_v22, %v3560_v27  ;;  %v3562_v13 = vrot.slane %v3560_v27, 4  ;;  %v8205_v36 = vpack.c.bf16 %v2960_v32, %v2960_v32  ;;  %v3206_v40 = vshll.u32 %v8097_v45, 16  ;;  %v2549_v27 = vpop.f32.mrf.mxu0 }
 0x3a4   : > { %3645 = vst.msk [vmem:[#allocation3 + $0x64] sm:$0xf] %vm3097_vm11, %v3561_v35  ;;  %v3194_v55 = vrot.slane %v3193_v24, 4  ;;  %v3184_v12 = vrot.slane %v3183_v20, 4  ;;  %v6009_v14 = vpack.c.bf16 %v2958_v58, %v2958_v58  ;;  %v2933_v5 = vadd.f32 %v6345_v42, %v2545_v8 }
 0x3a5   : > { %v3564_v33 = vsel %vm7295_vm12, %v3562_v13, %v3563_v31  ;;  %v3306_v43 = vshll.u32 %v8205_v36, 16  ;;  %v3310_v22 = vshrl.u32 %v8205_v36, 16  ;;  %v3575_v48 = vrot.slane %v8205_v36, 5  ;;  %3116 = vst.msk [vmem:[#allocation3 + $0x90] sm:$0xf] %vm3097_vm11, %v8205_v36 }
 0x3a6   : > { %v3568_v49 = vrot.slane %v3566_v0, 4  ;;  %3646 = vst.msk [vmem:[#allocation3 + $0x6c] sm:$0xf] %vm3097_vm11, %v3564_v33  ;;  %v3199_v9 = vsel %vm7314_vm13, %v3194_v55, %v8199_v29  ;;  %v3189_v53 = vsel %vm7314_vm13, %v3184_v12, %v3188_v46  ;;  %v3286_v31 = vshll.u32 %v6009_v14, 16  ;;  %3114 = vst.msk [vmem:[#allocation3 + $0x80] sm:$0xf] %vm3097_vm11, %v6009_v14  ;;  %v6348_v12 = vpop.f32.mrf.mxu1 }
 0x3a7   : > { %v8225_v4 = vrot.slane %v3260_v18, 4  ;;  %v8227_v26 = vrot.slane %v3306_v43, 5  ;;  %3417 = vrot.lane.b32.xlu0 %v3199_v9, %s6768_s13  ;;  %3415 = vrot.lane.b32.xlu1 %v3189_v53, %s6768_s13  ;;  %v3290_v0 = vshrl.u32 %v6009_v14, 16  ;;  %v3569_v25 = vrot.slane %v6009_v14, 5  ;;  %v6309_v43 = vpop.f32.mrf.mxu0 }
 0x3a8   : > { %v8231_v10 = vrot.slane %v3310_v22, 4  ;;  %v3577_v47 = vrot.slane %v3575_v48, 4  ;;  %v8235_v46 = vrot.slane %v3286_v31, 5  ;;  %v2961_v50 = vmax.f32 %v2933_v5, 0.0 }
 0x3a9   : > { %v3570_v32 = vsel %vm7295_vm12, %v3568_v49, %v3569_v25  ;;  %v3208_v24 = vrot.slane %v3206_v40, 5  ;;  %v3210_v18 = vshrl.u32 %v8097_v45, 16  ;;  %v3216_v20 = vshll.u32 %v8120_v39, 16 }
 0x3aa   : > { %3648 = vst.msk [vmem:[#allocation3 + $0x7c] sm:$0xf] %vm3097_vm11, %v3570_v32  ;;  %v8242_v58 = vpack.c.bf16 %v2961_v50, %v2961_v50  ;;  %v3200_v8 = vshrl.u32 %v8045_v1, 16  ;;  %v2537_v35 = vadd.f32 %v2536_v61, %v7953_v54  ;;  %v2558_v13 = vadd.f32 %v6308_v59, %v7955_v62  ;;  %v2883_v50 = vpop.f32.mrf.mxu1 }
 0x3ab   : > { %v8247_v42 = vrot.slane %v3290_v0, 4  ;;  %v3212_v55 = vrot.slane %v3210_v18, 4  ;;  %v3226_v40 = vshll.u32 %v8076_v11, 16  ;;  %v3230_v45 = vshrl.u32 %v8076_v11, 16 }
 0x3ac   : > { %v3578_v14 = vrot.slane %v8242_v58, 5  ;;  %3117 = vst.msk [vmem:[#allocation3 + $0x98] sm:$0xf] %vm3097_vm11, %v8242_v58  ;;  %v3218_v5 = vrot.slane %v3216_v20, 5  ;;  %v3202_v33 = vrot.slane %v3200_v8, 4  ;;  %v2931_v1 = vadd.f32 %v2870_v19, %v2537_v35  ;;  %v8265_v8 = vpop.f32.mrf.mxu0 }
 0x3ad   : > { %v3213_v54 = vor.u32 %v3212_v55, %v3208_v24  ;;  %v2936_v61 = vadd.f32 %v6348_v12, %v2558_v13  ;;  %v8254_v62 = vrot.slane %v3226_v40, 5  ;;  %v3232_v59 = vrot.slane %v3230_v45, 4 }
 0x3ae   : > { %v3571_v22 = vrot.slane %v3569_v25, 4  ;;  %v3320_v49 = vshrl.u32 %v8242_v58, 16  ;;  %v3579_v11 = vsel %vm7295_vm12, %v3577_v47, %v3578_v14  ;;  %v3203_v9 = vor.u32 %v3202_v33, %v8199_v29 }
 0x3af   : > { %3651 = vst.msk [vmem:[#allocation3 + $0x94] sm:$0xf] %vm3097_vm11, %v3579_v11  ;;  %v3214_v53 = vrot.slane %v3213_v54, 4  ;;  %v2959_v31 = vmax.f32 %v2931_v1, 0.0  ;;  %v2964_v0 = vmax.f32 %v2936_v61, 0.0  ;;  %v3233_v19 = vor.u32 %v3232_v59, %v8254_v62 }
 0x3b0   : > { %v3204_v32 = vrot.slane %v3203_v9, 4  ;;  %v3236_v18 = vshll.u32 %v8104_v6, 16  ;;  %v3220_v25 = vshrl.u32 %v8120_v39, 16  ;;  %v2550_v20 = vadd.f32 %v2549_v27, %v7957_v60 }
 0x3b1   : > { %v3219_v29 = vsel %vm7314_vm13, %v3214_v53, %v3218_v5  ;;  %v8269_v47 = vpack.c.bf16 %v2959_v31, %v2959_v31  ;;  %v8271_v35 = vpack.c.bf16 %v2964_v0, %v2964_v0  ;;  %v3234_v13 = vrot.slane %v3233_v19, 4  ;;  %v6553_v0 = vld [vmem:[%s9030_s3 + $0x38] sm:$0xff]  }
 0x3b2   : > { %3421 = vrot.lane.b32.xlu0 %v3219_v29, %s6768_s13  ;;  %v3209_v55 = vsel %vm7314_vm13, %v3204_v32, %v3208_v24  ;;  %v8276_v12 = vrot.slane %v3236_v18, 5  ;;  %v3222_v39 = vrot.slane %v3220_v25, 4  ;;  %v2934_v40 = vadd.f32 %v2883_v50, %v2550_v20  ;;  %v6349_v24 = vpop.f32.mrf.mxu1  ;;  %4256 = vmatpush1.bf16.msra.mxu1 %v6553_v0 }
 0x3b3   : > { %v8278_v60 = vrot.slane %v3320_v49, 4  ;;  %3419 = vrot.lane.b32.xlu1 %v3209_v55, %s6768_s13  ;;  %v3300_v27 = vshrl.u32 %v8269_v47, 16  ;;  %v3572_v45 = vrot.slane %v8269_v47, 5  ;;  %3115 = vst.msk [vmem:[#allocation3 + $0x88] sm:$0xf] %vm3097_vm11, %v8269_v47  ;;  %v3346_v33 = vshll.u32 %v8271_v35, 16  ;;  %v6312_v49 = vpop.f32.mrf.mxu0  ;;  %4257 = vmatprep.subr.bf16.mxu1 %v6767_v57 }
 0x3b4   : > { %3120 = vst.msk [vmem:[#allocation3 + $0xb0] sm:$0xf] %vm3097_vm11, %v8271_v35  ;;  %v3580_v1 = vrot.slane %v3578_v14, 4  ;;  %v3350_v54 = vshrl.u32 %v8271_v35, 16  ;;  %v3223_v61 = vor.u32 %v3222_v39, %v3218_v5  ;;  %v2962_v59 = vmax.f32 %v2934_v40, 0.0  ;;  %v2886_v20 = vpop.f32.mrf.mxu1  ;;  %v6557_v40 = vld [vmem:[%s9030_s3 + $0x30] sm:$0xff]  }
 0x3b5   : > { %v3573_v11 = vsel %vm7295_vm12, %v3571_v22, %v3572_v45  ;;  %v3574_v9 = vrot.slane %v3572_v45, 4  ;;  %v3587_v53 = vrot.slane %v8271_v35, 5  ;;  %v3239_v31 = vsel %vm7314_vm13, %v3234_v13, %v8276_v12 }
 0x3b6   : > { %v8298_v14 = vrot.slane %v3300_v27, 4  ;;  %3649 = vst.msk [vmem:[#allocation3 + $0x84] sm:$0xf] %vm3097_vm11, %v3573_v11  ;;  %v8301_v5 = vrot.slane %v3346_v33, 5  ;;  %3425 = vrot.lane.b32.xlu0 %v3239_v31, %s6768_s13  ;;  %v3224_v22 = vrot.slane %v3223_v61, 4  ;;  %v6013_v19 = vpack.c.bf16 %v2962_v59, %v2962_v59  ;;  %v6352_v39 = vpop.f32.mrf.mxu1  ;;  %4258 = vmatpush1.bf16.msra.mxu1 %v6557_v40 }
 0x3b7   : > { %v3576_v50 = vsel %vm7295_vm12, %v3574_v9, %v3575_v48  ;;  %v2561_v32 = vadd.f32 %v6309_v43, %v7959_v30  ;;  %v3253_v18 = vor.u32 %v8176_v16, %v8171_v63  ;;  %v3256_v25 = vshll.u32 %v8189_v2, 16  ;;  %v2565_v30 = vpop.f32.mrf.mxu0  ;;  %4259 = vmatprep.subr.bf16.mxu1 %v6767_v57 }
 0x3b8   : > { %3650 = vst.msk [vmem:[#allocation3 + $0x8c] sm:$0xf] %vm3097_vm11, %v3576_v50  ;;  %v8313_v29 = vrot.slane %v3350_v54, 4  ;;  %v3229_v36 = vsel %vm7314_vm13, %v3224_v22, %v8254_v62  ;;  %v3326_v13 = vshll.u32 %v6013_v19, 16  ;;  %v3581_v55 = vrot.slane %v6013_v19, 5 }
 0x3b9   : > { %3118 = vst.msk [vmem:[#allocation3 + $0xa0] sm:$0xf] %vm3097_vm11, %v6013_v19  ;;  %3423 = vrot.lane.b32.xlu1 %v3229_v36, %s6768_s13  ;;  %v2937_v16 = vadd.f32 %v6349_v24, %v2561_v32  ;;  %v3254_v2 = vrot.slane %v3253_v18, 4  ;;  %v3258_v48 = vrot.slane %v3256_v25, 5  ;;  %v3240_v43 = vshrl.u32 %v8104_v6, 16  ;;  %v6313_v31 = vpop.f32.mrf.mxu0 }
 0x3ba   : > { %v3589_v62 = vrot.slane %v3587_v53, 4  ;;  %v8327_v27 = vrot.slane %v3326_v13, 5  ;;  %v3330_v45 = vshrl.u32 %v6013_v19, 16  ;;  %v3582_v33 = vsel %vm7295_vm12, %v3580_v1, %v3581_v55  ;;  %v2899_v19 = vpop.f32.mrf.mxu1 }
 0x3bb   : > { %3652 = vst.msk [vmem:[#allocation3 + $0x9c] sm:$0xf] %vm3097_vm11, %v3582_v33  ;;  %v2965_v24 = vmax.f32 %v2937_v16, 0.0  ;;  %v3259_v6 = vsel %vm7314_vm13, %v3254_v2, %v3258_v48  ;;  %v3242_v54 = vrot.slane %v3240_v43, 4  ;;  %v2553_v61 = vadd.f32 %v8265_v8, %v7961_v37  ;;  %v2568_v13 = vpop.f32.mrf.mxu0  ;;  %v6561_v33 = vld [vmem:[%s9030_s3 + $0x20] sm:$0xff]  }
 0x3bc   : > { %3429 = vrot.lane.b32.xlu0 %v3259_v6, %s6768_s13  ;;  %v2574_v59 = vadd.f32 %v6312_v49, %v7966_v28  ;;  %v3273_v11 = vor.u32 %v8164_v41, %v8150_v3  ;;  %v3276_v1 = vshll.u32 %v8157_v38, 16  ;;  %v3263_v9 = vor.u32 %v8225_v4, %v3258_v48  ;;  %v6560_v28 = vld [vmem:[%s9030_s3 + $0x28] sm:$0xff]   ;;  %v6353_v43 = vpop.f32.mrf.mxu1 }
 0x3bd   : > { %v8343_v0 = vpack.c.bf16 %v2965_v24, %v2965_v24  ;;  %v3243_v22 = vor.u32 %v3242_v54, %v8276_v12  ;;  %v2935_v37 = vadd.f32 %v2886_v20, %v2553_v61  ;;  %v2566_v8 = vadd.f32 %v2565_v30, %v7972_v34  ;;  %4260 = vmatpush1.bf16.msra.mxu1 %v6560_v28 }
 0x3be   : > { %v3274_v41 = vrot.slane %v3273_v11, 4  ;;  %v3278_v49 = vrot.slane %v3276_v1, 5  ;;  %v3264_v38 = vrot.slane %v3263_v9, 4  ;;  %v2940_v50 = vadd.f32 %v6352_v39, %v2574_v59  ;;  %4261 = vmatprep.subr.bf16.mxu1 %v6767_v57  ;;  %v2902_v59 = vpop.f32.mrf.mxu1 }
 0x3bf   : > { %v3360_v4 = vshrl.u32 %v8343_v0, 16  ;;  %v3590_v32 = vrot.slane %v8343_v0, 5  ;;  %3121 = vst.msk [vmem:[#allocation3 + $0xb8] sm:$0xf] %vm3097_vm11, %v8343_v0  ;;  %v3244_v12 = vrot.slane %v3243_v22, 4  ;;  %v2963_v18 = vmax.f32 %v2935_v37, 0.0 }
 0x3c0   : > { %v8354_v34 = vrot.slane %v3330_v45, 4  ;;  %v3279_v25 = vsel %vm7314_vm13, %v3274_v41, %v3278_v49  ;;  %v2968_v20 = vmax.f32 %v2940_v50, 0.0  ;;  %v2577_v36 = vadd.f32 %v6313_v31, %v7974_v44  ;;  %v6565_v50 = vld [vmem:[%s9030_s3 + $0x18] sm:$0xff]  }
 0x3c1   : > { %v3583_v30 = vrot.slane %v3581_v55, 4  ;;  %v3591_v16 = vsel %vm7295_vm12, %v3589_v62, %v3590_v32  ;;  %v3249_v2 = vsel %vm7314_vm13, %v3244_v12, %v8171_v63  ;;  %3433 = vrot.lane.b32.xlu0 %v3279_v25, %s6768_s13  ;;  %v3269_v48 = vsel %vm7314_vm13, %v3264_v38, %v8150_v3  ;;  %4262 = vmatpush1.bf16.msra.mxu1 %v6561_v33 }
 0x3c2   : > { %3655 = vst.msk [vmem:[#allocation3 + $0xb4] sm:$0xf] %vm3097_vm11, %v3591_v16  ;;  %3427 = vrot.lane.b32.xlu1 %v3249_v2, %s6768_s13  ;;  %v8371_v44 = vpack.c.bf16 %v2963_v18, %v2963_v18  ;;  %v8373_v55 = vpack.c.bf16 %v2968_v20, %v2968_v20  ;;  %v2938_v39 = vadd.f32 %v2899_v19, %v2566_v8  ;;  %v8377_v63 = vrot.slane %v3360_v4, 4  ;;  %v6566_v2 = vld [vmem:[%s9030_s3 + $0x10] sm:$0xff]  }
 0x3c3   : > { %v3293_v40 = vor.u32 %v8247_v42, %v8235_v46  ;;  %v3296_v62 = vshll.u32 %v8269_v47, 16  ;;  %v3283_v45 = vor.u32 %v8191_v21, %v3278_v49  ;;  %v2569_v3 = vadd.f32 %v2568_v13, %v7980_v7  ;;  %4263 = vmatprep.subr.bf16.mxu1 %v6767_v57 }
 0x3c4   : > { %v3340_v24 = vshrl.u32 %v8371_v44, 16  ;;  %v3584_v6 = vrot.slane %v8371_v44, 5  ;;  %3119 = vst.msk [vmem:[#allocation3 + $0xa8] sm:$0xf] %vm3097_vm11, %v8371_v44  ;;  %v3599_v42 = vrot.slane %v8373_v55, 5  ;;  %v2941_v47 = vadd.f32 %v6353_v43, %v2577_v36 }
 0x3c5   : > { %3124 = vst.msk [vmem:[#allocation3 + $0xd0] sm:$0xf] %vm3097_vm11, %v8373_v55  ;;  %v2966_v21 = vmax.f32 %v2938_v39, 0.0  ;;  %v3294_v54 = vrot.slane %v3293_v40, 4  ;;  %v3298_v7 = vrot.slane %v3296_v62, 5  ;;  %v3284_v61 = vrot.slane %v3283_v45, 4  ;;  %4264 = vmatpush1.bf16.msra.mxu1 %v6565_v50 }
 0x3c6   : > { %v3592_v11 = vrot.slane %v3590_v32, 4  ;;  %v8392_v1 = vrot.slane %v3340_v24, 4  ;;  %v3585_v9 = vsel %vm7295_vm12, %v3583_v30, %v3584_v6  ;;  %v3586_v31 = vrot.slane %v3584_v6, 4  ;;  %3431 = vrot.lane.b32.xlu1 %v3269_v48, %s6768_s13  ;;  %4265 = vmatprep.subr.bf16.mxu1 %v6767_v57 }
 0x3c7   : > { %3653 = vst.msk [vmem:[#allocation3 + $0xa4] sm:$0xf] %vm3097_vm11, %v3585_v9  ;;  %v3601_v22 = vrot.slane %v3599_v42, 4  ;;  %v6017_v37 = vpack.c.bf16 %v2966_v21, %v2966_v21  ;;  %v3299_v8 = vsel %vm7314_vm13, %v3294_v54, %v3298_v7  ;;  %v3289_v19 = vsel %vm7314_vm13, %v3284_v61, %v8235_v46 }
 0x3c8   : > { %v3588_v28 = vsel %vm7295_vm12, %v3586_v31, %v3587_v53  ;;  %3437 = vrot.lane.b32.xlu0 %v3299_v8, %s6768_s13  ;;  %v2969_v41 = vmax.f32 %v2941_v47, 0.0  ;;  %v2939_v49 = vadd.f32 %v2902_v59, %v2569_v3  ;;  %v3313_v38 = vor.u32 %v8231_v10, %v8227_v26 }
 0x3c9   : > { %3654 = vst.msk [vmem:[#allocation3 + $0xac] sm:$0xf] %vm3097_vm11, %v3588_v28  ;;  %v3366_v4 = vshll.u32 %v6017_v37, 16  ;;  %v3370_v46 = vshrl.u32 %v6017_v37, 16  ;;  %v3593_v32 = vrot.slane %v6017_v37, 5  ;;  %v3316_v35 = vshll.u32 %v8242_v58, 16  ;;  %4266 = vmatpush1.bf16.msra.mxu1 %v6566_v2 }
 0x3ca   : > { %3122 = vst.msk [vmem:[#allocation3 + $0xc0] sm:$0xf] %vm3097_vm11, %v6017_v37  ;;  %3435 = vrot.lane.b32.xlu1 %v3289_v19, %s6768_s13  ;;  %v8420_v53 = vpack.c.bf16 %v2969_v41, %v2969_v41  ;;  %v2967_v12 = vmax.f32 %v2939_v49, 0.0  ;;  %v3314_v18 = vrot.slane %v3313_v38, 4  ;;  %v3303_v10 = vor.u32 %v8298_v14, %v3298_v7  ;;  %4267 = vmatprep.subr.bf16.mxu1 %v6767_v57 }
 0x3cb   : > { %v8423_v25 = vrot.slane %v3366_v4, 5  ;;  %v3372_v20 = vrot.slane %v3370_v46, 4  ;;  %v3594_v36 = vsel %vm7295_vm12, %v3592_v11, %v3593_v32  ;;  %v3595_v13 = vrot.slane %v3593_v32, 4 }
 0x3cc   : > { %3656 = vst.msk [vmem:[#allocation3 + $0xbc] sm:$0xf] %vm3097_vm11, %v3594_v36  ;;  %3125 = vst.msk [vmem:[#allocation3 + $0xd8] sm:$0xf] %vm3097_vm11, %v8420_v53  ;;  %v3396_v58 = vshll.u32 %v8420_v53, 16  ;;  %v3400_v30 = vshrl.u32 %v8420_v53, 16  ;;  %v6018_v16 = vpack.c.bf16 %v2967_v12, %v2967_v12  ;;  %v3333_v39 = vor.u32 %v8354_v34, %v8327_v27 }
 0x3cd   : > { %v3602_v14 = vrot.slane %v8420_v53, 5  ;;  %v3318_v48 = vrot.slane %v3316_v35, 5  ;;  %v3304_v43 = vrot.slane %v3303_v10, 4  ;;  %v3336_v40 = vshll.u32 %v8371_v44, 16 }
 0x3ce   : > { %v3380_v3 = vshrl.u32 %v6018_v16, 16  ;;  %v3596_v33 = vrot.slane %v6018_v16, 5  ;;  %3123 = vst.msk [vmem:[#allocation3 + $0xc8] sm:$0xf] %vm3097_vm11, %v6018_v16  ;;  %v3334_v6 = vrot.slane %v3333_v39, 4  ;;  %v3353_v59 = vor.u32 %v8313_v29, %v8301_v5 }
 0x3cf   : > { %v3603_v62 = vsel %vm7295_vm12, %v3601_v22, %v3602_v14  ;;  %v3604_v45 = vrot.slane %v3602_v14, 4  ;;  %v3319_v24 = vsel %vm7314_vm13, %v3314_v18, %v3318_v48  ;;  %v3309_v34 = vsel %vm7314_vm13, %v3304_v43, %v8227_v26  ;;  %v6570_v26 = vld [vmem:[%s9030_s3 + $0x8] sm:$0xff]   ;;  %v6574_v18 = vld [vmem:[%s9030_s3 + $0x58] sm:$0xff]   ;;  %v6576_v14 = vld [vmem:[%s9030_s3 + $0x50] sm:$0xff]  }
 0x3d0   : > { %3659 = vst.msk [vmem:[#allocation3 + $0xd4] sm:$0xf] %vm3097_vm11, %v3603_v62  ;;  %v3338_v44 = vrot.slane %v3336_v40, 5  ;;  %v3382_v47 = vrot.slane %v3380_v3, 4  ;;  %v3597_v21 = vsel %vm7295_vm12, %v3595_v13, %v3596_v33  ;;  %v3598_v54 = vrot.slane %v3596_v33, 4  ;;  %3441 = vrot.lane.b32.xlu0 %v3319_v24, %s6768_s13  ;;  %3439 = vrot.lane.b32.xlu1 %v3309_v34, %s6768_s13  ;;  %v6580_v40 = vld [vmem:[%s9030_s3 + $0x40] sm:$0xff]  }
 0x3d1   : > { %3661 = vst.msk [vmem:[#allocation3 + $0xdc] sm:$0x7] %vm3660_vm14, %v3604_v45  ;;  %v3323_v7 = vor.u32 %v8278_v60, %v3318_v48  ;;  %v3356_v11 = vshll.u32 %v8343_v0, 16  ;;  %v3373_v22 = vor.u32 %v3372_v20, %v8423_v25  ;;  %v3376_v37 = vshll.u32 %v6018_v16, 16  ;;  %4268 = vmatpush1.bf16.msra.mxu1 %v6570_v26  ;;  %v6579_v48 = vld [vmem:[%s9030_s3 + $0x48] sm:$0xff]   ;;  %v6567_v26 = vld [vmem:[%s9030_s3 + $0xe0] sm:$0xff]  }
 0x3d2   : > { %3657 = vst.msk [vmem:[#allocation3 + $0xc4] sm:$0xf] %vm3097_vm11, %v3597_v21  ;;  %v3339_v61 = vsel %vm7314_vm13, %v3334_v6, %v3338_v44  ;;  %v3343_v9 = vor.u32 %v8392_v1, %v3338_v44  ;;  %v3600_v60 = vsel %vm7295_vm12, %v3598_v54, %v3599_v42  ;;  %v3130_v8 = vshll.u32 %v7996_v51, 16  ;;  %4269 = vmatprep.subr.bf16.mxu1 %v6767_v57  ;;  %v6571_v1 = vld [vmem:[%s9030_s3] sm:$0xff]   ;;  %v6550_v6 = vld [vmem:[%s9030_s3 + $0xf8] sm:$0xff]   ;;  %v6562_v21 = vld [vmem:[%s9030_s3 + $0xe8] sm:$0xff]  }
 0x3d3   : > { %v3324_v31 = vrot.slane %v3323_v7, 4  ;;  %3658 = vst.msk [vmem:[#allocation3 + $0xcc] sm:$0xf] %vm3097_vm11, %v3600_v60  ;;  %v3354_v19 = vrot.slane %v3353_v59, 4  ;;  %v3358_v29 = vrot.slane %v3356_v11, 5  ;;  %v3390_v0 = vshrl.u32 %v8373_v55, 16 }
 0x3d4   : > { %v3344_v28 = vrot.slane %v3343_v9, 4  ;;  %3445 = vrot.lane.b32.xlu0 %v3339_v61, %s6768_s13  ;;  %v3378_v42 = vrot.slane %v3376_v37, 5  ;;  %v3374_v41 = vrot.slane %v3373_v22, 4  ;;  %v3398_v49 = vrot.slane %v3396_v58, 5  ;;  %v6575_v61 = vld [vmem:[%s9030_s3 + $0xd8] sm:$0xff]   ;;  %v6581_v37 = vld [vmem:[%s9030_s3 + $0xd0] sm:$0xff]  }
 0x3d5   : > { %v3329_v15 = vsel %vm7314_vm13, %v3324_v31, %v8327_v27  ;;  %v3386_v38 = vshll.u32 %v8373_v55, 16  ;;  %v3363_v4 = vor.u32 %v8377_v63, %v3358_v29  ;;  %v3402_v46 = vrot.slane %v3400_v30, 4  ;;  %4270 = vmatpush1.bf16.msra.mxu1 %v6571_v1  ;;  %v8571_v9 = vld [vmem:[#allocation3 + $0x24] ss:$8 sps:$4 sm:$0xff]  }
 0x3d6   : > { %3443 = vrot.lane.b32.xlu1 %v3329_v15, %s6768_s13  ;;  %v3349_v50 = vsel %vm7314_vm13, %v3344_v28, %v8301_v5  ;;  %v3383_v32 = vor.u32 %v3382_v47, %v3378_v42  ;;  %v3129_v27 = vrot.slane %v3127_v52, 4  ;;  %v3132_v35 = vrot.slane %v3130_v8, 5  ;;  %4279 = vmatprep.subr.bf16.mxu1 %v6767_v57  ;;  %v6556_v47 = vld [vmem:[%s9030_s3 + $0xf0] sm:$0xff]   ;;  %v6595_v28 = vld [vmem:[%s9030_s3 + $0xc0] sm:$0xff]  }
 0x3d7   : > { %v3359_v53 = vsel %vm7314_vm13, %v3354_v19, %v3358_v29  ;;  %v3140_v55 = vshrl.u32 %v8017_v56, 16  ;;  %v3392_v12 = vrot.slane %v3390_v0, 4  ;;  %v3388_v5 = vrot.slane %v3386_v38, 5  ;;  %v6589_v19 = vld [vmem:[%s9030_s3 + $0xc8] sm:$0xff]  }
 0x3d8   : > { %3449 = vrot.lane.b32.xlu0 %v3359_v53, %s6768_s13  ;;  %v3136_v63 = vshll.u32 %v8017_v56, 16  ;;  %v3379_v51 = vsel %vm7314_vm13, %v3374_v41, %v3378_v42  ;;  %v3364_v52 = vrot.slane %v3363_v4, 4  ;;  %v3403_v10 = vor.u32 %v3402_v46, %v3398_v49  ;;  %v8594_v42 = vld [vmem:[#allocation3 + $0x34] ss:$8 sps:$4 sm:$0xff]   ;;  %v8607_v4 = vld [vmem:[#allocation3 + $0x44] ss:$8 sps:$4 sm:$0xff]  }
 0x3d9   : > { %v3384_v20 = vrot.slane %v3383_v32, 4  ;;  %4280 = vmatpush2.bf16.msra.mxu1 %v6574_v18  ;;  %v3133_v36 = vor.u32 %v3132_v35, %v3129_v27  ;;  %v3142_v13 = vrot.slane %v3140_v55, 4  ;;  %v3393_v58 = vor.u32 %v3392_v12, %v3388_v5  ;;  %v6604_v27 = vld [vmem:[%s9030_s3 + $0x110] sm:$0xff]   ;;  %v6607_v55 = vld [vmem:[%s9030_s3 + $0x108] sm:$0xff]  }
 0x3da   : > { %3447 = vrot.lane.b32.xlu1 %v3349_v50, %s6768_s13  ;;  %4281 = vmatprep.subr.bf16.mxu1 %v6767_v57  ;;  %v3369_v56 = vsel %vm7314_vm13, %v3364_v52, %v8423_v25  ;;  %v3138_v30 = vrot.slane %v3136_v63, 5  ;;  %v3404_v16 = vrot.slane %v3403_v10, 4  ;;  %vm3489_vm12 = vcmask 1043968   ;;  %v8626_v18 = vld [vmem:[#allocation3 + $0x54] ss:$8 sps:$4 sm:$0xff]   ;;  %v6611_v52 = vld [vmem:[%s9030_s3 + $0x100] sm:$0xff]  }
 0x3db   : > { %v3389_v2 = vsel %vm7314_vm13, %v3384_v20, %v3388_v5  ;;  %v3134_v43 = vrot.slane %v3133_v36, 4  ;;  %v3394_v25 = vrot.slane %v3393_v58, 4  ;;  %v8638_v20 = vld [vmem:[#allocation3 + $0x64] ss:$8 sps:$4 sm:$0xff]   ;;  %vm3518_vm2 = vmand %vm3489_vm12, %vm1442_vm10  ;;  %vm6771_vm10 = vmmov 0  }
 0x3dc   : > { %3453 = vrot.lane.b32.xlu0 %v3379_v51, %s6768_s13  ;;  %v3143_v39 = vor.u32 %v3142_v13, %v3138_v30 }
 0x3dd   : > { %4282 = vmatpush2.bf16.msra.mxu1 %v6576_v14  ;;  %v3139_v62 = vsel %vm7314_vm13, %v3134_v43, %v3138_v30  ;;  %v3399_v45 = vsel %vm7314_vm13, %v3394_v25, %v3398_v49  ;;  %v6599_v49 = vld [vmem:[%s9030_s3 + $0x118] sm:$0xff]  }
 0x3de   : > { %3451 = vrot.lane.b32.xlu1 %v3369_v56, %s6768_s13  ;;  %4283 = vmatprep.subr.bf16.mxu1 %v6767_v57  ;;  %v3144_v3 = vrot.slane %v3143_v39, 4 }
 0x3e0   : > { %3459 = vrot.lane.b32.xlu0 %v3404_v16, %s6768_s13  ;;  %v3149_v33 = vsel %vm7314_vm13, %v3144_v3, %v8021_v23  ;;  %vm2990_vm13 = vmor %vm2989_vm1, %vm2988_vm0  ;;  %v8647_v16 = vld [vmem:[#allocation3 + $0x74] ss:$8 sps:$4 sm:$0xff]   ;;  %v3519_v3 = vld [vmem:[#allocation3 + $0xd8] sm:$0xf] }
 0x3e1   : > { %4284 = vmatpush2.bf16.msra.mxu1 %v6579_v48  ;;  %2991 = vst.msk [vmem:[#allocation3 + $0xe0] sm:$0xff] %vm2990_vm13, %v6767_v57  ;;  %2992 = vst.msk [vmem:[#allocation3 + $0xe8] sm:$0xff] %vm2990_vm13, %v6767_v57 }
 0x3e2   : > { %3455 = vrot.lane.b32.xlu1 %v3389_v2, %s6768_s13  ;;  %4285 = vmatprep.subr.bf16.mxu1 %v6767_v57  ;;  %2993 = vst.msk [vmem:[#allocation3 + $0xf0] sm:$0xff] %vm2990_vm13, %v6767_v57  ;;  %2994 = vst.msk [vmem:[#allocation3 + $0xf8] sm:$0xff] %vm2990_vm13, %v6767_v57 }
 0x3e3   : > { %2995 = vst.msk [vmem:[#allocation3 + $0x100] sm:$0xff] %vm2990_vm13, %v6767_v57  ;;  %2996 = vst.msk [vmem:[#allocation3 + $0x108] sm:$0xff] %vm2990_vm13, %v6767_v57 }
 0x3e4   : > { %3405 = vrot.lane.b32.xlu0 %v3139_v62, %s6768_s13  ;;  %2997 = vst.msk [vmem:[#allocation3 + $0x110] sm:$0xff] %vm2990_vm13, %v6767_v57  ;;  %2998 = vst.msk [vmem:[#allocation3 + $0x118] sm:$0xff] %vm2990_vm13, %v6767_v57 }
 0x3e5   : > { %4286 = vmatpush2.bf16.msra.mxu1 %v6580_v40 }
 0x3e6   : > { %3457 = vrot.lane.b32.xlu1 %v3399_v45, %s6768_s13  ;;  %v8658_v45 = vld [vmem:[#allocation3 + $0x84] ss:$8 sps:$4 sm:$0xff]  }
 0x3ea   : > { %3407 = vrot.lane.b32.xlu1 %v3149_v33, %s6768_s13  ;;  %s6695_s13 = sshll.u32 %s6772_s12, 4  ;;  %s6696_s13 = int_to_ptr.vmem [resolvable:$false] %s6695_s13 }
 0x3eb   : > { %s6697_s9 = scalar_lea.vmem %s6696_s13, 32  ;;  %p6698_p11 = scmp.lt.s32.totalorder %s5429_s22, %s6696_s13 }
 0x3ec   : > { %p6699_p0 = scmp.lt.s32.totalorder %s6697_s9, %s6691_s10 }
 0x3ee   : > { %p6700_p1 = por %p6699_p0, %p6698_p11 }
 0x3f0   : > { %p6701_p3 = pnand %p6700_p1, %p6694_p8 }
 0x3fe   : > { %v3410_v24 = vpop.permute.xlu0 %3409 }
 0x3ff   : > { %3492 = vst.msk [vmem:[#allocation3 + $0x10] sm:$0xf] %vm3489_vm12, %v3410_v24 }
 0x408   : > { %v3412_v34 = vpop.permute.xlu1 %3411 }
 0x409   : > { %3493 = vst.msk [vmem:[#allocation3 + $0x18] sm:$0xf] %vm3489_vm12, %v3412_v34 }
 0x410   : > { %v8538_v44 = vld [vmem:[#allocation3 + $0x10] ss:$8 sps:$4 sm:$0xff]  }
 0x411   : > { %4043 = vmatmul.mubr.bf16.vlgmr.msra.gmra.mxu0 %v8538_v44 }
 0x412   : > { %4738 = vmatpush1.bf16.msra.mxu0 %v6550_v6  ;;  %5816 = vmatprep.mubr.msk.bf16.mxu0 %vm3961_vm15, %v8571_v9 }
 0x413   : > { %v3414_v23 = vpop.permute.xlu0 %3413  ;;  %4739 = vmatprep.subr.bf16.mxu0 %v6767_v57 }
 0x414   : > { %3494 = vst.msk [vmem:[#allocation3 + $0x20] sm:$0xf] %vm3489_vm12, %v3414_v23 }
 0x416   : > { %4740 = vmatpush1.bf16.msra.mxu0 %v6556_v47 }
 0x417   : > { %4741 = vmatprep.subr.bf16.mxu0 %v6767_v57 }
 0x419   : > { %v3418_v54 = vpop.permute.xlu0 %3417  ;;  %v3416_v7 = vpop.permute.xlu1 %3415 }
 0x41a   : > { %3496 = vst.msk [vmem:[#allocation3 + $0x30] sm:$0xf] %vm3489_vm12, %v3418_v54  ;;  %3495 = vst.msk [vmem:[#allocation3 + $0x28] sm:$0xf] %vm3489_vm12, %v3416_v7  ;;  %4742 = vmatpush1.bf16.msra.mxu0 %v6562_v21  ;;  %v8670_v21 = vld [vmem:[#allocation3 + $0x94] ss:$8 sps:$4 sm:$0xff]  }
 0x41b   : > { %4743 = vmatprep.subr.bf16.mxu0 %v6767_v57  ;;  %v3666_v59 = vld [vmem:[#allocation3 + $0x20] sm:$0xff] }
 0x41e   : > { %4744 = vmatpush1.bf16.msra.mxu0 %v6567_v26  ;;  %v8679_v26 = vld [vmem:[#allocation3 + $0xa4] ss:$8 sps:$4 sm:$0xff]  }
 0x41f   : > { %4745 = vmatprep.subr.bf16.mxu0 %v6767_v57 }
 0x421   : > { %v3667_v11 = vld [vmem:[#allocation3 + $0x28] sm:$0xff]  ;;  %v3668_v0 = vld [vmem:[#allocation3 + $0x30] sm:$0xff] }
 0x422   : > { %v8574_v60 = vcombine.low %v3666_v59, %v3667_v11  ;;  %4746 = vmatpush1.bf16.msra.mxu0 %v6575_v61  ;;  %v6584_v59 = vld [vmem:[#allocation3 + $0x4] ss:$8 sps:$4 sm:$0xff]  }
 0x423   : > { %4747 = vmatprep.subr.bf16.mxu0 %v6767_v57  ;;  %5845 = vmatprep.mubr.msk.bf16.mxu1 %vm3961_vm15, %v6584_v59  ;;  %v6621_v59 = vld [vmem:[#allocation7 + $0x8] sm:$0xff]  }
 0x424   : > { %v3422_v31 = vpop.permute.xlu0 %3421  ;;  %4051 = vmatmul.mubr.bf16.gmra.mxu0 %v8574_v60 }
 0x425   : > { %3498 = vst.msk [vmem:[#allocation3 + $0x40] sm:$0xf] %vm3489_vm12, %v3422_v31  ;;  %v3420_v22 = vpop.permute.xlu1 %3419  ;;  %5817 = vmatprep.mubr.msk.bf16.mxu0 %vm3961_vm15, %v8594_v42  ;;  %v8689_v31 = vld [vmem:[#allocation3 + $0xb4] ss:$8 sps:$4 sm:$0xff]  }
 0x426   : > { %3497 = vst.msk [vmem:[#allocation3 + $0x38] sm:$0xf] %vm3489_vm12, %v3420_v22  ;;  %4748 = vmatpush1.bf16.msra.mxu0 %v6581_v37  ;;  %v8699_v37 = vld [vmem:[#allocation3 + $0xc4] ss:$8 sps:$4 sm:$0xff]  }
 0x427   : > { %4749 = vmatprep.subr.bf16.mxu0 %v6767_v57 }
 0x428   : > { %v3426_v8 = vpop.permute.xlu0 %3425 }
 0x429   : > { %3500 = vst.msk [vmem:[#allocation3 + $0x50] sm:$0xf] %vm3489_vm12, %v3426_v8  ;;  %v6605_v8 = vld [vmem:[#allocation3 + $0xe4] ss:$8 sps:$4 sm:$0xff]  }
 0x42a   : > { %4750 = vmatpush1.bf16.msra.mxu0 %v6589_v19 }
 0x42b   : > { %v3424_v29 = vpop.permute.xlu1 %3423  ;;  %4751 = vmatprep.subr.bf16.mxu0 %v6767_v57 }
 0x42c   : > { %3499 = vst.msk [vmem:[#allocation3 + $0x48] sm:$0xf] %vm3489_vm12, %v3424_v29  ;;  %v3670_v32 = vld [vmem:[#allocation3 + $0x40] sm:$0xff] }
 0x42d   : > { %v3669_v15 = vld [vmem:[#allocation3 + $0x38] sm:$0xff]  ;;  %v3690_v29 = vld [vmem:[#allocation3 + $0xe0] sm:$0xff] }
 0x42e   : > { %v3430_v1 = vpop.permute.xlu0 %3429  ;;  %v8596_v41 = vcombine.low %v3668_v0, %v3669_v15  ;;  %4752 = vmatpush1.bf16.msra.mxu0 %v6595_v28  ;;  %v3691_v28 = vld [vmem:[#allocation3 + $0xe8] sm:$0xff]  ;;  %v8721_v15 = vld [vmem:[#allocation3 + $0xf4] ss:$8 sps:$4 sm:$0xff]  }
 0x42f   : > { %3502 = vst.msk [vmem:[#allocation3 + $0x60] sm:$0xf] %vm3489_vm12, %v3430_v1  ;;  %4761 = vmatprep.subr.bf16.mxu0 %v6767_v57  ;;  %v5797_v0 = vcombine.low %v3690_v29, %v3691_v28  ;;  %v8728_v1 = vld [vmem:[#allocation3 + $0xf0] ss:$8 sps:$4 sm:$0xff]  }
 0x430   : > { %4059 = vmatmul.mubr.bf16.gmra.mxu0 %v8596_v41  ;;  %v3672_v51 = vld [vmem:[#allocation3 + $0x50] sm:$0xff] }
 0x431   : > { %5818 = vmatprep.mubr.msk.bf16.mxu0 %vm3961_vm15, %v8607_v4 }
 0x432   : > { %4762 = vmatpush2.bf16.msra.mxu0 %v6599_v49  ;;  %v8730_v49 = vld [vmem:[#allocation3 + $0x104] ss:$8 sps:$4 sm:$0xff]  }
 0x433   : > { %v3434_v38 = vpop.permute.xlu0 %3433  ;;  %v3671_v50 = vld [vmem:[#allocation3 + $0x48] sm:$0xff]  ;;  %4763 = vmatprep.subr.bf16.mxu0 %v6767_v57 }
 0x434   : > { %v3428_v46 = vpop.permute.xlu1 %3427  ;;  %3504 = vst.msk [vmem:[#allocation3 + $0x70] sm:$0xf] %vm3489_vm12, %v3434_v38  ;;  %v8616_v35 = vcombine.low %v3670_v32, %v3671_v50  ;;  %v8738_v38 = vld [vmem:[#allocation3 + $0x100] ss:$8 sps:$4 sm:$0xff]  }
 0x435   : > { %3501 = vst.msk [vmem:[#allocation3 + $0x58] sm:$0xf] %vm3489_vm12, %v3428_v46  ;;  %v6616_v46 = vld [vmem:[#allocation7 + $0x30] sm:$0xff]  }
 0x436   : > { %4764 = vmatpush2.bf16.msra.mxu0 %v6604_v27  ;;  %v3674_v58 = vld [vmem:[#allocation3 + $0x60] sm:$0xff] }
 0x437   : > { %4765 = vmatprep.subr.bf16.mxu0 %v6767_v57 }
 0x438   : > { %v3432_v53 = vpop.permute.xlu1 %3431  ;;  %4067 = vmatmul.mubr.bf16.gmra.mxu0 %v8616_v35 }
 0x439   : > { %3503 = vst.msk [vmem:[#allocation3 + $0x68] sm:$0xf] %vm3489_vm12, %v3432_v53  ;;  %5819 = vmatprep.mubr.msk.bf16.mxu0 %vm3961_vm15, %v8626_v18 }
 0x43a   : > { %v3438_v12 = vpop.permute.xlu0 %3437  ;;  %4766 = vmatpush2.bf16.msra.mxu0 %v6607_v55 }
 0x43b   : > { %3506 = vst.msk [vmem:[#allocation3 + $0x80] sm:$0xf] %vm3489_vm12, %v3438_v12  ;;  %4767 = vmatprep.subr.bf16.mxu0 %v6767_v57  ;;  %v3676_v25 = vld [vmem:[#allocation3 + $0x70] sm:$0xff] }
 0x43c   : > { %v3436_v5 = vpop.permute.xlu1 %3435  ;;  %v3673_v63 = vld [vmem:[#allocation3 + $0x58] sm:$0xff] }
 0x43d   : > { %3505 = vst.msk [vmem:[#allocation3 + $0x78] sm:$0xf] %vm3489_vm12, %v3436_v5  ;;  %v8634_v10 = vcombine.low %v3672_v51, %v3673_v63  ;;  %v6617_v5 = vld [vmem:[#allocation7 + $0x28] sm:$0xff]  }
 0x43e   : > { %4768 = vmatpush2.bf16.msra.mxu0 %v6611_v52 }
 0x440   : > { %4075 = vmatmul.mubr.bf16.gmra.mxu0 %v8634_v10  ;;  %v3675_v56 = vld [vmem:[#allocation3 + $0x68] sm:$0xff] }
 0x441   : > { %5820 = vmatprep.mubr.msk.bf16.mxu0 %vm3961_vm15, %v8638_v20  ;;  %v8644_v14 = vcombine.low %v3674_v58, %v3675_v56  ;;  %v6618_v56 = vld [vmem:[#allocation7 + $0x20] sm:$0xff]  }
 0x442   : > { %v3442_v36 = vpop.permute.xlu0 %3441  ;;  %v3440_v13 = vpop.permute.xlu1 %3439 }
 0x443   : > { %3508 = vst.msk [vmem:[#allocation3 + $0x90] sm:$0xf] %vm3489_vm12, %v3442_v36  ;;  %3507 = vst.msk [vmem:[#allocation3 + $0x88] sm:$0xf] %vm3489_vm12, %v3440_v13 }
 0x444   : > { %v3677_v43 = vld [vmem:[#allocation3 + $0x78] sm:$0xff] }
 0x445   : > { %v8655_v40 = vcombine.low %v3676_v25, %v3677_v43  ;;  %v6619_v25 = vld [vmem:[#allocation7 + $0x18] sm:$0xff]  }
 0x446   : > { %v3446_v30 = vpop.permute.xlu0 %3445 }
 0x447   : > { %3510 = vst.msk [vmem:[#allocation3 + $0xa0] sm:$0xf] %vm3489_vm12, %v3446_v30 }
 0x448   : > { %v3444_v57 = vpop.permute.xlu1 %3443  ;;  %4083 = vmatmul.mubr.bf16.gmra.mxu0 %v8644_v14 }
 0x449   : > { %3509 = vst.msk [vmem:[#allocation3 + $0x98] sm:$0xf] %vm3489_vm12, %v3444_v57  ;;  %5821 = vmatprep.mubr.msk.bf16.mxu0 %vm3961_vm15, %v8647_v16 }
 0x44a   : > { %v3450_v2 = vpop.permute.xlu0 %3449  ;;  %v8667_v23 = vld [vmem:[#allocation3 + $0x80] ss:$8 sps:$4 sm:$0xff]  }
 0x44b   : > { %3512 = vst.msk [vmem:[#allocation3 + $0xb0] sm:$0xf] %vm3489_vm12, %v3450_v2 }
 0x44c   : > { %v3448_v48 = vpop.permute.xlu1 %3447 }
 0x44d   : > { %3511 = vst.msk [vmem:[#allocation3 + $0xa8] sm:$0xf] %vm3489_vm12, %v3448_v48 }
 0x44e   : > { %v3454_v39 = vpop.permute.xlu0 %3453 }
 0x44f   : > { %3514 = vst.msk [vmem:[#allocation3 + $0xc0] sm:$0xf] %vm3489_vm12, %v3454_v39 }
 0x450   : > { %v3452_v62 = vpop.permute.xlu1 %3451  ;;  %4091 = vmatmul.mubr.bf16.gmra.mxu0 %v8655_v40  ;;  %v8677_v7 = vld [vmem:[#allocation3 + $0x90] ss:$8 sps:$4 sm:$0xff]  }
 0x451   : > { %3513 = vst.msk [vmem:[#allocation3 + $0xb8] sm:$0xf] %vm3489_vm12, %v3452_v62  ;;  %5822 = vmatprep.mubr.msk.bf16.mxu0 %vm3961_vm15, %v8658_v45 }
 0x452   : > { %v3460_v33 = vpop.permute.xlu0 %3459 }
 0x453   : > { %v3520_v24 = vsel %vm3518_vm2, %v3460_v33, %v3519_v3  ;;  %v6620_v3 = vld [vmem:[#allocation7 + $0x10] sm:$0xff]  }
 0x454   : > { %v3456_v34 = vpop.permute.xlu1 %3455  ;;  %3521 = vst [vmem:[#allocation3 + $0xd8] sm:$0xf] %v3520_v24  ;;  %v8685_v11 = vld [vmem:[#allocation3 + $0xa0] ss:$8 sps:$4 sm:$0xff]  }
 0x455   : > { %3515 = vst.msk [vmem:[#allocation3 + $0xc8] sm:$0xf] %vm3489_vm12, %v3456_v34 }
 0x456   : > { %v3406_v6 = vpop.permute.xlu0 %3405 }
 0x457   : > { %3490 = vst.msk [vmem:[#allocation3] sm:$0xf] %vm3489_vm12, %v3406_v6 }
 0x458   : > { %v3458_v47 = vpop.permute.xlu1 %3457  ;;  %4099 = vmatmul.mubr.bf16.gmra.mxu0 %v8667_v23  ;;  %v8695_v22 = vld [vmem:[#allocation3 + $0xb0] ss:$8 sps:$4 sm:$0xff]  }
 0x459   : > { %3516 = vst.msk [vmem:[#allocation3 + $0xd0] sm:$0xf] %vm3489_vm12, %v3458_v47  ;;  %5823 = vmatprep.mubr.msk.bf16.mxu0 %vm3961_vm15, %v8670_v21 }
 0x45c   : > { %v3408_v54 = vpop.permute.xlu1 %3407 }
 0x45d   : > { %3491 = vst.msk [vmem:[#allocation3 + $0x8] sm:$0xf] %vm3489_vm12, %v3408_v54 }
 0x460   : > { %4107 = vmatmul.mubr.bf16.gmra.mxu0 %v8677_v7  ;;  %v8715_v19 = vld [vmem:[#allocation3 + $0xd0] ss:$8 sps:$4 sm:$0xff]  }
 0x461   : > { %5824 = vmatprep.mubr.msk.bf16.mxu0 %vm3961_vm15, %v8679_v26 }
 0x464   : > { %v6582_v61 = vld [vmem:[#allocation3] ss:$8 sps:$4 sm:$0xff]  }
 0x465   : > { %4288 = vmatmul.mubr.bf16.vlgmr.msra.gmra.mxu1 %v6582_v61 }
 0x466   : > { %5846 = vmatprep.mubr.msk.bf16.mxu1 %vm3961_vm15, %v8540_v17  ;;  %v8705_v17 = vld [vmem:[#allocation3 + $0xc0] ss:$8 sps:$4 sm:$0xff]  }
 0x468   : > { %4115 = vmatmul.mubr.bf16.gmra.mxu0 %v8685_v11 }
 0x469   : > { %5825 = vmatprep.mubr.msk.bf16.mxu0 %vm3961_vm15, %v8689_v31 }
 0x46d   : > { %4296 = vmatmul.mubr.bf16.gmra.mxu1 %v8538_v44  ;;  %v8709_v44 = vld [vmem:[#allocation3 + $0xd4] ss:$8 sps:$4 sm:$0xff]  }
 0x46e   : > { %5847 = vmatprep.mubr.msk.bf16.mxu1 %vm3961_vm15, %v8571_v9 }
 0x470   : > { %4123 = vmatmul.mubr.bf16.gmra.mxu0 %v8695_v22 }
 0x471   : > { %5826 = vmatprep.mubr.msk.bf16.mxu0 %vm3961_vm15, %v8699_v37 }
 0x475   : > { %4304 = vmatmul.mubr.bf16.gmra.mxu1 %v8574_v60 }
 0x476   : > { %5848 = vmatprep.mubr.msk.bf16.mxu1 %vm3961_vm15, %v8594_v42 }
 0x478   : > { %4131 = vmatmul.mubr.bf16.gmra.mxu0 %v8705_v17 }
 0x479   : > { %5827 = vmatprep.mubr.msk.bf16.mxu0 %vm3961_vm15, %v8709_v44 }
 0x47d   : > { %4312 = vmatmul.mubr.bf16.gmra.mxu1 %v8596_v41 }
 0x47e   : > { %5849 = vmatprep.mubr.msk.bf16.mxu1 %vm3961_vm15, %v8607_v4 }
 0x480   : > { %4139 = vmatmul.mubr.bf16.gmra.mxu0 %v8715_v19 }
 0x481   : > { %5828 = vmatprep.mubr.msk.bf16.mxu0 %vm3961_vm15, %v6605_v8 }
 0x485   : > { %4320 = vmatmul.mubr.bf16.gmra.mxu1 %v8616_v35 }
 0x486   : > { %5850 = vmatprep.mubr.msk.bf16.mxu1 %vm3961_vm15, %v8626_v18 }
 0x488   : > { %4147 = vmatmul.mubr.bf16.gmra.mxu0 %v5797_v0 }
 0x489   : > { %5829 = vmatprep.mubr.msk.bf16.mxu0 %vm3961_vm15, %v8721_v15 }
 0x48d   : > { %4328 = vmatmul.mubr.bf16.gmra.mxu1 %v8634_v10 }
 0x48e   : > { %5851 = vmatprep.mubr.msk.bf16.mxu1 %vm3961_vm15, %v8638_v20 }
 0x490   : > { %4155 = vmatmul.mubr.bf16.gmra.mxu0 %v8728_v1 }
 0x491   : > { %5830 = vmatprep.mubr.msk.bf16.mxu0 %vm3961_vm15, %v8730_v49 }
 0x495   : > { %4336 = vmatmul.mubr.bf16.gmra.mxu1 %v8644_v14 }
 0x496   : > { %5852 = vmatprep.mubr.msk.bf16.mxu1 %vm3961_vm15, %v8647_v16 }
 0x498   : > { %4163 = vmatmul.mubr.bf16.gmra.mxu0 %v8738_v38 }
 0x499   : > { %5929 = vmatprep.mubr.msk.bf16.mxu0 %vm3961_vm15, %v8571_v9  ;;  %v6770_v9 = vmov 0.0  }
 0x49a   : > { %6354 = vmatprep.subr.bf16.mxu1 %v6770_v9 }
 0x49d   : > { %4344 = vmatmul.mubr.bf16.gmra.mxu1 %v8655_v40 }
 0x49e   : > { %5853 = vmatprep.mubr.msk.bf16.mxu1 %vm3961_vm15, %v8658_v45 }
 0x4a0   : > { %4770 = vmatmul.mubr.bf16.vlgmr.msra.gmra.mxu0 %v8574_v60 }
 0x4a1   : > { %5930 = vmatprep.mubr.msk.bf16.mxu0 %vm3961_vm15, %v8594_v42  ;;  %v6615_v42 = vld [vmem:[#allocation7 + $0x38] sm:$0xff]  }
 0x4a2   : > { %6355 = vmatpush3.bf16.msra.mxu1 %v6615_v42 }
 0x4a3   : > { %6356 = vmatprep.subr.bf16.mxu1 %v6770_v9 }
 0x4a5   : > { %4352 = vmatmul.mubr.bf16.gmra.mxu1 %v8667_v23 }
 0x4a6   : > { %5854 = vmatprep.mubr.msk.bf16.mxu1 %vm3961_vm15, %v8670_v21  ;;  %6357 = vmatpush3.bf16.msra.mxu1 %v6616_v46 }
 0x4a7   : > { %6358 = vmatprep.subr.bf16.mxu1 %v6770_v9 }
 0x4a8   : > { %4778 = vmatmul.mubr.bf16.gmra.mxu0 %v8596_v41 }
 0x4a9   : > { %5931 = vmatprep.mubr.msk.bf16.mxu0 %vm3961_vm15, %v8607_v4 }
 0x4aa   : > { %6359 = vmatpush3.bf16.msra.mxu1 %v6617_v5 }
 0x4ab   : > { %6360 = vmatprep.subr.bf16.mxu1 %v6770_v9 }
 0x4ad   : > { %4360 = vmatmul.mubr.bf16.gmra.mxu1 %v8677_v7 }
 0x4ae   : > { %5855 = vmatprep.mubr.msk.bf16.mxu1 %vm3961_vm15, %v8679_v26  ;;  %6361 = vmatpush3.bf16.msra.mxu1 %v6618_v56 }
 0x4af   : > { %6362 = vmatprep.subr.bf16.mxu1 %v6770_v9 }
 0x4b0   : > { %4786 = vmatmul.mubr.bf16.gmra.mxu0 %v8616_v35 }
 0x4b1   : > { %5932 = vmatprep.mubr.msk.bf16.mxu0 %vm3961_vm15, %v8626_v18 }
 0x4b2   : > { %6363 = vmatpush3.bf16.msra.mxu1 %v6619_v25 }
 0x4b3   : > { %6364 = vmatprep.subr.bf16.mxu1 %v6770_v9 }
 0x4b5   : > { %4368 = vmatmul.mubr.bf16.gmra.mxu1 %v8685_v11 }
 0x4b6   : > { %5856 = vmatprep.mubr.msk.bf16.mxu1 %vm3961_vm15, %v8689_v31  ;;  %6365 = vmatpush3.bf16.msra.mxu1 %v6620_v3 }
 0x4b7   : > { %6366 = vmatprep.subr.bf16.mxu1 %v6770_v9 }
 0x4b8   : > { %4794 = vmatmul.mubr.bf16.gmra.mxu0 %v8634_v10 }
 0x4b9   : > { %5933 = vmatprep.mubr.msk.bf16.mxu0 %vm3961_vm15, %v8638_v20 }
 0x4ba   : > { %6367 = vmatpush3.bf16.msra.mxu1 %v6621_v59 }
 0x4bb   : > { %6368 = vmatprep.subr.bf16.mxu1 %v6770_v9 }
 0x4bd   : > { %4376 = vmatmul.mubr.bf16.gmra.mxu1 %v8695_v22 }
 0x4be   : > { %5857 = vmatprep.mubr.msk.bf16.mxu1 %vm3961_vm15, %v8699_v37 }
 0x4c0   : > { %4802 = vmatmul.mubr.bf16.gmra.mxu0 %v8644_v14 }
 0x4c1   : > { %5934 = vmatprep.mubr.msk.bf16.mxu0 %vm3961_vm15, %v8647_v16 }
 0x4c5   : > { %4384 = vmatmul.mubr.bf16.gmra.mxu1 %v8705_v17 }
 0x4c6   : > { %5858 = vmatprep.mubr.msk.bf16.mxu1 %vm3961_vm15, %v8709_v44 }
 0x4c8   : > { %4810 = vmatmul.mubr.bf16.gmra.mxu0 %v8655_v40 }
 0x4c9   : > { %5935 = vmatprep.mubr.msk.bf16.mxu0 %vm3961_vm15, %v8658_v45 }
 0x4cd   : > { %4392 = vmatmul.mubr.bf16.gmra.mxu1 %v8715_v19 }
 0x4ce   : > { %5859 = vmatprep.mubr.msk.bf16.mxu1 %vm3961_vm15, %v6605_v8 }
 0x4d0   : > { %4818 = vmatmul.mubr.bf16.gmra.mxu0 %v8667_v23 }
 0x4d1   : > { %5936 = vmatprep.mubr.msk.bf16.mxu0 %vm3961_vm15, %v8670_v21  ;;  %v8788_v60 = vpop.f32.mrf.mxu0 }
 0x4d3   : > { %v4046_v41 = vpop.f32.mrf.mxu0 }
 0x4d5   : > { %4400 = vmatmul.mubr.bf16.gmra.mxu1 %v5797_v0  ;;  %v8791_v50 = vpop.f32.mrf.mxu0 }
 0x4d6   : > { %5860 = vmatprep.mubr.msk.bf16.mxu1 %vm3961_vm15, %v8721_v15 }
 0x4d7   : > { %v4049_v4 = vpop.f32.mrf.mxu0 }
 0x4d8   : > { %4826 = vmatmul.mubr.bf16.gmra.mxu0 %v8677_v7 }
 0x4d9   : > { %5937 = vmatprep.mubr.msk.bf16.mxu0 %vm3961_vm15, %v8679_v26 }
 0x4dd   : > { %4408 = vmatmul.mubr.bf16.gmra.mxu1 %v8728_v1 }
 0x4de   : > { %6370 = vmatprep.mubr.msk.bf16.mxu1 %vm6771_vm10, %v6770_v9 }
 0x4e0   : > { %4834 = vmatmul.mubr.bf16.gmra.mxu0 %v8685_v11 }
 0x4e1   : > { %5938 = vmatprep.mubr.msk.bf16.mxu0 %vm3961_vm15, %v8689_v31 }
 0x4e4   : > { %v8802_v32 = vpop.f32.mrf.mxu0 }
 0x4e6   : > { %v4054_v27 = vpop.f32.mrf.mxu0 }
 0x4e8   : > { %4842 = vmatmul.mubr.bf16.gmra.mxu0 %v8695_v22  ;;  %v8806_v35 = vpop.f32.mrf.mxu0 }
 0x4e9   : > { %5939 = vmatprep.mubr.msk.bf16.mxu0 %vm3961_vm15, %v8699_v37 }
 0x4ea   : > { %v4057_v53 = vpop.f32.mrf.mxu0 }
 0x4f0   : > { %v8810_v55 = vpop.f32.mrf.mxu0  ;;  %4850 = vmatmul.mubr.bf16.gmra.mxu0 %v8705_v17 }
 0x4f1   : > { %5940 = vmatprep.mubr.msk.bf16.mxu0 %vm3961_vm15, %v8709_v44 }
 0x4f2   : > { %v4062_v12 = vpop.f32.mrf.mxu0 }
 0x4f4   : > { %v8815_v63 = vpop.f32.mrf.mxu0 }
 0x4f6   : > { %v4065_v18 = vpop.f32.mrf.mxu0 }
 0x4f8   : > { %v8818_v51 = vpop.f32.mrf.mxu0  ;;  %4858 = vmatmul.mubr.bf16.gmra.mxu0 %v8715_v19 }
 0x4fa   : > { %v4070_v52 = vpop.f32.mrf.mxu0 }
 0x4fc   : > { %v8821_v10 = vpop.f32.mrf.mxu0 }
 0x4fe   : > { %v4073_v20 = vpop.f32.mrf.mxu0 }
 0x500   : > { %v8823_v36 = vpop.f32.mrf.mxu0 }
 0x502   : > { %v4078_v13 = vpop.f32.mrf.mxu0 }
 0x504   : > { %v8825_v58 = vpop.f32.mrf.mxu0 }
 0x506   : > { %v4081_v30 = vpop.f32.mrf.mxu0 }
 0x507   : > { %v6622_v30 = vld [vmem:[#allocation7] sm:$0xff]  }
 0x508   : > { %v8828_v14 = vpop.f32.mrf.mxu0  ;;  %6369 = vmatpush3.bf16.msra.mxu1 %v6622_v30 }
 0x509   : > { %6374 = vmatprep.subr.bf16.mxu1 %v6770_v9 }
 0x50a   : > { %v4086_v57 = vpop.f32.mrf.mxu0 }
 0x50c   : > { %v8830_v16 = vpop.f32.mrf.mxu0 }
 0x50e   : > { %v4089_v2 = vpop.f32.mrf.mxu0 }
 0x510   : > { %v8832_v48 = vpop.f32.mrf.mxu0 }
 0x512   : > { %v4094_v43 = vpop.f32.mrf.mxu0 }
 0x514   : > { %v8834_v39 = vpop.f32.mrf.mxu0 }
 0x516   : > { %v4097_v40 = vpop.f32.mrf.mxu0 }
 0x518   : > { %v8837_v62 = vpop.f32.mrf.mxu0 }
 0x51a   : > { %v4102_v45 = vpop.f32.mrf.mxu0 }
 0x51c   : > { %v8839_v33 = vpop.f32.mrf.mxu0 }
 0x51e   : > { %v4105_v24 = vpop.f32.mrf.mxu0 }
 0x520   : > { %v8842_v34 = vpop.f32.mrf.mxu0 }
 0x522   : > { %v4110_v6 = vpop.f32.mrf.mxu0 }
 0x524   : > { %v8844_v23 = vpop.f32.mrf.mxu0 }
 0x525   : > { %v8846_v47 = vpop.f32.mrf.mxu1 }
 0x526   : > { %v4113_v21 = vpop.f32.mrf.mxu0 }
 0x527   : > { %v4291_v54 = vpop.f32.mrf.mxu1 }
 0x528   : > { %v8848_v7 = vpop.f32.mrf.mxu0 }
 0x529   : > { %v8850_v26 = vpop.f32.mrf.mxu1 }
 0x52a   : > { %v4118_v61 = vpop.f32.mrf.mxu0 }
 0x52b   : > { %v4294_v11 = vpop.f32.mrf.mxu1 }
 0x52c   : > { %v8852_v31 = vpop.f32.mrf.mxu0 }
 0x52d   : > { %v8855_v22 = vpop.f32.mrf.mxu1 }
 0x52e   : > { %v4121_v37 = vpop.f32.mrf.mxu0 }
 0x52f   : > { %v4299_v17 = vpop.f32.mrf.mxu1 }
 0x530   : > { %v4124_v44 = vpop.f32.mrf.mxu0 }
 0x531   : > { %v8857_v8 = vpop.f32.mrf.mxu1 }
 0x532   : > { %v4126_v19 = vpop.f32.mrf.mxu0 }
 0x533   : > { %v4302_v29 = vpop.f32.mrf.mxu1 }
 0x534   : > { %v4127_v28 = vpop.f32.mrf.mxu0 }
 0x535   : > { %v8859_v0 = vpop.f32.mrf.mxu1 }
 0x536   : > { %v4129_v42 = vpop.f32.mrf.mxu0 }
 0x537   : > { %v4307_v41 = vpop.f32.mrf.mxu1  ;;  %v4962_v42 = vlaneseq }
 0x538   : > { %v4132_v4 = vpop.f32.mrf.mxu0 }
 0x539   : > { %v8861_v46 = vpop.f32.mrf.mxu1 }
 0x53a   : > { %v4134_v27 = vpop.f32.mrf.mxu0 }
 0x53b   : > { %v4310_v53 = vpop.f32.mrf.mxu1 }
 0x53c   : > { %v4135_v12 = vpop.f32.mrf.mxu0 }
 0x53d   : > { %v8863_v5 = vpop.f32.mrf.mxu1  ;;  %v8882_v12 = vshrl.u32 %v4962_v42, 7 }
 0x53e   : > { %v4137_v18 = vpop.f32.mrf.mxu0 }
 0x53f   : > { %v4315_v52 = vpop.f32.mrf.mxu1  ;;  %v4964_v30 = vadd.s32 8, %v8882_v12 }
 0x540   : > { %v4140_v20 = vpop.f32.mrf.mxu0 }
 0x541   : > { %v8865_v13 = vpop.f32.mrf.mxu1 }
 0x542   : > { %v4142_v56 = vpop.f32.mrf.mxu0 }
 0x543   : > { %v4318_v57 = vpop.f32.mrf.mxu1 }
 0x544   : > { %v4143_v2 = vpop.f32.mrf.mxu0 }
 0x545   : > { %v8870_v43 = vpop.f32.mrf.mxu1 }
 0x546   : > { %v4145_v25 = vpop.f32.mrf.mxu0 }
 0x547   : > { %v4323_v40 = vpop.f32.mrf.mxu1  ;;  %v4290_v25 = vadd.f32 %v8846_v47, %v8788_v60  ;;  %v4298_v60 = vadd.f32 %v8855_v22, %v8802_v32 }
 0x548   : > { %v4148_v45 = vpop.f32.mrf.mxu0 }
 0x549   : > { %v8872_v3 = vpop.f32.mrf.mxu1 }
 0x54a   : > { %v4150_v24 = vpop.f32.mrf.mxu0 }
 0x54b   : > { %v4326_v6 = vpop.f32.mrf.mxu1  ;;  %v4996_v24 = vand.u32 15, %v4964_v30 }
 0x54c   : > { %v4151_v21 = vpop.f32.mrf.mxu0  ;;  %v4293_v6 = vadd.f32 %v8850_v26, %v8791_v50 }
 0x54d   : > { %v8874_v54 = vpop.f32.mrf.mxu1  ;;  %vm5060_vm3 = vcmp.lt.s32.totalorder %v4996_v24, 10  ;;  %v4968_v24 = vadd.s32 40, %v8882_v12 }
 0x54e   : > { %v4153_v61 = vpop.f32.mrf.mxu0 }
 0x54f   : > { %v4331_v59 = vpop.f32.mrf.mxu1 }
 0x550   : > { %v4156_v11 = vpop.f32.mrf.mxu0 }
 0x551   : > { %v8876_v37 = vpop.f32.mrf.mxu1 }
 0x552   : > { %v4158_v17 = vpop.f32.mrf.mxu0 }
 0x553   : > { %v4334_v44 = vpop.f32.mrf.mxu1 }
 0x554   : > { %v4159_v19 = vpop.f32.mrf.mxu0 }
 0x555   : > { %v8878_v29 = vpop.f32.mrf.mxu1  ;;  %v4966_v19 = vadd.s32 24, %v8882_v12 }
 0x556   : > { %v4161_v28 = vpop.f32.mrf.mxu0 }
 0x557   : > { %v4339_v41 = vpop.f32.mrf.mxu1 }
 0x558   : > { %v4164_v4 = vpop.f32.mrf.mxu0 }
 0x559   : > { %v8880_v27 = vpop.f32.mrf.mxu1 }
 0x55a   : > { %v4166_v53 = vpop.f32.mrf.mxu0 }
 0x55b   : > { %v4342_v18 = vpop.f32.mrf.mxu1 }
 0x55c   : > { %v4167_v52 = vpop.f32.mrf.mxu0 }
 0x55d   : > { %v8884_v20 = vpop.f32.mrf.mxu1  ;;  %v4998_v52 = vand.u32 15, %v4966_v19 }
 0x55e   : > { %v4169_v56 = vpop.f32.mrf.mxu0 }
 0x55f   : > { %v4347_v57 = vpop.f32.mrf.mxu1  ;;  %v4301_v56 = vadd.f32 %v8857_v8, %v8806_v35  ;;  %vm5062_vm4 = vcmp.lt.s32.totalorder %v4998_v52, 10 }
 0x560   : > { %v4771_v2 = vpop.f32.mrf.mxu0 }
 0x561   : > { %v8889_v40 = vpop.f32.mrf.mxu1  ;;  %v4898_v61 = vadd.f32 %v4771_v2, %v4290_v25 }
 0x562   : > { %v4773_v45 = vpop.f32.mrf.mxu0 }
 0x563   : > { %v4350_v21 = vpop.f32.mrf.mxu1  ;;  %v4930_v42 = vmax.f32 %v4898_v61, 0.0 }
 0x564   : > { %v4774_v59 = vpop.f32.mrf.mxu0 }
 0x565   : > { %v4899_v11 = vadd.f32 %v4774_v59, %v4293_v6  ;;  %v8893_v17 = vpop.f32.mrf.mxu1  ;;  %v4306_v6 = vadd.f32 %v8859_v0, %v8810_v55  ;;  %v4970_v0 = vadd.s32 56, %v8882_v12 }
 0x566   : > { %v4776_v44 = vpop.f32.mrf.mxu0 }
 0x567   : > { %v4931_v47 = vmax.f32 %v4899_v11, 0.0  ;;  %v4355_v28 = vpop.f32.mrf.mxu1 }
 0x568   : > { %v4779_v41 = vpop.f32.mrf.mxu0 }
 0x569   : > { %v5124_v4 = vsel %vm5060_vm3, %v4931_v47, 0.0  ;;  %v4900_v53 = vadd.f32 %v4779_v41, %v4298_v60  ;;  %v8898_v50 = vpop.f32.mrf.mxu1  ;;  %v5000_v60 = vand.u32 15, %v4968_v24  ;;  %v4309_v47 = vadd.f32 %v8861_v46, %v8815_v63 }
 0x56a   : > { %v5155_v26 = vadd.f32 %v5124_v4, %v4930_v42  ;;  %v4781_v18 = vpop.f32.mrf.mxu0 }
 0x56b   : > { %v4932_v30 = vmax.f32 %v4900_v53, 0.0  ;;  %v4358_v57 = vpop.f32.mrf.mxu1  ;;  %vm5064_vm5 = vcmp.lt.s32.totalorder %v5000_v60, 10  ;;  %v4314_v18 = vadd.f32 %v8863_v5, %v8818_v51  ;;  %v4972_v5 = vadd.s32 72, %v8882_v12 }
 0x56c   : > { %v4782_v2 = vpop.f32.mrf.mxu0 }
 0x56d   : > { %v5156_v25 = vadd.f32 %v5155_v26, %v4932_v30  ;;  %v4901_v45 = vadd.f32 %v4782_v2, %v4301_v56  ;;  %v8902_v32 = vpop.f32.mrf.mxu1 }
 0x56e   : > { %v4784_v22 = vpop.f32.mrf.mxu0 }
 0x56f   : > { %v4933_v21 = vmax.f32 %v4901_v45, 0.0  ;;  %v4363_v61 = vpop.f32.mrf.mxu1  ;;  %v5002_v45 = vand.u32 15, %v4970_v0  ;;  %v4317_v22 = vadd.f32 %v8865_v13, %v8821_v10 }
 0x570   : > { %v4787_v59 = vpop.f32.mrf.mxu0 }
 0x571   : > { %v5126_v11 = vsel %vm5062_vm4, %v4933_v21, 0.0  ;;  %v4902_v44 = vadd.f32 %v4787_v59, %v4306_v6  ;;  %v8907_v35 = vpop.f32.mrf.mxu1  ;;  %vm5066_vm6 = vcmp.lt.s32.totalorder %v5002_v45, 10 }
 0x572   : > { %v5157_v8 = vadd.f32 %v5156_v25, %v5126_v11  ;;  %v4789_v19 = vpop.f32.mrf.mxu0 }
 0x573   : > { %v4934_v28 = vmax.f32 %v4902_v44, 0.0  ;;  %v4366_v42 = vpop.f32.mrf.mxu1  ;;  %v4322_v44 = vadd.f32 %v8870_v43, %v8823_v36  ;;  %v4974_v43 = vadd.s32 88, %v8882_v12 }
 0x574   : > { %v4790_v41 = vpop.f32.mrf.mxu0 }
 0x575   : > { %v5158_v4 = vadd.f32 %v5157_v8, %v4934_v28  ;;  %v4903_v53 = vadd.f32 %v4790_v41, %v4309_v47  ;;  %v4369_v26 = vpop.f32.mrf.mxu1  ;;  %v5004_v41 = vand.u32 15, %v4972_v5  ;;  %v5006_v45 = vand.u32 15, %v4974_v43 }
 0x576   : > { %v4792_v55 = vpop.f32.mrf.mxu0 }
 0x577   : > { %v4935_v52 = vmax.f32 %v4903_v53, 0.0  ;;  %v4371_v56 = vpop.f32.mrf.mxu1  ;;  %vm5068_vm7 = vcmp.lt.s32.totalorder %v5004_v41, 10  ;;  %vm5070_vm8 = vcmp.lt.s32.totalorder %v5006_v45, 10 }
 0x578   : > { %v4795_v30 = vpop.f32.mrf.mxu0  ;;  %v4330_v56 = vadd.f32 %v8874_v54, %v8828_v14  ;;  %v4976_v54 = vadd.s32 104, %v8882_v12 }
 0x579   : > { %v5128_v57 = vsel %vm5064_vm5, %v4935_v52, 0.0  ;;  %v4904_v2 = vadd.f32 %v4795_v30, %v4314_v18  ;;  %v4372_v25 = vpop.f32.mrf.mxu1 }
 0x57a   : > { %v5159_v63 = vadd.f32 %v5158_v4, %v5128_v57  ;;  %v4797_v46 = vpop.f32.mrf.mxu0  ;;  %v4325_v4 = vadd.f32 %v8872_v3, %v8825_v58 }
 0x57b   : > { %v4936_v24 = vmax.f32 %v4904_v2, 0.0  ;;  %v4374_v6 = vpop.f32.mrf.mxu1 }
 0x57c   : > { %v4798_v21 = vpop.f32.mrf.mxu0 }
 0x57d   : > { %v5160_v61 = vadd.f32 %v5159_v63, %v4936_v24  ;;  %v4905_v59 = vadd.f32 %v4798_v21, %v4317_v22  ;;  %v4377_v11 = vpop.f32.mrf.mxu1  ;;  %v4333_v22 = vadd.f32 %v8876_v37, %v8830_v16 }
 0x57e   : > { %v4800_v51 = vpop.f32.mrf.mxu0 }
 0x57f   : > { %v4937_v8 = vmax.f32 %v4905_v59, 0.0  ;;  %v4379_v19 = vpop.f32.mrf.mxu1  ;;  %v4338_v51 = vadd.f32 %v8878_v29, %v8832_v48  ;;  %v4978_v48 = vadd.s32 120, %v8882_v12 }
 0x580   : > { %v4803_v60 = vpop.f32.mrf.mxu0 }
 0x581   : > { %v5130_v47 = vsel %vm5066_vm6, %v4937_v8, 0.0  ;;  %v4906_v28 = vadd.f32 %v4803_v60, %v4322_v44  ;;  %v4380_v42 = vpop.f32.mrf.mxu1 }
 0x582   : > { %v5161_v10 = vadd.f32 %v5160_v61, %v5130_v47  ;;  %v4805_v13 = vpop.f32.mrf.mxu0  ;;  %v4341_v42 = vadd.f32 %v8880_v27, %v8834_v39  ;;  %v5010_v27 = vand.u32 15, %v4978_v48 }
 0x583   : > { %v4938_v53 = vmax.f32 %v4906_v28, 0.0  ;;  %v4382_v26 = vpop.f32.mrf.mxu1  ;;  %v5008_v28 = vand.u32 15, %v4976_v54 }
 0x584   : > { %v4806_v55 = vpop.f32.mrf.mxu0  ;;  %vm5074_vm11 = vcmp.lt.s32.totalorder %v5010_v27, 10 }
 0x585   : > { %v5162_v0 = vadd.f32 %v5161_v10, %v4938_v53  ;;  %v4907_v18 = vadd.f32 %v4806_v55, %v4325_v4  ;;  %v4385_v52 = vpop.f32.mrf.mxu1  ;;  %vm5072_vm9 = vcmp.lt.s32.totalorder %v5008_v28, 10  ;;  %v4346_v55 = vadd.f32 %v8884_v20, %v8837_v62 }
 0x586   : > { %v4808_v36 = vpop.f32.mrf.mxu0  ;;  %v4980_v62 = vadd.s32 136, %v8882_v12 }
 0x587   : > { %v4939_v30 = vmax.f32 %v4907_v18, 0.0  ;;  %v4387_v57 = vpop.f32.mrf.mxu1 }
 0x588   : > { %v4811_v2 = vpop.f32.mrf.mxu0  ;;  %v4349_v57 = vadd.f32 %v8889_v40, %v8839_v33  ;;  %v5012_v40 = vand.u32 15, %v4980_v62  ;;  %v6629_v62 = vld [vmem:[%s9033_s6 + $0x8] sm:$0xff]  }
 0x589   : > { %v5132_v25 = vsel %vm5068_vm7, %v4939_v30, 0.0  ;;  %v4908_v63 = vadd.f32 %v4811_v2, %v4330_v56  ;;  %v4388_v46 = vpop.f32.mrf.mxu1 }
 0x58a   : > { %v5163_v58 = vadd.f32 %v5162_v0, %v5132_v25  ;;  %v4813_v3 = vpop.f32.mrf.mxu0  ;;  %vm5076_vm14 = vcmp.lt.s32.totalorder %v5012_v40, 10 }
 0x58b   : > { %v4940_v24 = vmax.f32 %v4908_v63, 0.0  ;;  %v4390_v6 = vpop.f32.mrf.mxu1 }
 0x58c   : > { %v4814_v21 = vpop.f32.mrf.mxu0 }
 0x58d   : > { %v5164_v61 = vadd.f32 %v5163_v58, %v4940_v24  ;;  %v4909_v59 = vadd.f32 %v4814_v21, %v4333_v22  ;;  %v4393_v11 = vpop.f32.mrf.mxu1  ;;  %v4354_v22 = vadd.f32 %v8893_v17, %v8842_v34  ;;  %v4362_v34 = vadd.f32 %v8902_v32, %v8848_v7 }
 0x58e   : > { %v4816_v14 = vpop.f32.mrf.mxu0 }
 0x58f   : > { %v4941_v5 = vmax.f32 %v4909_v59, 0.0  ;;  %v4395_v44 = vpop.f32.mrf.mxu1  ;;  %v4357_v14 = vadd.f32 %v8898_v50, %v8844_v23  ;;  %v4365_v23 = vadd.f32 %v8907_v35, %v8852_v31 }
 0x590   : > { %v4819_v8 = vpop.f32.mrf.mxu0 }
 0x591   : > { %v5134_v19 = vsel %vm5070_vm8, %v4941_v5, 0.0  ;;  %v4910_v60 = vadd.f32 %v4819_v8, %v4338_v51  ;;  %v4396_v47 = vpop.f32.mrf.mxu1 }
 0x592   : > { %v5165_v16 = vadd.f32 %v5164_v61, %v5134_v19  ;;  %v4821_v37 = vpop.f32.mrf.mxu0  ;;  %v4982_v19 = vadd.s32 152, %v8882_v12 }
 0x593   : > { %v4942_v10 = vmax.f32 %v4910_v60, 0.0  ;;  %v4398_v13 = vpop.f32.mrf.mxu1 }
 0x594   : > { %v4822_v41 = vpop.f32.mrf.mxu0 }
 0x595   : > { %v5166_v4 = vadd.f32 %v5165_v16, %v4942_v10  ;;  %v4911_v53 = vadd.f32 %v4822_v41, %v4341_v42  ;;  %v4401_v29 = vpop.f32.mrf.mxu1  ;;  %v5014_v42 = vand.u32 15, %v4982_v19 }
 0x596   : > { %v4824_v26 = vpop.f32.mrf.mxu0 }
 0x597   : > { %v4943_v0 = vmax.f32 %v4911_v53, 0.0  ;;  %v4403_v52 = vpop.f32.mrf.mxu1  ;;  %vm5078_vm12 = vcmp.lt.s32.totalorder %v5014_v42, 10 }
 0x598   : > { %v4827_v18 = vpop.f32.mrf.mxu0 }
 0x599   : > { %v5136_v36 = vsel %vm5072_vm9, %v4943_v0, 0.0  ;;  %v4912_v43 = vadd.f32 %v4827_v18, %v4346_v55  ;;  %v4404_v30 = vpop.f32.mrf.mxu1 }
 0x59a   : > { %v5167_v56 = vadd.f32 %v5166_v4, %v5136_v36  ;;  %v4829_v39 = vpop.f32.mrf.mxu0 }
 0x59b   : > { %v4944_v2 = vmax.f32 %v4912_v43, 0.0  ;;  %v4406_v63 = vpop.f32.mrf.mxu1 }
 0x59c   : > { %v4830_v25 = vpop.f32.mrf.mxu0  ;;  %v6625_v63 = vld [vmem:[%s9033_s6 + $0x28] sm:$0xff]  }
 0x59d   : > { %v5168_v46 = vadd.f32 %v5167_v56, %v4944_v2  ;;  %v4913_v58 = vadd.f32 %v4830_v25, %v4349_v57  ;;  %v4409_v20 = vpop.f32.mrf.mxu1  ;;  %v6623_v57 = vld [vmem:[%s9033_s6 + $0x38] sm:$0xff]   ;;  %v6624_v25 = vld [vmem:[%s9033_s6 + $0x30] sm:$0xff]  }
 0x59e   : > { %v4832_v3 = vpop.f32.mrf.mxu0  ;;  %v6630_v20 = vld [vmem:[%s9033_s6] sm:$0xff]  }
 0x59f   : > { %v4945_v45 = vmax.f32 %v4913_v58, 0.0  ;;  %v4411_v6 = vpop.f32.mrf.mxu1  ;;  %v6627_v58 = vld [vmem:[%s9033_s6 + $0x18] sm:$0xff]   ;;  %v6628_v3 = vld [vmem:[%s9033_s6 + $0x10] sm:$0xff]  }
 0x5a0   : > { %v4835_v24 = vpop.f32.mrf.mxu0  ;;  %v6636_v6 = vld [vmem:[#allocation3 + $0x110] ss:$8 sps:$4 sm:$0xff]  }
 0x5a1   : > { %v5138_v21 = vsel %vm5074_vm11, %v4945_v45, 0.0  ;;  %v4914_v59 = vadd.f32 %v4835_v24, %v4354_v22  ;;  %v4412_v11 = vpop.f32.mrf.mxu1  ;;  %v6631_v45 = vld [vmem:[#allocation3 + $0xe4] ss:$8 sps:$4 sm:$0xff]   ;;  %v6633_v22 = vld [vmem:[#allocation3 + $0xe0] ss:$8 sps:$4 sm:$0xff]  }
 0x5a2   : > { %v5169_v61 = vadd.f32 %v5168_v46, %v5138_v21  ;;  %v4837_v33 = vpop.f32.mrf.mxu0  ;;  %v6626_v46 = vld [vmem:[%s9033_s6 + $0x20] sm:$0xff]   ;;  %5941 = vmatprep.mubr.msk.bf16.mxu0 %vm3961_vm15, %v6631_v45  ;;  %v6634_v24 = vld [vmem:[#allocation3 + $0x114] ss:$8 sps:$4 sm:$0xff]  }
 0x5a3   : > { %v4414_v51 = vpop.f32.mrf.mxu1  ;;  %v4946_v44 = vmax.f32 %v4914_v59, 0.0  ;;  %4866 = vmatmul.mubr.bf16.gmra.mxu0 %v6633_v22 }
 0x5a4   : > { %v4838_v54 = vpop.f32.mrf.mxu0  ;;  %5942 = vmatprep.mubr.msk.bf16.mxu0 %vm3961_vm15, %v8721_v15 }
 0x5a5   : > { %v4915_v5 = vadd.f32 %v4838_v54, %v4357_v14  ;;  %v5170_v37 = vadd.f32 %v5169_v61, %v4946_v44 }
 0x5a6   : > { %v4840_v8 = vpop.f32.mrf.mxu0 }
 0x5a7   : > { %v4947_v17 = vmax.f32 %v4915_v5, 0.0 }
 0x5a8   : > { %v4843_v60 = vpop.f32.mrf.mxu0 }
 0x5a9   : > { %v5140_v47 = vsel %vm5076_vm14, %v4947_v17, 0.0  ;;  %v4916_v16 = vadd.f32 %v4843_v60, %v4362_v34 }
 0x5aa   : > { %v4845_v28 = vpop.f32.mrf.mxu0  ;;  %v5171_v50 = vadd.f32 %v5170_v37, %v5140_v47 }
 0x5ab   : > { %v4948_v10 = vmax.f32 %v4916_v16, 0.0  ;;  %4874 = vmatmul.mubr.bf16.gmra.mxu0 %v8728_v1  ;;  %v5317_v28 = vld [vmem:[%s9034_s7] sm:$0x1] }
 0x5ac   : > { %v4846_v13 = vpop.f32.mrf.mxu0  ;;  %5943 = vmatprep.mubr.msk.bf16.mxu0 %vm3961_vm15, %v8730_v49 }
 0x5ad   : > { %v4917_v41 = vadd.f32 %v4846_v13, %v4365_v23  ;;  %v5172_v53 = vadd.f32 %v5171_v50, %v4948_v10 }
 0x5ae   : > { %v4848_v4 = vpop.f32.mrf.mxu0 }
 0x5af   : > { %v4949_v12 = vmax.f32 %v4917_v41, 0.0 }
 0x5b0   : > { %v4851_v26 = vpop.f32.mrf.mxu0 }
 0x5b1   : > { %v5142_v7 = vsel %vm5078_vm12, %v4949_v12, 0.0 }
 0x5b2   : > { %v5173_v32 = vadd.f32 %v5172_v53, %v5142_v7  ;;  %v4853_v48 = vpop.f32.mrf.mxu0 }
 0x5b3   : > { %4882 = vmatmul.mubr.bf16.gmra.mxu0 %v8738_v38 }
 0x5b4   : > { %v5186_v29 = vrot.slane %v5173_v32, 4  ;;  %v4854_v55 = vpop.f32.mrf.mxu0  ;;  %5944 = vmatprep.mubr.msk.bf16.mxu0 %vm3961_vm15, %v6634_v24  ;;  %vm5407_vm15 = vcmask 1040384  }
 0x5b6   : > { %v5187_v0 = vadd.f32 %v5186_v29, %v5173_v32  ;;  %v4856_v18 = vpop.f32.mrf.mxu0 }
 0x5b8   : > { %v5188_v52 = vrot.slane %v5187_v0, 2  ;;  %v4859_v36 = vpop.f32.mrf.mxu0 }
 0x5ba   : > { %v5189_v43 = vadd.f32 %v5188_v52, %v5187_v0  ;;  %v4861_v31 = vpop.f32.mrf.mxu0 }
 0x5bb   : > { %4890 = vmatmul.mubr.bf16.gmra.mxu0 %v6636_v6 }
 0x5bc   : > { %v5190_v35 = vrot.slane %v5189_v43, 1  ;;  %v4862_v56 = vpop.f32.mrf.mxu0 }
 0x5be   : > { %v5191_v39 = vadd.f32 %v5190_v35, %v5189_v43  ;;  %v4864_v27 = vpop.f32.mrf.mxu0 }
 0x5c0   : > { %v5192_v30 = vmul.f32 0.01, %v5191_v39 }
 0x5c2   : > { %v5193_v2 = vpack.c.bf16 %v5192_v30, %v5192_v30 }
 0x5c4   : > { %6371 = vmatmul.mubr.bf16.vlgmr.msra.gmra.mxu1 %v5193_v2 }
 0x5c5   : > { %6375 = vmatpush3.bf16.msra.mxu1 %v6623_v57  ;;  %6390 = vmatprep.mubr.msk.bf16.mxu1 %vm6771_vm10, %v6770_v9 }
 0x5c6   : > { %6376 = vmatprep.subr.bf16.mxu1 %v6770_v9 }
 0x5c9   : > { %6377 = vmatpush3.bf16.msra.mxu1 %v6624_v25 }
 0x5ca   : > { %6378 = vmatprep.subr.bf16.mxu1 %v6770_v9 }
 0x5cd   : > { %6379 = vmatpush3.bf16.msra.mxu1 %v6625_v63 }
 0x5ce   : > { %6380 = vmatprep.subr.bf16.mxu1 %v6770_v9 }
 0x5d1   : > { %6381 = vmatpush3.bf16.msra.mxu1 %v6626_v46 }
 0x5d2   : > { %6382 = vmatprep.subr.bf16.mxu1 %v6770_v9 }
 0x5d5   : > { %6383 = vmatpush3.bf16.msra.mxu1 %v6627_v58 }
 0x5d6   : > { %6384 = vmatprep.subr.bf16.mxu1 %v6770_v9 }
 0x5d9   : > { %6385 = vmatpush3.bf16.msra.mxu1 %v6628_v3 }
 0x5da   : > { %6386 = vmatprep.subr.bf16.mxu1 %v6770_v9 }
 0x5dd   : > { %6387 = vmatpush3.bf16.msra.mxu1 %v6629_v62 }
 0x5de   : > { %6388 = vmatprep.subr.bf16.mxu1 %v6770_v9  ;;  %v5210_v9 = vld [vmem:[%s9032_s5] sm:$0x1] }
 0x5e1   : > { %6389 = vmatpush3.bf16.msra.mxu1 %v6630_v20 }
 0x663   : > { %v4867_v49 = vpop.f32.mrf.mxu0 }
 0x665   : > { %v4869_v11 = vpop.f32.mrf.mxu0 }
 0x667   : > { %v4870_v14 = vpop.f32.mrf.mxu0 }
 0x669   : > { %v4872_v38 = vpop.f32.mrf.mxu0 }
 0x66b   : > { %v4875_v54 = vpop.f32.mrf.mxu0 }
 0x66d   : > { %v4877_v51 = vpop.f32.mrf.mxu0 }
 0x66f   : > { %v4878_v5 = vpop.f32.mrf.mxu0 }
 0x671   : > { %v4880_v44 = vpop.f32.mrf.mxu0 }
 0x673   : > { %v4883_v8 = vpop.f32.mrf.mxu0 }
 0x675   : > { %v4885_v19 = vpop.f32.mrf.mxu0 }
 0x677   : > { %v4886_v34 = vpop.f32.mrf.mxu0 }
 0x679   : > { %v4888_v17 = vpop.f32.mrf.mxu0 }
 0x67b   : > { %v4891_v60 = vpop.f32.mrf.mxu0 }
 0x67d   : > { %v4893_v47 = vpop.f32.mrf.mxu0 }
 0x67f   : > { %v4894_v16 = vpop.f32.mrf.mxu0 }
 0x681   : > { %v4896_v37 = vpop.f32.mrf.mxu0 }
 0x684   : > { %v5293_v21 = vpop.f32.mrf.mxu1 }
 0x685   : > { %v5294_v61 = vadd.f32 %v5293_v21, %v5210_v9 }
 0x686   : > { %v6372_v59 = vpop.f32.mrf.mxu1 }
 0x687   : > { %v5299_v15 = vmax.f32 %v5294_v61, 0.0 }
 0x688   : > { %v5296_v33 = vpop.f32.mrf.mxu1 }
 0x689   : > { %v5300_v1 = vpack.c.bf16 %v5299_v15, %v5299_v15 }
 0x68a   : > { %v6373_v40 = vpop.f32.mrf.mxu1 }
 0x68b   : > { %6391 = vmatmul.mubr.bf16.vlgmr.msra.gmra.mxu1 %v5300_v1 }
 0x74b   : > { %v5400_v42 = vpop.f32.mrf.mxu1 }
 0x74c   : > { %v5401_v23 = vadd.f32 %v5400_v42, %v5317_v28 }
 0x74d   : > { %v6392_v50 = vpop.f32.mrf.mxu1 }
 0x74e   : > { %v5406_v10 = vmul.f32 %v5401_v23, %v5401_v23 }
 0x74f   : > { %v5403_v13 = vpop.f32.mrf.mxu1 }
 0x750   : > { %v5408_v41 = vsel %vm5407_vm15, %v5406_v10, 0.0 }
 0x751   : > { %5409 = vadd.xlane.f32.xlu0 %v5408_v41  ;;  %v6393_v4 = vpop.f32.mrf.mxu1 }
 0x7da   : > { %v5410_v12 = vpop.xlane.xlu0 %5409 }
 0x7db   : > { %v5411_v53 = vmax.f32 %v5410_v12, 1e-24 }
 0x7dd   : > { %6637 = vrsqrt.f32 %v5411_v53 }
 0x7ea   : > { %v6638_v26 = vpop.eup %6637 }
 0x7eb   : > { %v5413_v7 = vmul.f32 %v6638_v26, %v5401_v23 }
 0x7ed   : > { %5414 = vst [vmem:[%s327_s17] sm:$0x1] %v5413_v7 }
 0x7ee   : > { %6704 = shalt.err (!%p6701_p3)
}
 0x7ef   : > { %s6705_s18 = scalar_lea.hbm %s5426_s25, 16  ;;  %s6709_s21 = scalar_lea.hbm %s9035_s8, 32 }
 0x7f0   : > { %p6706_p2 = scmp.ne.s32.totalorder %s5426_s25, %s6705_s18  ;;  %p6710_p7 = scmp.lt.s32.totalorder %s5426_s25, %s9035_s8 }
 0x7f1   : > { %p6711_p6 = scmp.lt.s32.totalorder %s6709_s21, %s6705_s18 }
 0x7f2   : > { %p6707_p4 = pnand %p6706_p2, %p6856_p5 }
 0x7f3   : > { %p6712_p9 = por %p6711_p6, %p6710_p7 }
 0x7f4   : > { %p6708_p13 = pneg %p6707_p4 }
 0x7f6   : > { %p6713_p10 = pnand %p6712_p9, %p6708_p13 }
 0x7f8   : > { %6716 = shalt.err (!%p6713_p10)
}
 0x7f9   : > { %6408 = dma.vmem_to_hbm [thread:$0]  (%p6856_p5), %s5429_s22, 16, %s5426_s25, %s5416_s26  }
 0x7fa PF: > { %p6425_p12 = scmp.ge.s32.totalorder %s6759_s30, 2  ;;  %s5440_s24 = sand.u32 1, %s6747_s27  }
 0x7fb   : > { %p9049_p8 = scmp.ne.s32.totalorder %s9038_s16, 0  ;;  %s5441_s10 = scalar_lea.sflag [#allocation6], %s5440_s24 }
 0x7fd   : > { %p6418_p11 = pnand %p6425_p12, %p9049_p8 }
 0x7ff   : > { %p6419_p0 = pneg %p6418_p11 }
 0x801   : > { %6742 = dma.done.wait (%p6419_p0), %s5441_s10, 16  }
 0x802   : > { %6744 = vsyncadd (%p6419_p0), %s5441_s10, 4294967280  ;;  %p20_p1 = scmp.ge.s32.totalorder %s6843_s11, 4   ;;  %s9050_s27 = smov %s6751_s28 }
 0x803   : > { %s9051_s28 = smov %s6755_s29  ;;  %s9052_s29 = smov %s6854_s14 }
 0x804   : > { %s9053_s30 = smov %s6843_s11  ;;  %22 = sbr.rel (!%p20_p1) target bundleno = 5 (0x5), region = 102 }
 0x809   :  { %5445 = vsyncpa [#allocation5], 1 }
 0x80a   :  { %5447 = vsyncpa [#allocation5 + $0x1], 1 }
 0x80b   :  { %5448 = vsyncpa [#allocation8], 1 }
 0x80c   :  { %5449 = vsyncpa [#allocation6], 1 }
 0x80d   :  { %5451 = vsyncpa [#allocation6 + $0x1], 1 }

</bundles_post_ra>
